<compile_context>
chip_gen: v6e
topology: v6e:2x2x1
jax: 0.10.0
libtpu: 0.0.40
codegen_flags: <defaults>
</compile_context>

<pallas_src>
import jax
import jax.numpy as jnp
import numpy as np
from jax.experimental import pallas as pl
from jax.experimental.pallas import tpu as pltpu

LABEL_PAD = 128  # lane-dense classifier/output width (real label count L <= 128)


def sc_eval_kernel(counts_ref, msum_ref, table_ref, wp_ref, bp_ref,
                   wc_ref, bc_ref, probs_ref, acc_ref):
    """Fused embed+pool (K-tiled) + pooler + classifier + softmax.

    counts_ref: (TB, TK)  bf16  masked bag-of-(token|segment|position) histogram tile
    msum_ref:   (TB, 1)   f32   number of real tokens per row
    table_ref:  (TK, H)   bf16  K-tile of concat(tok_emb, seg_emb, pos_emb, 0-pad)
    wp/bp:      (H, H) bf16 / (1, H) f32        BERT pooler
    wc/bc:      (H, 128) bf16 / (1, 128) f32    classifier padded to 128 labels
                (pad weights are 0, pad biases are -1e30 so softmax ignores them)
    probs_ref:  (TB, 128) f32   softmax probabilities (pad lanes exactly 0)
    acc_ref:    (TB, H)   f32   VMEM accumulator for the pooled masked sum
    """
    k = pl.program_id(1)

    @pl.when(k == 0)
    def _init():
        acc_ref[...] = jnp.zeros_like(acc_ref)

    # Masked-sum pooling, K-tiled: bf16 MXU matmul with f32 accumulation.
    acc_ref[...] += jnp.dot(counts_ref[...], table_ref[...],
                            preferred_element_type=jnp.float32)

    @pl.when(k == pl.num_programs(1) - 1)
    def _epilogue():
        # Masked mean; guard all-padding rows; reciprocal on the EUP slot.
        inv_len = pl.reciprocal(jnp.maximum(msum_ref[...], 1.0), approx=True)
        # Cast activations down to bf16 so the weight matmuls stay on the fast
        # bf16 MXU path (weights are already bf16; accumulation stays f32).
        pooled_in = (acc_ref[...] * inv_len).astype(wp_ref.dtype)       # (TB, H)

        pooled_f32 = jnp.dot(pooled_in, wp_ref[...],
                             preferred_element_type=jnp.float32) + bp_ref[...]
        pooled = jnp.tanh(pooled_f32)                                    # (TB, H) f32

        logits = jnp.dot(pooled.astype(wc_ref.dtype), wc_ref[...],
                         preferred_element_type=jnp.float32) + bc_ref[...]  # (TB, 128)

        # Numerically-stable softmax (PyTorch: softmax(logits, dim=1)); pad
        # lanes carry a -1e30 bias so their exp underflows to exactly 0.
        # Exact divide for the normalization so rows sum to 1.
        mx = jnp.max(logits, axis=-1, keepdims=True)
        e = jnp.exp(logits - mx)
        probs_ref[...] = e / jnp.sum(e, axis=-1, keepdims=True)


def sc_evaluate(input_ids, input_mask, segment_ids,
                tok_emb, seg_emb, pos_emb, w_pool, b_pool, w_cls, b_cls,
                *, tile_b=128, tile_k=512):
    """Surrogate of SC.evaluate(): returns softmax probabilities of shape (B, L).

    The (B, S, H) embedded activation tensor is never formed: masked-sum
    embedding pooling is recast as counts @ table, K-tiled inside the kernel.
    """
    B, S = input_ids.shape
    V, H = tok_emb.shape
    L = w_cls.shape[1]
    assert L <= LABEL_PAD

    # ---- JAX glue: per-row masked histogram via fused one-hot compare+reduce
    # (dense VPU compare/select/sum; no serialized XLA scatter). -------------
    m = input_mask.astype(jnp.float32)                                   # (B, S)
    tok_counts = jnp.sum(jax.nn.one_hot(input_ids, V, dtype=jnp.float32)
                         * m[:, :, None], axis=1)                        # (B, V)
    seg_counts = jnp.sum(jax.nn.one_hot(segment_ids, 2, dtype=jnp.float32)
                         * m[:, :, None], axis=1)                        # (B, 2)

    # Counts are per-token occurrence sums <= S, exact in bf16 only for S < 256.
    io_dtype = jnp.bfloat16 if S < 256 else jnp.float32

    K = V + 2 + S
    K_pad = tile_k * pl.cdiv(K, tile_k)            # K-tile-align the reduction dim
    counts = jnp.concatenate(
        [tok_counts, seg_counts, m, jnp.zeros((B, K_pad - K), jnp.float32)],
        axis=1).astype(io_dtype)                                         # (B, Kp)
    table = jnp.concatenate(
        [tok_emb, seg_emb, pos_emb, jnp.zeros((K_pad - K, H), jnp.float32)],
        axis=0).astype(io_dtype)                                         # (Kp, H)
    msum = jnp.sum(m, axis=1, keepdims=True)                             # (B, 1)

    # Lane-dense classifier: pad to 128 labels (0 weights, -1e30 biases; the
    # bias add / softmax stay f32 so -1e30 is safe).
    wc = jnp.concatenate(
        [w_cls, jnp.zeros((H, LABEL_PAD - L), w_cls.dtype)], axis=1
    ).astype(jnp.bfloat16)                                               # (H, 128)
    bc = jnp.concatenate(
        [b_cls.astype(jnp.float32),
         jnp.full((1, LABEL_PAD - L), -1e30, jnp.float32)], axis=1)      # (1, 128)
    wp = w_pool.astype(jnp.bfloat16)                                     # (H, H)
    bp = b_pool.astype(jnp.float32)                                      # (1, H)

    # Pad batch to a multiple of tile_b (padded rows are all-zero and harmless).
    B_pad = tile_b * pl.cdiv(B, tile_b)
    if B_pad != B:
        counts = jnp.pad(counts, ((0, B_pad - B), (0, 0)))
        msum = jnp.pad(msum, ((0, B_pad - B), (0, 0)))

    grid = (B_pad // tile_b, K_pad // tile_k)      # K axis last ("arbitrary")

    # Explicit VMEM budget: streamed blocks double-buffered, invariant weights
    # single-buffered, plus output / scratch; 2x headroom, capped for v7x.
    elt = jnp.dtype(io_dtype).itemsize
    vmem_bytes = (2 * tile_b * tile_k * elt            # counts (2 bufs)
                  + 2 * tile_k * H * elt               # table  (2 bufs)
                  + 2 * tile_b * 4                     # msum
                  + (H * H + H * LABEL_PAD) * 2        # wp + wc (1 buf, bf16)
                  + (H + LABEL_PAD) * 4                # bp + bc
                  + 2 * tile_b * LABEL_PAD * 4         # probs out (2 bufs)
                  + tile_b * H * 4)                    # acc scratch
    vmem_limit = int(min(2 * vmem_bytes + (4 << 20), 64 << 20))

    def build_call(single_buffer_invariants):
        inv_kw = ({"pipeline_mode": pl.Buffered(1)}
                  if single_buffer_invariants else {})
        return pl.pallas_call(
            sc_eval_kernel,
            out_shape=jax.ShapeDtypeStruct((B_pad, LABEL_PAD), jnp.float32),
            grid_spec=pltpu.PrefetchScalarGridSpec(
                num_scalar_prefetch=0,
                grid=grid,
                in_specs=[
                    pl.BlockSpec((tile_b, tile_k), lambda i, k: (i, k)),   # counts
                    pl.BlockSpec((tile_b, 1), lambda i, k: (i, 0)),        # msum
                    pl.BlockSpec((tile_k, H), lambda i, k: (k, 0)),        # table
                    pl.BlockSpec((H, H), lambda i, k: (0, 0), **inv_kw),   # wp
                    pl.BlockSpec((1, H), lambda i, k: (0, 0), **inv_kw),   # bp
                    pl.BlockSpec((H, LABEL_PAD), lambda i, k: (0, 0), **inv_kw),  # wc
                    pl.BlockSpec((1, LABEL_PAD), lambda i, k: (0, 0), **inv_kw),  # bc
                ],
                out_specs=pl.BlockSpec((tile_b, LABEL_PAD), lambda i, k: (i, 0)),
                scratch_shapes=[pltpu.VMEM((tile_b, H), jnp.float32)],
            ),
            compiler_params=pltpu.CompilerParams(
                dimension_semantics=("parallel", "arbitrary"),
                vmem_limit_bytes=vmem_limit,
            ),
        )

    args = (counts, msum, table, wp, bp, wc, bc)
    try:
        probs_pad = build_call(True)(*args)
    except Exception:
        # Fallback for jax builds that reject single-buffered (Buffered(1))
        # BlockSpecs; identical semantics, just default double-buffering.
        probs_pad = build_call(False)(*args)

    return probs_pad[:B, :L]


if __name__ == "__main__":
    # Demo shapes: B=256 sentences (two 128-row batch tiles -> both TCs busy),
    # max_seq_length S=16, hidden H=128, num_labels L=2, vocab V=512.
    # tile_k=256 -> 3 K steps, so the reduction pipeline is actually exercised.
    B, S, H, L, V = 256, 16, 128, 2, 512
    TILE_B, TILE_K = 128, 256

    key = jax.random.PRNGKey(0)
    k_tok, k_pos, k_seg, k_wp, k_wc, k_ids, k_len = jax.random.split(key, 7)

    def bf16_exact(x):
        # Round params to bf16-representable values so the kernel's bf16 HBM
        # transfer is lossless w.r.t. the f32 reference below.
        return x.astype(jnp.bfloat16).astype(jnp.float32)

    # Deterministic synthetic "BERT" parameters (no checkpoint loading).
    tok_emb = bf16_exact(0.02 * jax.random.normal(k_tok, (V, H), jnp.float32))
    pos_emb = bf16_exact(0.02 * jax.random.normal(k_pos, (S, H), jnp.float32))
    seg_emb = bf16_exact(0.02 * jax.random.normal(k_seg, (2, H), jnp.float32))
    w_pool = bf16_exact(0.05 * jax.random.normal(k_wp, (H, H), jnp.float32))
    b_pool = jnp.zeros((1, H), jnp.float32)
    w_cls = bf16_exact(0.05 * jax.random.normal(k_wc, (H, L), jnp.float32))
    b_cls = jnp.zeros((1, L), jnp.float32)

    # Synthetic tokenized sentences: [CLS] tok ... tok [SEP] pad ...
    input_ids = jax.random.randint(k_ids, (B, S), 5, V, dtype=jnp.int32)
    lengths = jax.random.randint(k_len, (B,), 4, S + 1, dtype=jnp.int32)
    positions = jnp.arange(S, dtype=jnp.int32)[None, :]
    input_mask = (positions < lengths[:, None]).astype(jnp.float32)      # (B, S)
    segment_ids = jnp.zeros((B, S), jnp.int32)

    probs = sc_evaluate(input_ids, input_mask, segment_ids,
                        tok_emb, seg_emb, pos_emb,
                        w_pool, b_pool, w_cls, b_cls,
                        tile_b=TILE_B, tile_k=TILE_K)
    probs = jax.block_until_ready(probs)
    preds = jax.block_until_ready(jnp.argmax(probs, axis=1))  # np.argmax(preds[0], 1)

    # Pure-JAX f32 reference (materializes h; the kernel never does).
    h = tok_emb[input_ids] + pos_emb[None, :, :] + seg_emb[segment_ids]  # (B,S,H)
    msum = jnp.maximum(jnp.sum(input_mask, axis=1, keepdims=True), 1.0)
    pooled_in = jnp.sum(h * input_mask[:, :, None], axis=1) / msum
    pooled = jnp.tanh(pooled_in @ w_pool + b_pool)
    logits = pooled @ w_cls + b_cls
    probs_ref = jax.nn.softmax(logits, axis=1)

    # bf16 activations/operands + approx 1/len => modest tolerance; softmax
    # normalization is an exact divide so rows sum to 1.
    np.testing.assert_allclose(np.asarray(probs), np.asarray(probs_ref),
                               rtol=2e-2, atol=2e-2)
    assert probs.shape == (B, L) and preds.shape == (B,)
    assert np.allclose(np.asarray(probs).sum(axis=1), 1.0, atol=1e-4)

    print("KERNEL_OK")
</pallas_src>

<mosaic_0001>
module attributes {stable_mosaic.version = 11 : i64} {
  func.func @sc_eval_kernel(%arg0: i32, %arg1: i32, %arg2: memref<128x256xbf16, #tpu.memory_space<vmem>>, %arg3: memref<128x1xf32, #tpu.memory_space<vmem>>, %arg4: memref<256x128xbf16, #tpu.memory_space<vmem>>, %arg5: memref<128x128xbf16, #tpu.memory_space<vmem>>, %arg6: memref<1x128xf32, #tpu.memory_space<vmem>>, %arg7: memref<128x128xbf16, #tpu.memory_space<vmem>>, %arg8: memref<1x128xf32, #tpu.memory_space<vmem>>, %arg9: memref<128x128xf32, #tpu.memory_space<vmem>>, %arg10: memref<128x128xf32, #tpu.memory_space<vmem>>) attributes {dimension_semantics = [#tpu.dimension_semantics<parallel>, #tpu.dimension_semantics<arbitrary>], iteration_bounds = array<i64: 2, 3>, scalar_prefetch = 0 : i64, scratch_operands = 1 : i64, tpu.core_type = #tpu.core_type<tc>, window_params = [{transform_indices = @transform_0, window_bounds = array<i64: 128, 256>}, {transform_indices = @transform_1, window_bounds = array<i64: 128, 1>}, {transform_indices = @transform_2, window_bounds = array<i64: 256, 128>}, {pipeline_mode = #tpu.pipeline_mode<synchronous>, transform_indices = @transform_3, window_bounds = array<i64: 128, 128>}, {pipeline_mode = #tpu.pipeline_mode<synchronous>, transform_indices = @transform_4, window_bounds = array<i64: 1, 128>}, {pipeline_mode = #tpu.pipeline_mode<synchronous>, transform_indices = @transform_5, window_bounds = array<i64: 128, 128>}, {pipeline_mode = #tpu.pipeline_mode<synchronous>, transform_indices = @transform_6, window_bounds = array<i64: 1, 128>}, {transform_indices = @transform_7, window_bounds = array<i64: 128, 128>}]} {
    %c0_i32 = arith.constant 0 : i32
    %0 = arith.cmpi eq, %arg1, %c0_i32 : i32
    %1 = arith.extui %0 : i1 to i32
    %c0_i32_0 = arith.constant 0 : i32
    %2 = arith.cmpi ne, %1, %c0_i32_0 : i32
    scf.if %2 {
      %cst_9 = arith.constant 0.000000e+00 : f32
      %12 = vector.broadcast %cst_9 : f32 to vector<128x128xf32>
      %c0_10 = arith.constant 0 : index
      %c0_11 = arith.constant 0 : index
      %13 = vector.load %arg10[%c0_10, %c0_11] : memref<128x128xf32, #tpu.memory_space<vmem>>, vector<128x128xf32>
      tpu.vector_store %arg10[%c0_10, %c0_11], %12 {strides = array<i32>} : memref<128x128xf32, #tpu.memory_space<vmem>>, vector<128x128xf32>,
    } else {
    }
    %c0 = arith.constant 0 : index
    %c0_1 = arith.constant 0 : index
    %3 = vector.load %arg10[%c0, %c0_1] : memref<128x128xf32, #tpu.memory_space<vmem>>, vector<128x128xf32>
    %c0_2 = arith.constant 0 : index
    %c0_3 = arith.constant 0 : index
    %4 = vector.load %arg2[%c0_2, %c0_3] : memref<128x256xbf16, #tpu.memory_space<vmem>>, vector<128x256xbf16>
    %c0_4 = arith.constant 0 : index
    %c0_5 = arith.constant 0 : index
    %5 = vector.load %arg4[%c0_4, %c0_5] : memref<256x128xbf16, #tpu.memory_space<vmem>>, vector<256x128xbf16>
    %cst = arith.constant dense<0.000000e+00> : vector<128x128xf32>
    %6 = tpu.matmul %4, %5, %cst {dimension_numbers = #tpu.dot_dimension_numbers<[1], [0], [0], [1], [0, 0, 1, 1], [], []>} : vector<128x256xbf16>, vector<256x128xbf16>, vector<128x128xf32> -> vector<128x128xf32>
    %7 = arith.addf %3, %6 : vector<128x128xf32>
    %c0_6 = arith.constant 0 : index
    %c0_7 = arith.constant 0 : index
    %8 = vector.load %arg10[%c0_6, %c0_7] : memref<128x128xf32, #tpu.memory_space<vmem>>, vector<128x128xf32>
    tpu.vector_store %arg10[%c0_6, %c0_7], %7 {strides = array<i32>} : memref<128x128xf32, #tpu.memory_space<vmem>>, vector<128x128xf32>,
    %c2_i32 = arith.constant 2 : i32
    %9 = arith.cmpi eq, %arg1, %c2_i32 : i32
    %10 = arith.extui %9 : i1 to i32
    %c0_i32_8 = arith.constant 0 : i32
    %11 = arith.cmpi ne, %10, %c0_i32_8 : i32
    scf.if %11 {
      %c0_9 = arith.constant 0 : index
      %c0_10 = arith.constant 0 : index
      %12 = vector.load %arg3[%c0_9, %c0_10] : memref<128x1xf32, #tpu.memory_space<vmem>>, vector<128x1xf32>
      %cst_11 = arith.constant 1.000000e+00 : f32
      %13 = vector.broadcast %cst_11 : f32 to vector<128x1xf32>
      %14 = arith.maximumf %12, %13 : vector<128x1xf32>
      %15 = tpu.reciprocal %14 {approx = true} : vector<128x1xf32> -> vector<128x1xf32>
      %c0_12 = arith.constant 0 : index
      %c0_13 = arith.constant 0 : index
      %16 = vector.load %arg10[%c0_12, %c0_13] : memref<128x128xf32, #tpu.memory_space<vmem>>, vector<128x128xf32>
      %17 = vector.broadcast %15 : vector<128x1xf32> to vector<128x128xf32>
      %18 = arith.mulf %16, %17 : vector<128x128xf32>
      %19 = arith.truncf %18 : vector<128x128xf32> to vector<128x128xbf16>
      %c0_14 = arith.constant 0 : index
      %c0_15 = arith.constant 0 : index
      %20 = vector.load %arg5[%c0_14, %c0_15] : memref<128x128xbf16, #tpu.memory_space<vmem>>, vector<128x128xbf16>
      %cst_16 = arith.constant dense<0.000000e+00> : vector<128x128xf32>
      %21 = tpu.matmul %19, %20, %cst_16 {dimension_numbers = #tpu.dot_dimension_numbers<[1], [0], [0], [1], [0, 0, 1, 1], [], []>} : vector<128x128xbf16>, vector<128x128xbf16>, vector<128x128xf32> -> vector<128x128xf32>
      %c0_17 = arith.constant 0 : index
      %c0_18 = arith.constant 0 : index
      %22 = vector.load %arg6[%c0_17, %c0_18] : memref<1x128xf32, #tpu.memory_space<vmem>>, vector<1x128xf32>
      %23 = vector.broadcast %22 : vector<1x128xf32> to vector<128x128xf32>
      %24 = arith.addf %21, %23 : vector<128x128xf32>
      %25 = math.tanh %24 : vector<128x128xf32>
      %26 = arith.truncf %25 : vector<128x128xf32> to vector<128x128xbf16>
      %c0_19 = arith.constant 0 : index
      %c0_20 = arith.constant 0 : index
      %27 = vector.load %arg7[%c0_19, %c0_20] : memref<128x128xbf16, #tpu.memory_space<vmem>>, vector<128x128xbf16>
      %cst_21 = arith.constant dense<0.000000e+00> : vector<128x128xf32>
      %28 = tpu.matmul %26, %27, %cst_21 {dimension_numbers = #tpu.dot_dimension_numbers<[1], [0], [0], [1], [0, 0, 1, 1], [], []>} : vector<128x128xbf16>, vector<128x128xbf16>, vector<128x128xf32> -> vector<128x128xf32>
      %c0_22 = arith.constant 0 : index
      %c0_23 = arith.constant 0 : index
      %29 = vector.load %arg8[%c0_22, %c0_23] : memref<1x128xf32, #tpu.memory_space<vmem>>, vector<1x128xf32>
      %30 = vector.broadcast %29 : vector<1x128xf32> to vector<128x128xf32>
      %31 = arith.addf %28, %30 : vector<128x128xf32>
      %cst_24 = arith.constant dense<0xFF800000> : vector<128xf32>
      %32 = vector.multi_reduction <maximumf>, %31, %cst_24 [1] : vector<128x128xf32> to vector<128xf32>
      %33 = vector.shape_cast %32 : vector<128xf32> to vector<128x1xf32>
      %34 = vector.broadcast %33 : vector<128x1xf32> to vector<128x128xf32>
      %35 = arith.subf %31, %34 : vector<128x128xf32>
      %36 = math.exp %35 : vector<128x128xf32>
      %cst_25 = arith.constant dense<0.000000e+00> : vector<128xf32>
      %37 = vector.multi_reduction <add>, %36, %cst_25 [1] : vector<128x128xf32> to vector<128xf32>
      %38 = vector.shape_cast %37 : vector<128xf32> to vector<128x1xf32>
      %39 = vector.broadcast %38 : vector<128x1xf32> to vector<128x128xf32>
      %40 = arith.divf %36, %39 : vector<128x128xf32>
      %c0_26 = arith.constant 0 : index
      %c0_27 = arith.constant 0 : index
      %41 = vector.load %arg9[%c0_26, %c0_27] : memref<128x128xf32, #tpu.memory_space<vmem>>, vector<128x128xf32>
      tpu.vector_store %arg9[%c0_26, %c0_27], %40 {strides = array<i32>} : memref<128x128xf32, #tpu.memory_space<vmem>>, vector<128x128xf32>,
    } else {
    }
    return
  }
  func.func @transform_0(%arg0: i32, %arg1: i32) -> (i32, i32) {
    %c0_i32 = arith.constant 0 : i32
    return %arg0, %arg1 : i32, i32
  }
  func.func @transform_1(%arg0: i32, %arg1: i32) -> (i32, i32) {
    %c0_i32 = arith.constant 0 : i32
    %c0_i32_0 = arith.constant 0 : i32
    return %arg0, %c0_i32 : i32, i32
  }
  func.func @transform_2(%arg0: i32, %arg1: i32) -> (i32, i32) {
    %c0_i32 = arith.constant 0 : i32
    %c0_i32_0 = arith.constant 0 : i32
    return %arg1, %c0_i32 : i32, i32
  }
  func.func @transform_3(%arg0: i32, %arg1: i32) -> (i32, i32) {
    %c0_i32 = arith.constant 0 : i32
    %c0_i32_0 = arith.constant 0 : i32
    %c0_i32_1 = arith.constant 0 : i32
    return %c0_i32, %c0_i32_0 : i32, i32
  }
  func.func @transform_4(%arg0: i32, %arg1: i32) -> (i32, i32) {
    %c0_i32 = arith.constant 0 : i32
    %c0_i32_0 = arith.constant 0 : i32
    %c0_i32_1 = arith.constant 0 : i32
    return %c0_i32, %c0_i32_0 : i32, i32
  }
  func.func @transform_5(%arg0: i32, %arg1: i32) -> (i32, i32) {
    %c0_i32 = arith.constant 0 : i32
    %c0_i32_0 = arith.constant 0 : i32
    %c0_i32_1 = arith.constant 0 : i32
    return %c0_i32, %c0_i32_0 : i32, i32
  }
  func.func @transform_6(%arg0: i32, %arg1: i32) -> (i32, i32) {
    %c0_i32 = arith.constant 0 : i32
    %c0_i32_0 = arith.constant 0 : i32
    %c0_i32_1 = arith.constant 0 : i32
    return %c0_i32, %c0_i32_0 : i32, i32
  }
  func.func @transform_7(%arg0: i32, %arg1: i32) -> (i32, i32) {
    %c0_i32 = arith.constant 0 : i32
    %c0_i32_0 = arith.constant 0 : i32
    return %arg0, %c0_i32 : i32, i32
  }
}

module attributes {stable_mosaic.version = 11 : i64} {
  func.func @sc_eval_kernel(%arg0: i32, %arg1: i32, %arg2: memref<128x256xbf16, #tpu.memory_space<vmem>>, %arg3: memref<128x1xf32, #tpu.memory_space<vmem>>, %arg4: memref<256x128xbf16, #tpu.memory_space<vmem>>, %arg5: memref<128x128xbf16, #tpu.memory_space<vmem>>, %arg6: memref<1x128xf32, #tpu.memory_space<vmem>>, %arg7: memref<128x128xbf16, #tpu.memory_space<vmem>>, %arg8: memref<1x128xf32, #tpu.memory_space<vmem>>, %arg9: memref<128x128xf32, #tpu.memory_space<vmem>>, %arg10: memref<128x128xf32, #tpu.memory_space<vmem>>) attributes {dimension_semantics = [#tpu.dimension_semantics<parallel>, #tpu.dimension_semantics<arbitrary>], iteration_bounds = array<i64: 2, 3>, scalar_prefetch = 0 : i64, scratch_operands = 1 : i64, tpu.core_type = #tpu.core_type<tc>, window_params = [{transform_indices = @transform_0, window_bounds = array<i64: 128, 256>}, {transform_indices = @transform_1, window_bounds = array<i64: 128, 1>}, {transform_indices = @transform_2, window_bounds = array<i64: 256, 128>}, {pipeline_mode = #tpu.pipeline_mode<synchronous>, transform_indices = @transform_3, window_bounds = array<i64: 128, 128>}, {pipeline_mode = #tpu.pipeline_mode<synchronous>, transform_indices = @transform_4, window_bounds = array<i64: 1, 128>}, {pipeline_mode = #tpu.pipeline_mode<synchronous>, transform_indices = @transform_5, window_bounds = array<i64: 128, 128>}, {pipeline_mode = #tpu.pipeline_mode<synchronous>, transform_indices = @transform_6, window_bounds = array<i64: 1, 128>}, {transform_indices = @transform_7, window_bounds = array<i64: 128, 128>}]} {
    %c0_i32 = arith.constant 0 : i32
    %0 = arith.cmpi eq, %arg1, %c0_i32 : i32
    %1 = arith.extui %0 : i1 to i32
    %c0_i32_0 = arith.constant 0 : i32
    %2 = arith.cmpi ne, %1, %c0_i32_0 : i32
    scf.if %2 {
      %cst_9 = arith.constant 0.000000e+00 : f32
      %12 = vector.broadcast %cst_9 : f32 to vector<128x128xf32>
      %c0_10 = arith.constant 0 : index
      %c0_11 = arith.constant 0 : index
      %13 = vector.load %arg10[%c0_10, %c0_11] : memref<128x128xf32, #tpu.memory_space<vmem>>, vector<128x128xf32>
      tpu.vector_store %arg10[%c0_10, %c0_11], %12 {strides = array<i32>} : memref<128x128xf32, #tpu.memory_space<vmem>>, vector<128x128xf32>,
    } else {
    }
    %c0 = arith.constant 0 : index
    %c0_1 = arith.constant 0 : index
    %3 = vector.load %arg10[%c0, %c0_1] : memref<128x128xf32, #tpu.memory_space<vmem>>, vector<128x128xf32>
    %c0_2 = arith.constant 0 : index
    %c0_3 = arith.constant 0 : index
    %4 = vector.load %arg2[%c0_2, %c0_3] : memref<128x256xbf16, #tpu.memory_space<vmem>>, vector<128x256xbf16>
    %c0_4 = arith.constant 0 : index
    %c0_5 = arith.constant 0 : index
    %5 = vector.load %arg4[%c0_4, %c0_5] : memref<256x128xbf16, #tpu.memory_space<vmem>>, vector<256x128xbf16>
    %cst = arith.constant dense<0.000000e+00> : vector<128x128xf32>
    %6 = tpu.matmul %4, %5, %cst {dimension_numbers = #tpu.dot_dimension_numbers<[1], [0], [0], [1], [0, 0, 1, 1], [], []>} : vector<128x256xbf16>, vector<256x128xbf16>, vector<128x128xf32> -> vector<128x128xf32>
    %7 = arith.addf %3, %6 : vector<128x128xf32>
    %c0_6 = arith.constant 0 : index
    %c0_7 = arith.constant 0 : index
    %8 = vector.load %arg10[%c0_6, %c0_7] : memref<128x128xf32, #tpu.memory_space<vmem>>, vector<128x128xf32>
    tpu.vector_store %arg10[%c0_6, %c0_7], %7 {strides = array<i32>} : memref<128x128xf32, #tpu.memory_space<vmem>>, vector<128x128xf32>,
    %c2_i32 = arith.constant 2 : i32
    %9 = arith.cmpi eq, %arg1, %c2_i32 : i32
    %10 = arith.extui %9 : i1 to i32
    %c0_i32_8 = arith.constant 0 : i32
    %11 = arith.cmpi ne, %10, %c0_i32_8 : i32
    scf.if %11 {
      %c0_9 = arith.constant 0 : index
      %c0_10 = arith.constant 0 : index
      %12 = vector.load %arg3[%c0_9, %c0_10] : memref<128x1xf32, #tpu.memory_space<vmem>>, vector<128x1xf32>
      %cst_11 = arith.constant 1.000000e+00 : f32
      %13 = vector.broadcast %cst_11 : f32 to vector<128x1xf32>
      %14 = arith.maximumf %12, %13 : vector<128x1xf32>
      %15 = tpu.reciprocal %14 {approx = true} : vector<128x1xf32> -> vector<128x1xf32>
      %c0_12 = arith.constant 0 : index
      %c0_13 = arith.constant 0 : index
      %16 = vector.load %arg10[%c0_12, %c0_13] : memref<128x128xf32, #tpu.memory_space<vmem>>, vector<128x128xf32>
      %17 = vector.broadcast %15 : vector<128x1xf32> to vector<128x128xf32>
      %18 = arith.mulf %16, %17 : vector<128x128xf32>
      %19 = arith.truncf %18 : vector<128x128xf32> to vector<128x128xbf16>
      %c0_14 = arith.constant 0 : index
      %c0_15 = arith.constant 0 : index
      %20 = vector.load %arg5[%c0_14, %c0_15] : memref<128x128xbf16, #tpu.memory_space<vmem>>, vector<128x128xbf16>
      %cst_16 = arith.constant dense<0.000000e+00> : vector<128x128xf32>
      %21 = tpu.matmul %19, %20, %cst_16 {dimension_numbers = #tpu.dot_dimension_numbers<[1], [0], [0], [1], [0, 0, 1, 1], [], []>} : vector<128x128xbf16>, vector<128x128xbf16>, vector<128x128xf32> -> vector<128x128xf32>
      %c0_17 = arith.constant 0 : index
      %c0_18 = arith.constant 0 : index
      %22 = vector.load %arg6[%c0_17, %c0_18] : memref<1x128xf32, #tpu.memory_space<vmem>>, vector<1x128xf32>
      %23 = vector.broadcast %22 : vector<1x128xf32> to vector<128x128xf32>
      %24 = arith.addf %21, %23 : vector<128x128xf32>
      %25 = math.tanh %24 : vector<128x128xf32>
      %26 = arith.truncf %25 : vector<128x128xf32> to vector<128x128xbf16>
      %c0_19 = arith.constant 0 : index
      %c0_20 = arith.constant 0 : index
      %27 = vector.load %arg7[%c0_19, %c0_20] : memref<128x128xbf16, #tpu.memory_space<vmem>>, vector<128x128xbf16>
      %cst_21 = arith.constant dense<0.000000e+00> : vector<128x128xf32>
      %28 = tpu.matmul %26, %27, %cst_21 {dimension_numbers = #tpu.dot_dimension_numbers<[1], [0], [0], [1], [0, 0, 1, 1], [], []>} : vector<128x128xbf16>, vector<128x128xbf16>, vector<128x128xf32> -> vector<128x128xf32>
      %c0_22 = arith.constant 0 : index
      %c0_23 = arith.constant 0 : index
      %29 = vector.load %arg8[%c0_22, %c0_23] : memref<1x128xf32, #tpu.memory_space<vmem>>, vector<1x128xf32>
      %30 = vector.broadcast %29 : vector<1x128xf32> to vector<128x128xf32>
      %31 = arith.addf %28, %30 : vector<128x128xf32>
      %cst_24 = arith.constant dense<0xFF800000> : vector<128xf32>
      %32 = vector.multi_reduction <maximumf>, %31, %cst_24 [1] : vector<128x128xf32> to vector<128xf32>
      %33 = vector.shape_cast %32 : vector<128xf32> to vector<128x1xf32>
      %34 = vector.broadcast %33 : vector<128x1xf32> to vector<128x128xf32>
      %35 = arith.subf %31, %34 : vector<128x128xf32>
      %36 = math.exp %35 : vector<128x128xf32>
      %cst_25 = arith.constant dense<0.000000e+00> : vector<128xf32>
      %37 = vector.multi_reduction <add>, %36, %cst_25 [1] : vector<128x128xf32> to vector<128xf32>
      %38 = vector.shape_cast %37 : vector<128xf32> to vector<128x1xf32>
      %39 = vector.broadcast %38 : vector<128x1xf32> to vector<128x128xf32>
      %40 = arith.divf %36, %39 : vector<128x128xf32>
      %c0_26 = arith.constant 0 : index
      %c0_27 = arith.constant 0 : index
      %41 = vector.load %arg9[%c0_26, %c0_27] : memref<128x128xf32, #tpu.memory_space<vmem>>, vector<128x128xf32>
      tpu.vector_store %arg9[%c0_26, %c0_27], %40 {strides = array<i32>} : memref<128x128xf32, #tpu.memory_space<vmem>>, vector<128x128xf32>,
    } else {
    }
    return
  }
  func.func @transform_0(%arg0: i32, %arg1: i32) -> (i32, i32) {
    %c0_i32 = arith.constant 0 : i32
    return %arg0, %arg1 : i32, i32
  }
  func.func @transform_1(%arg0: i32, %arg1: i32) -> (i32, i32) {
    %c0_i32 = arith.constant 0 : i32
    %c0_i32_0 = arith.constant 0 : i32
    return %arg0, %c0_i32 : i32, i32
  }
  func.func @transform_2(%arg0: i32, %arg1: i32) -> (i32, i32) {
    %c0_i32 = arith.constant 0 : i32
    %c0_i32_0 = arith.constant 0 : i32
    return %arg1, %c0_i32 : i32, i32
  }
  func.func @transform_3(%arg0: i32, %arg1: i32) -> (i32, i32) {
    %c0_i32 = arith.constant 0 : i32
    %c0_i32_0 = arith.constant 0 : i32
    %c0_i32_1 = arith.constant 0 : i32
    return %c0_i32, %c0_i32_0 : i32, i32
  }
  func.func @transform_4(%arg0: i32, %arg1: i32) -> (i32, i32) {
    %c0_i32 = arith.constant 0 : i32
    %c0_i32_0 = arith.constant 0 : i32
    %c0_i32_1 = arith.constant 0 : i32
    return %c0_i32, %c0_i32_0 : i32, i32
  }
  func.func @transform_5(%arg0: i32, %arg1: i32) -> (i32, i32) {
    %c0_i32 = arith.constant 0 : i32
    %c0_i32_0 = arith.constant 0 : i32
    %c0_i32_1 = arith.constant 0 : i32
    return %c0_i32, %c0_i32_0 : i32, i32
  }
  func.func @transform_6(%arg0: i32, %arg1: i32) -> (i32, i32) {
    %c0_i32 = arith.constant 0 : i32
    %c0_i32_0 = arith.constant 0 : i32
    %c0_i32_1 = arith.constant 0 : i32
    return %c0_i32, %c0_i32_0 : i32, i32
  }
  func.func @transform_7(%arg0: i32, %arg1: i32) -> (i32, i32) {
    %c0_i32 = arith.constant 0 : i32
    %c0_i32_0 = arith.constant 0 : i32
    return %arg0, %c0_i32 : i32, i32
  }
}

</mosaic_0001>

<bundles_post_ra>
// kernel: tpu_custom_call.1
= control target key start
LH: loop header
LB: loop body
LE: loop exit
PB: predicated region body
PF: predicated region fallthrough
CT: control target
= control target key end

     0   :  { %s2948_s0 = inlined_call_operand.hbm [shape: bf16[256,768], index: 0, kind: input, shape index: {}]   ;;  %s2949_s1 = inlined_call_operand.vmem [shape: f32[256,1], index: 1, kind: input, shape index: {}]   ;;  %s2950_s2 = inlined_call_operand.hbm [shape: bf16[768,128], index: 2, kind: input, shape index: {}]   ;;  %s2951_s3 = inlined_call_operand.vmem [shape: bf16[128,128], index: 3, kind: input, shape index: {}]   ;;  %s2952_s4 = inlined_call_operand.vmem [shape: f32[1,128], index: 4, kind: input, shape index: {}]   ;;  %s2953_s5 = inlined_call_operand.vmem [shape: bf16[128,128], index: 5, kind: input, shape index: {}]   ;;  %s2954_s6 = inlined_call_operand.vmem [shape: f32[1,128], index: 6, kind: input, shape index: {}]   ;;  %s2955_s7 = inlined_call_operand.hbm [shape: f32[256,128], index: 7, kind: output, shape index: {}]  }
   0x1   :  { %2963 = sst [smem:[#allocation17_spill]] %s2948_s0 }
   0x2   :  { %2964 = sst [smem:[#allocation18_spill]] %s2949_s1 }
   0x3   :  { %2965 = sst [smem:[#allocation19_spill]] %s2951_s3 }
   0x4   :  { %2966 = sst [smem:[#allocation20_spill]] %s2952_s4 }
   0x5   :  { %2967 = sst [smem:[#allocation21_spill]] %s2953_s5 }
   0x6   :  { %2968 = sst [smem:[#allocation22_spill]] %s2954_s6 }
   0x7   :  { %2969 = sst [smem:[#allocation23_spill]] %s2955_s7 }
   0x8   :  { %12 = vsyncpa [#allocation4], 0 }
   0x9   :  { %14 = vsyncpa [#allocation4 + $0x1], 0 }
   0xa   :  { %15 = vsyncpa [#allocation7], 0 }
   0xb   :  { %17 = vsyncpa [#allocation7 + $0x1], 0 }
   0xc   :  { %18 = vsyncpa [#allocation5], 0 }
   0xd   :  { %20 = vsyncpa [#allocation5 + $0x1], 0  ;;  %s2436_s24 = smov 0   ;;  %s2438_s25 = smov 0  }
   0xe   :  { %s2440_s26 = smov 0   ;;  %s2442_s27 = smov 0  }
   0xf   :  { %s2444_s28 = smov 0   ;;  %s2446_s29 = smov 0  }
  0x10   :  { %s2448_s30 = smov 0   ;;  %s2450_s8 = smov 0  }
  0x11   :  { %s2452_s9 = smov 0   ;;  %s2454_s10 = smov 0  }
  0x12   :  { %s2456_s11 = smov 0   ;;  %s2458_s12 = smov 0  }
  0x13   :  { %s2460_s13 = smov 0   ;;  %s2462_s14 = smov 0  }
  0x14 LB: > { %2970 = sst [smem:[#allocation12_spill]] %s2366_s10  ;;  %s35_s15 = sadd.s32 1, %s2374_s12  ;;  %s2382_s14 = sphi %s2462_s14, %s26_s14   ;;  %s2378_s13 = sphi %s2460_s13, %s3000_s13   ;;  %s2374_s12 = sphi %s2458_s12, %s3011_s12   ;;  %s2370_s11 = sphi %s2456_s11, %s2998_s11   ;;  %s2366_s10 = sphi %s2454_s10, %s3010_s10   ;;  %s2362_s9 = sphi %s2452_s9, %s3009_s9   ;;  %s2358_s8 = sphi %s2450_s8, %s3008_s8   ;;  %s2354_s30 = sphi %s2448_s30, %s3007_s30   ;;  %s2350_s29 = sphi %s2446_s29, %s3006_s29   ;;  %s2346_s28 = sphi %s2444_s28, %s3005_s28   ;;  %s2342_s27 = sphi %s2442_s27, %s3004_s27   ;;  %s2338_s26 = sphi %s2440_s26, %s3003_s26   ;;  %s2334_s25 = sphi %s2438_s25, %s3002_s25   ;;  %s2330_s24 = sphi %s2436_s24, %s3001_s24  }
  0x15   : > { %2971 = sst [smem:[#allocation13_spill]] %s2370_s11  ;;  %s38_s16 = sadd.s32 1, %s2378_s13 }
  0x16   : > { %2972 = sst [smem:[#allocation14_spill]] %s2378_s13  ;;  %p36_p0 = scmp.ge.s32.totalorder %s35_s15, 3 }
  0x17   : > { %s47_s17 = sadd.s32 1, %s2362_s9  ;;  %p54_p1 = scmp.ne.s32.totalorder %s2362_s9, %s2358_s8 }
  0x18   : > { %p55_p2 = scmp.eq.s32.totalorder %s2382_s14, 0  ;;  %s3013_s15 = smov (%p36_p0, %s35_s15), 0 }
  0x19   : > { %2973 = sst [smem:[#allocation15_spill]] %s3013_s15  ;;  %s3015_s16 = smov (!%p36_p0, %s38_s16), %s2378_s13 }
  0x1a   : > { %s2517_s18 = ssub.s32 %s2374_s12, %s3013_s15  ;;  %p2521_p3 = por %p55_p2, %p54_p1 }
  0x1b   : > { %p40_p4 = scmp.ge.s32.totalorder %s3015_s16, 2  ;;  %p60_p5 = scmp.ne.s32.totalorder %s2358_s8, %s2354_s30 }
  0x1c   : > { %s209_s20 = sadd.s32 1, %s2338_s26  ;;  %p2962_p6 = scmp.lt.s32.totalorder %s2382_s14, 6 }
  0x1d   : > { %s3017_s16 = smov (%p40_p4, %s3015_s16), 0  ;;  %s258_s21 = sand.u32 1, %s2362_s9  }
  0x1e   : > { %2975 = sst [smem:[#allocation16_spill]] %s3017_s16  ;;  %s42_s22 = ssub.s32 %s2378_s13, %s3017_s16 }
  0x1f   : > { %s44_s23 = sor.u32 %s2517_s18, %s42_s22  ;;  %p207_p7 = scmp.eq.s32.totalorder %s42_s22, 0 }
  0x20   : > { %p45_p8 = scmp.eq.s32.totalorder %s44_s23, 0  ;;  %s1602_s15 = sshll.u32 %s258_s21, 7 }
  0x21   : > { %s2536_s7 = scalar_select %p207_p7, %s2338_s26, %s209_s20  }
  0x22   : > { %s2539_s6 = scalar_select %p45_p8, %s2362_s9, %s47_s17  }
  0x23   : > { %s1604_s4 = sshll.u32 %s2374_s12, 1  ;;  %s1851_s5 = smul.u32 96, %s2378_s13 }
  0x24   : > { %s262_s3 = scalar_lea.vmem [#allocation3], %s1602_s15  ;;  %p2547_p9 = pnand %p2962_p6, %p2521_p3 }
  0x25   : > { %s272_s10 = sshll.u32 %s262_s3, 4  ;;  %s269_s16 = sadd.s32 %s1851_s5, %s1604_s4  ;;  %s273_s10 = int_to_ptr.vmem [resolvable:$true] %s272_s10 }
  0x26   : > { %s1606_s22 = sshll.u32 %s269_s16, 6  ;;  %s2977_s0 = sld [smem:[#allocation17_spill]] }
  0x27   : > { %p1610_p10 = scmp.ge.s32.totalorder %s2382_s14, 1  ;;  %s259_s17 = scalar_lea.sflag [#allocation4], %s258_s21 }
  0x28   : > { %p2180_p11 = pneg %p2547_p9  ;;  %s2191_s15 = scalar_lea.vmem %s273_s10, 2048 }
  0x29   : > { %p2192_p12 = scmp.ne.s32.totalorder %s273_s10, %s2191_s15  ;;  %s2384_s3 = smov [#allocation3]  }
  0x2a   : > { %s2196_s19 = sshll.u32 %s2384_s3, 4  ;;  %s2197_s19 = int_to_ptr.vmem [resolvable:$false] %s2196_s19 }
  0x2b   : > { %p2194_p13 = pnand %p2192_p12, %p2180_p11  ;;  %s2198_s13 = scalar_lea.vmem %s2197_s19, 4096 }
  0x2c   : > { %s271_s20 = scalar_lea.hbm %s2977_s0, %s1606_s22  ;;  %p2199_p1 = scmp.lt.s32.totalorder %s273_s10, %s2197_s19 }
  0x2d   : > { %p2195_p0 = pneg %p2194_p13  ;;  %p2200_p3 = scmp.lt.s32.totalorder %s2198_s13, %s2191_s15 }
  0x2f   : > { %p2201_p4 = por %p2200_p3, %p2199_p1 }
  0x31   : > { %p2202_p7 = pnand %p2201_p4, %p2195_p0 }
  0x33   : > { %2205 = shalt.err (!%p2202_p7)
}
  0x34   : > { %s2385_s4 = smov 384   ;;  %s2386_s5 = smov 128  }
  0x35   : > { %s2387_s11 = smov 8   ;;  %p310_p8 = scmp.lt.s32.totalorder %s2382_s14, 7 }
  0x36   : > { %1861 = dma.hbm_to_vmem [thread:$0]  (!%p2547_p9), %s271_s20, 2048, %s273_s10, %s259_s17, %s2385_s4, %s2386_s5, %s2387_s11  }
  0x37   : > { %p2562_p11 = pnand %p1610_p10, %p310_p8  ;;  %s1598_s16 = sadd.s32 4294967295, %s2382_s14  }
  0x38   : > { %s1599_s21 = sadd.s32 4294967294, %s2382_s14   ;;  %p61_p12 = scmp.eq.s32.totalorder %s1598_s16, 0 }
  0x39   : > { %p97_p13 = scmp.eq.s32.totalorder %s2517_s18, 0  ;;  %s99_s22 = sadd.s32 1, %s2350_s29 }
  0x3a   : > { %p106_p0 = scmp.ne.s32.totalorder %s2350_s29, %s2346_s28  ;;  %p2575_p1 = por %p61_p12, %p60_p5 }
  0x3b   : > { %p112_p9 = scmp.ne.s32.totalorder %s2346_s28, %s2342_s27  ;;  %p219_p4 = scmp.ne.s32.totalorder %s2338_s26, %s2334_s25 }
  0x3c   : > { %s2582_s10 = scalar_select %p97_p13, %s2350_s29, %s99_s22  }
  0x3d   : > { %p2586_p10 = por %p106_p0, %p55_p2  ;;  %p2590_p3 = por %p112_p9, %p61_p12 }
  0x3e   : > { %p220_p7 = scmp.eq.s32.totalorder %s1598_s16, 5  ;;  %p225_p5 = scmp.ne.s32.totalorder %s2334_s25, %s2330_s24 }
  0x3f   : > { %p226_p8 = scmp.eq.s32.totalorder %s1599_s21, 5  ;;  %s291_s27 = sand.u32 1, %s2350_s29  }
  0x40   : > { %p2598_p6 = por %p220_p7, %p219_p4  ;;  %s1607_s17 = sshll.u32 %s291_s27, 7 }
  0x41   : > { %p2603_p13 = por %p226_p8, %p225_p5  ;;  %s1673_s15 = sshll.u32 %s2374_s12, 11 }
  0x42   : > { %s301_s4 = scalar_lea.hbm %s2950_s2, %s1673_s15  ;;  %s295_s5 = scalar_lea.vmem [#allocation6], %s1607_s17 }
  0x43   : > { %s2983_s20 = scalar_select %p2603_p13, 1, 0 }
  0x44   : > { %s302_s11 = sshll.u32 %s295_s5, 4  ;;  %p2984_p2 = scmp.lt.s32.totalorder %s2382_s14, 6  ;;  %s303_s11 = int_to_ptr.vmem [resolvable:$true] %s302_s11 }
  0x45   : > { %s292_s21 = scalar_lea.sflag [#allocation7], %s291_s27  ;;  %s2219_s22 = scalar_lea.vmem %s303_s11, 2048 }
  0x46   : > { %p2615_p12 = pnand %p2984_p2, %p2586_p10  ;;  %p2220_p9 = scmp.ne.s32.totalorder %s303_s11, %s2219_s22 }
  0x47   : > { %s2388_s0 = smov [#allocation6]  }
  0x48   : > { %p2208_p0 = pneg %p2615_p12  ;;  %s2224_s3 = sshll.u32 %s2388_s0, 4  ;;  %s2225_s3 = int_to_ptr.vmem [resolvable:$false] %s2224_s3 }
  0x49   : > { %s2226_s17 = scalar_lea.vmem %s2225_s3, 4096  ;;  %p2227_p5 = scmp.lt.s32.totalorder %s303_s11, %s2225_s3 }
  0x4a   : > { %p2222_p4 = pnand %p2220_p9, %p2208_p0  ;;  %p2228_p8 = scmp.lt.s32.totalorder %s2226_s17, %s2219_s22 }
  0x4c   : > { %p2223_p7 = pneg %p2222_p4  ;;  %p2229_p13 = por %p2228_p8, %p2227_p5 }
  0x4e   : > { %p2230_p10 = pnand %p2229_p13, %p2223_p7 }
  0x50   : > { %2233 = shalt.err (!%p2230_p10)
}
  0x51   : > { %s2389_s23 = smov 64   ;;  %s2390_s15 = smov 4  }
  0x52   : > { %1864 = dma.hbm_to_vmem [thread:$0]  (!%p2615_p12), %s301_s4, 2048, %s303_s11, %s292_s21, %s2389_s23, %s2389_s23, %s2390_s15  }
  0x53   : > { %314 = sbr.rel (%p2562_p11) target bundleno = 1314 (0x522), region = 48  ;;  %s316_s27 = sand.u32 (!%p2562_p11), 1, %s2358_s8  }
  0x54   : > { %s1611_s19 = sshll.u32 (!%p2562_p11), %s316_s27, 7  ;;  %s317_s0 = scalar_lea.sflag (!%p2562_p11), [#allocation4], %s316_s27 }
  0x55   : > { %s2626_s5 = scalar_lea.vmem (!%p2562_p11), [#allocation3], %s1611_s19 }
  0x58   : > { %2317 = dma.done.wait (%p2575_p1), %s317_s0, 2048  }
  0x59   : > { %2319 = vsyncadd (%p2575_p1), %s317_s0, 4294965248  ;;  %s325_s22 = sand.u32 1, %s2346_s28  }
  0x5a   : > { %s1612_s16 = sshll.u32 %s325_s22, 7  ;;  %s326_s4 = scalar_lea.sflag [#allocation7], %s325_s22 }
  0x5b   : > { %s2633_s11 = scalar_lea.vmem [#allocation6], %s1612_s16 }
  0x5c   : > { %2321 = dma.done.wait (%p2590_p3), %s326_s4, 2048  }
  0x5d   : > { %2323 = vsyncadd (%p2590_p3), %s326_s4, 4294965248  ;;  %s2986_s13 = sld [smem:[#allocation13_spill]]  ;;  %s367_s21 = sand.u32 1, %s2334_s25  }
  0x5e   : > { %s1613_s1 = sshll.u32 %s367_s21, 7  ;;  %s2987_s27 = sld [smem:[#allocation18_spill]] }
  0x5f   : > { %s2648_s0 = scalar_lea.vmem [#allocation8], %s1613_s1  ;;  %s2988_s22 = sld [smem:[#allocation12_spill]] }
  0x63   : > { %s1614_s3 = sshll.u32 %s2986_s13, 4 }
  0x64   : > { %p373_p11 = scmp.lt.s32.totalorder %s1614_s3, 31 }
  0x65   : > { %p1616_p1 = scmp.ne.s32.totalorder %s2988_s22, 0 }
  0x66   : > { %s3019_s3 = smov (!%p373_p11, %s1614_s3), 31 }
  0x67   : > { %s1615_s17 = sshll.u32 %s3019_s3, 3  ;;  %384 = sbr.rel (%p1616_p1) target bundleno = 117 (0x75), region = 60 }
  0x68   : > { %s2646_s19 = scalar_lea.vmem %s2987_s27, %s1615_s17 }
  0x6c   : > { %v2391_v0 = vmov 0.0  }
  0x6d   : > { %385 = vst [vmem:[#allocation2 + $0x30] sm:$0xff] %v2391_v0  ;;  %386 = vst [vmem:[#allocation2] sm:$0xff] %v2391_v0 }
  0x6e   : > { %387 = vst [vmem:[#allocation2 + $0x58] sm:$0xff] %v2391_v0  ;;  %388 = vst [vmem:[#allocation2 + $0x18] sm:$0xff] %v2391_v0 }
  0x6f   : > { %389 = vst [vmem:[#allocation2 + $0x50] sm:$0xff] %v2391_v0  ;;  %390 = vst [vmem:[#allocation2 + $0x68] sm:$0xff] %v2391_v0 }
  0x70   : > { %391 = vst [vmem:[#allocation2 + $0x8] sm:$0xff] %v2391_v0  ;;  %392 = vst [vmem:[#allocation2 + $0x48] sm:$0xff] %v2391_v0 }
  0x71   : > { %393 = vst [vmem:[#allocation2 + $0x40] sm:$0xff] %v2391_v0  ;;  %394 = vst [vmem:[#allocation2 + $0x20] sm:$0xff] %v2391_v0 }
  0x72   : > { %395 = vst [vmem:[#allocation2 + $0x10] sm:$0xff] %v2391_v0  ;;  %396 = vst [vmem:[#allocation2 + $0x38] sm:$0xff] %v2391_v0 }
  0x73   : > { %397 = vst [vmem:[#allocation2 + $0x60] sm:$0xff] %v2391_v0  ;;  %398 = vst [vmem:[#allocation2 + $0x70] sm:$0xff] %v2391_v0 }
  0x74   : > { %399 = vst [vmem:[#allocation2 + $0x78] sm:$0xff] %v2391_v0  ;;  %400 = vst [vmem:[#allocation2 + $0x28] sm:$0xff] %v2391_v0 }
  0x75 PF: > { %v1992_v1 = vld [vmem:[%s2633_s11 + $0x78] sm:$0xff]   ;;  %v1994_v3 = vld [vmem:[%s2633_s11 + $0x70] sm:$0xff]   ;;  %v1996_v5 = vld [vmem:[%s2633_s11 + $0x68] sm:$0xff]   ;;  %s2989_s18 = sld [smem:[#allocation12_spill]] }
  0x76   : > { %v1993_v2 = vld [vmem:[%s2633_s11 + $0x38] sm:$0xff]   ;;  %1675 = vmatprep.subr.bf16.mxu0 %v1992_v1  ;;  %1835 = vmatprep.subr.bf16.mxu1 %v1992_v1  ;;  %v1995_v4 = vld [vmem:[%s2633_s11 + $0x30] sm:$0xff]   ;;  %v1997_v6 = vld [vmem:[%s2633_s11 + $0x28] sm:$0xff]  }
  0x77   : > { %1676 = vmatpush3.bf16.msra.mxu0 %v1993_v2  ;;  %1843 = vmatpush3.bf16.msra.mxu1 %v1993_v2  ;;  %v1998_v7 = vld [vmem:[%s2633_s11 + $0x60] sm:$0xff]   ;;  %v2000_v9 = vld [vmem:[%s2633_s11 + $0x58] sm:$0xff]   ;;  %v2002_v11 = vld [vmem:[%s2633_s11 + $0x50] sm:$0xff]  }
  0x78   : > { %1677 = vmatprep.subr.bf16.mxu0 %v1994_v3  ;;  %1836 = vmatprep.subr.bf16.mxu1 %v1994_v3  ;;  %v1999_v8 = vld [vmem:[%s2633_s11 + $0x20] sm:$0xff]   ;;  %v2001_v10 = vld [vmem:[%s2633_s11 + $0x18] sm:$0xff]   ;;  %v2003_v14 = vld [vmem:[%s2633_s11 + $0x10] sm:$0xff]  }
  0x79   : > { %v2010_v12 = vld [vmem:[%s2626_s5 + $0x4] ss:$8 sps:$4 sm:$0xff]   ;;  %v2008_v19 = vld [vmem:[%s2626_s5] ss:$8 sps:$4 sm:$0xff]   ;;  %v2014_v21 = vld [vmem:[%s2626_s5 + $0x14] ss:$8 sps:$4 sm:$0xff]  }
  0x7a   : > { %v2013_v13 = vld [vmem:[%s2626_s5 + $0x44] ss:$8 sps:$4 sm:$0xff]   ;;  %673 = vmatprep.mubr.bf16.mxu0 %v2010_v12  ;;  %v2011_v20 = vld [vmem:[%s2626_s5 + $0x40] ss:$8 sps:$4 sm:$0xff]   ;;  %v2016_v22 = vld [vmem:[%s2626_s5 + $0x54] ss:$8 sps:$4 sm:$0xff]  }
  0x7b   : > { %1678 = vmatpush3.bf16.msra.mxu0 %v1995_v4  ;;  %1844 = vmatpush3.bf16.msra.mxu1 %v1995_v4  ;;  %v2004_v15 = vld [vmem:[%s2633_s11 + $0x48] sm:$0xff]   ;;  %v2006_v17 = vld [vmem:[%s2633_s11 + $0x40] sm:$0xff]   ;;  %v2018_v23 = vld [vmem:[%s2626_s5 + $0x10] ss:$8 sps:$4 sm:$0xff]   ;;  %p1649_p3 = scmp.ne.s32.totalorder %s2989_s18, 2 }
  0x7c   : > { %1679 = vmatprep.subr.bf16.mxu0 %v1996_v5  ;;  %1837 = vmatprep.subr.bf16.mxu1 %v1996_v5  ;;  %v2005_v16 = vld [vmem:[%s2633_s11 + $0x8] sm:$0xff]   ;;  %v2007_v18 = vld [vmem:[%s2633_s11] sm:$0xff]   ;;  %v2019_v24 = vld [vmem:[%s2626_s5 + $0x50] ss:$8 sps:$4 sm:$0xff]   ;;  %s2990_s4 = sld [smem:[#allocation19_spill]] (!%p1649_p3) }
  0x7d   : > { %705 = vmatprep.mubr.bf16.mxu1 %v2013_v13  ;;  %v2020_v25 = vld [vmem:[%s2626_s5 + $0x24] ss:$8 sps:$4 sm:$0xff]   ;;  %v2024_v27 = vld [vmem:[%s2626_s5 + $0x20] ss:$8 sps:$4 sm:$0xff]   ;;  %v2026_v29 = vld [vmem:[%s2626_s5 + $0x34] ss:$8 sps:$4 sm:$0xff]  }
  0x7e   : > { %v2022_v26 = vld [vmem:[%s2626_s5 + $0x64] ss:$8 sps:$4 sm:$0xff]   ;;  %v2025_v28 = vld [vmem:[%s2626_s5 + $0x60] ss:$8 sps:$4 sm:$0xff]   ;;  %v2028_v30 = vld [vmem:[%s2626_s5 + $0x74] ss:$8 sps:$4 sm:$0xff]  }
  0x7f   : > { %1680 = vmatpush3.bf16.msra.mxu0 %v1997_v6  ;;  %1845 = vmatpush3.bf16.msra.mxu1 %v1997_v6  ;;  %v2030_v31 = vld [vmem:[%s2626_s5 + $0x30] ss:$8 sps:$4 sm:$0xff]   ;;  %v409_v37 = vld [vmem:[#allocation2 + $0x40] sm:$0xff]  ;;  %s2991_s1 = sld [smem:[#allocation21_spill]] (!%p1649_p3) }
  0x80   : > { %1681 = vmatprep.subr.bf16.mxu0 %v1998_v7  ;;  %1838 = vmatprep.subr.bf16.mxu1 %v1998_v7  ;;  %v2031_v32 = vld [vmem:[%s2626_s5 + $0x70] ss:$8 sps:$4 sm:$0xff]   ;;  %v402_v45 = vld [vmem:[#allocation2] sm:$0xff]  ;;  %s2992_s22 = sld [smem:[#allocation20_spill]] (!%p1649_p3) }
  0x81   : > { %v401_v35 = vld [vmem:[#allocation2 + $0x30] sm:$0xff]  ;;  %v410_v47 = vld [vmem:[#allocation2 + $0x20] sm:$0xff]  ;;  %v403_v55 = vld [vmem:[#allocation2 + $0x58] sm:$0xff]  ;;  %s2993_s16 = sld [smem:[#allocation22_spill]] (!%p1649_p3) }
  0x82   : > { %v411_v57 = vld [vmem:[#allocation2 + $0x10] sm:$0xff]  ;;  %v404_v1 = vld [vmem:[#allocation2 + $0x18] sm:$0xff]  ;;  %v413_v13 = vld [vmem:[#allocation2 + $0x60] sm:$0xff] }
  0x83   : > { %1682 = vmatpush3.bf16.msra.mxu0 %v1999_v8  ;;  %1846 = vmatpush3.bf16.msra.mxu1 %v1999_v8  ;;  %v412_v3 = vld [vmem:[#allocation2 + $0x38] sm:$0xff] }
  0x84   : > { %1683 = vmatprep.subr.bf16.mxu0 %v2000_v9  ;;  %1839 = vmatprep.subr.bf16.mxu1 %v2000_v9 }
  0x87   : > { %1684 = vmatpush3.bf16.msra.mxu0 %v2001_v10  ;;  %1847 = vmatpush3.bf16.msra.mxu1 %v2001_v10 }
  0x88   : > { %1685 = vmatprep.subr.bf16.mxu0 %v2002_v11  ;;  %1840 = vmatprep.subr.bf16.mxu1 %v2002_v11  ;;  %v405_v11 = vld [vmem:[#allocation2 + $0x50] sm:$0xff] }
  0x8b   : > { %1686 = vmatpush3.bf16.msra.mxu0 %v2003_v14  ;;  %1848 = vmatpush3.bf16.msra.mxu1 %v2003_v14 }
  0x8c   : > { %1687 = vmatprep.subr.bf16.mxu0 %v2004_v15  ;;  %1841 = vmatprep.subr.bf16.mxu1 %v2004_v15 }
  0x8f   : > { %1688 = vmatpush3.bf16.msra.mxu0 %v2005_v16  ;;  %1849 = vmatpush3.bf16.msra.mxu1 %v2005_v16 }
  0x90   : > { %1689 = vmatprep.subr.bf16.mxu0 %v2006_v17  ;;  %1842 = vmatprep.subr.bf16.mxu1 %v2006_v17 }
  0x93   : > { %1690 = vmatpush3.bf16.msra.mxu0 %v2007_v18  ;;  %1850 = vmatpush3.bf16.msra.mxu1 %v2007_v18 }
  0x96   : > { %674 = vmatmul.mubr.bf16.vlgmr.msra.gmra.mxu0 %v2008_v19  ;;  %706 = vmatmul.mubr.bf16.vlgmr.msra.gmra.mxu1 %v2011_v20 }
  0x97   : > { %681 = vmatprep.mubr.bf16.mxu0 %v2014_v21  ;;  %713 = vmatprep.mubr.bf16.mxu1 %v2016_v22  ;;  %v406_v21 = vld [vmem:[#allocation2 + $0x68] sm:$0xff] }
  0x9e   : > { %682 = vmatmul.mubr.bf16.gmra.mxu0 %v2018_v23  ;;  %714 = vmatmul.mubr.bf16.gmra.mxu1 %v2019_v24  ;;  %v414_v23 = vld [vmem:[#allocation2 + $0x70] sm:$0xff] }
  0x9f   : > { %689 = vmatprep.mubr.bf16.mxu0 %v2020_v25  ;;  %721 = vmatprep.mubr.bf16.mxu1 %v2022_v26 }
  0xa6   : > { %690 = vmatmul.mubr.bf16.gmra.mxu0 %v2024_v27  ;;  %722 = vmatmul.mubr.bf16.gmra.mxu1 %v2025_v28 }
  0xa7   : > { %697 = vmatprep.mubr.bf16.mxu0 %v2026_v29  ;;  %729 = vmatprep.mubr.bf16.mxu1 %v2028_v30 }
  0xae   : > { %698 = vmatmul.mubr.bf16.gmra.mxu0 %v2030_v31  ;;  %730 = vmatmul.mubr.bf16.gmra.mxu1 %v2031_v32  ;;  %v407_v31 = vld [vmem:[#allocation2 + $0x8] sm:$0xff] }
 0x156   : > { %v1691_v33 = vpop.f32.mrf.mxu0  ;;  %v1715_v34 = vpop.f32.mrf.mxu1 }
 0x158   : > { %v1692_v36 = vpop.f32.mrf.mxu0  ;;  %v1716_v38 = vpop.f32.mrf.mxu1 }
 0x159   : > { %v1693_v39 = vadd.f32 %v1692_v36, %v1691_v33  ;;  %v1717_v40 = vadd.f32 %v1716_v38, %v1715_v34  ;;  %v415_v33 = vld [vmem:[#allocation2 + $0x78] sm:$0xff] }
 0x15a   : > { %v1694_v41 = vpop.f32.mrf.mxu0  ;;  %v1718_v42 = vpop.f32.mrf.mxu1 }
 0x15b   : > { %v738_v43 = vadd.f32 %v1693_v39, %v401_v35  ;;  %v746_v44 = vadd.f32 %v1717_v40, %v409_v37 }
 0x15c   : > { %v1695_v46 = vpop.f32.mrf.mxu0  ;;  %v1719_v48 = vpop.f32.mrf.mxu1 }
 0x15d   : > { %754 = vst [vmem:[#allocation2 + $0x30] sm:$0xff] %v738_v43  ;;  %762 = vst [vmem:[#allocation2 + $0x40] sm:$0xff] %v746_v44  ;;  %v1696_v49 = vadd.f32 %v1695_v46, %v1694_v41  ;;  %v1720_v50 = vadd.f32 %v1719_v48, %v1718_v42  ;;  %v408_v41 = vld [vmem:[#allocation2 + $0x48] sm:$0xff] }
 0x15e   : > { %v1697_v51 = vpop.f32.mrf.mxu0  ;;  %v1721_v52 = vpop.f32.mrf.mxu1  ;;  %v416_v43 = vld [vmem:[#allocation2 + $0x28] sm:$0xff] }
 0x15f   : > { %v739_v53 = vadd.f32 %v1696_v49, %v402_v45  ;;  %v747_v54 = vadd.f32 %v1720_v50, %v410_v47 }
 0x160   : > { %v1698_v56 = vpop.f32.mrf.mxu0  ;;  %v1722_v58 = vpop.f32.mrf.mxu1 }
 0x161   : > { %755 = vst [vmem:[#allocation2] sm:$0xff] %v739_v53  ;;  %763 = vst [vmem:[#allocation2 + $0x20] sm:$0xff] %v747_v54  ;;  %v1699_v59 = vadd.f32 %v1698_v56, %v1697_v51  ;;  %v1723_v60 = vadd.f32 %v1722_v58, %v1721_v52 }
 0x162   : > { %v1700_v61 = vpop.f32.mrf.mxu0  ;;  %v1724_v62 = vpop.f32.mrf.mxu1 }
 0x163   : > { %v740_v63 = vadd.f32 %v1699_v59, %v403_v55  ;;  %v748_v0 = vadd.f32 %v1723_v60, %v411_v57 }
 0x164   : > { %v1701_v2 = vpop.f32.mrf.mxu0  ;;  %v1725_v4 = vpop.f32.mrf.mxu1 }
 0x165   : > { %756 = vst [vmem:[#allocation2 + $0x58] sm:$0xff] %v740_v63  ;;  %764 = vst [vmem:[#allocation2 + $0x10] sm:$0xff] %v748_v0  ;;  %v1702_v5 = vadd.f32 %v1701_v2, %v1700_v61  ;;  %v1726_v6 = vadd.f32 %v1725_v4, %v1724_v62 }
 0x166   : > { %v1703_v7 = vpop.f32.mrf.mxu0  ;;  %v1727_v8 = vpop.f32.mrf.mxu1 }
 0x167   : > { %v741_v9 = vadd.f32 %v1702_v5, %v404_v1  ;;  %v749_v10 = vadd.f32 %v1726_v6, %v412_v3 }
 0x168   : > { %v1704_v12 = vpop.f32.mrf.mxu0  ;;  %v1728_v14 = vpop.f32.mrf.mxu1 }
 0x169   : > { %757 = vst [vmem:[#allocation2 + $0x18] sm:$0xff] %v741_v9  ;;  %765 = vst [vmem:[#allocation2 + $0x38] sm:$0xff] %v749_v10  ;;  %v1705_v15 = vadd.f32 %v1704_v12, %v1703_v7  ;;  %v1729_v16 = vadd.f32 %v1728_v14, %v1727_v8 }
 0x16a   : > { %v1706_v17 = vpop.f32.mrf.mxu0  ;;  %v1730_v18 = vpop.f32.mrf.mxu1 }
 0x16b   : > { %v742_v19 = vadd.f32 %v1705_v15, %v405_v11  ;;  %v750_v20 = vadd.f32 %v1729_v16, %v413_v13 }
 0x16c   : > { %v1707_v22 = vpop.f32.mrf.mxu0  ;;  %v1731_v24 = vpop.f32.mrf.mxu1 }
 0x16d   : > { %758 = vst [vmem:[#allocation2 + $0x50] sm:$0xff] %v742_v19  ;;  %766 = vst [vmem:[#allocation2 + $0x60] sm:$0xff] %v750_v20  ;;  %v1708_v25 = vadd.f32 %v1707_v22, %v1706_v17  ;;  %v1732_v26 = vadd.f32 %v1731_v24, %v1730_v18 }
 0x16e   : > { %v1709_v27 = vpop.f32.mrf.mxu0  ;;  %v1733_v28 = vpop.f32.mrf.mxu1 }
 0x16f   : > { %v743_v29 = vadd.f32 %v1708_v25, %v406_v21  ;;  %v751_v30 = vadd.f32 %v1732_v26, %v414_v23 }
 0x170   : > { %v1710_v32 = vpop.f32.mrf.mxu0  ;;  %v1734_v34 = vpop.f32.mrf.mxu1 }
 0x171   : > { %759 = vst [vmem:[#allocation2 + $0x68] sm:$0xff] %v743_v29  ;;  %767 = vst [vmem:[#allocation2 + $0x70] sm:$0xff] %v751_v30  ;;  %v1711_v35 = vadd.f32 %v1710_v32, %v1709_v27  ;;  %v1735_v36 = vadd.f32 %v1734_v34, %v1733_v28 }
 0x172   : > { %v1712_v37 = vpop.f32.mrf.mxu0  ;;  %v1736_v38 = vpop.f32.mrf.mxu1 }
 0x173   : > { %v744_v39 = vadd.f32 %v1711_v35, %v407_v31  ;;  %v752_v40 = vadd.f32 %v1735_v36, %v415_v33 }
 0x174   : > { %v1713_v42 = vpop.f32.mrf.mxu0  ;;  %v1737_v44 = vpop.f32.mrf.mxu1 }
 0x175   : > { %760 = vst [vmem:[#allocation2 + $0x8] sm:$0xff] %v744_v39  ;;  %768 = vst [vmem:[#allocation2 + $0x78] sm:$0xff] %v752_v40  ;;  %v1714_v45 = vadd.f32 %v1713_v42, %v1712_v37  ;;  %v1738_v46 = vadd.f32 %v1737_v44, %v1736_v38  ;;  %773 = sbr.rel (%p1649_p3) target bundleno = 1289 (0x509), region = 64 }
 0x177   : > { %v745_v47 = vadd.f32 %v1714_v45, %v408_v41  ;;  %v753_v48 = vadd.f32 %v1738_v46, %v416_v43 }
 0x179   : > { %761 = vst [vmem:[#allocation2 + $0x48] sm:$0xff] %v745_v47  ;;  %769 = vst [vmem:[#allocation2 + $0x28] sm:$0xff] %v753_v48 }
 0x17a   : > { %v776_v49 = vld [vmem:[%s2646_s19 + $0x10] sm:$0xff]  ;;  %v774_v50 = vld [vmem:[%s2646_s19] sm:$0xff]  ;;  %v777_v51 = vld [vmem:[%s2646_s19 + $0x18] sm:$0xff]  ;;  %v2392_v52 = vmov 0  }
 0x17b   : > { %2033 = vset.pattern.permute.xlu1 %v2392_v52  ;;  %2032 = vset.pattern.permute.xlu0 %v2392_v52  ;;  %v792_v53 = vmax.f32 %v776_v49, 1.0  ;;  %v790_v54 = vmax.f32 %v774_v50, 1.0  ;;  %v793_v55 = vmax.f32 %v777_v51, 1.0  ;;  %v775_v56 = vld [vmem:[%s2646_s19 + $0x8] sm:$0xff]  ;;  %v778_v59 = vld [vmem:[%s2646_s19 + $0x20] sm:$0xff]  ;;  %v781_v61 = vld [vmem:[%s2646_s19 + $0x38] sm:$0xff] }
 0x17c   : > { %v791_v57 = vmax.f32 %v775_v56, 1.0  ;;  %v779_v58 = vld [vmem:[%s2646_s19 + $0x28] sm:$0xff]  ;;  %v780_v62 = vld [vmem:[%s2646_s19 + $0x30] sm:$0xff]  ;;  %v794_v63 = vmax.f32 %v778_v59, 1.0  ;;  %v2034_v0 = vld [vmem:[%s2990_s4 + $0x38] sm:$0xff]   ;;  %v797_v2 = vmax.f32 %v781_v61, 1.0 }
 0x17d   : > { %2050 = vrcp.f32 %v792_v53  ;;  %v795_v60 = vmax.f32 %v779_v58, 1.0  ;;  %v2035_v1 = vld [vmem:[%s2990_s4 + $0x30] sm:$0xff]   ;;  %1771 = vmatprep.subr.bf16.mxu0 %v2034_v0  ;;  %v783_v3 = vld [vmem:[%s2646_s19 + $0x48] sm:$0xff]  ;;  %v796_v4 = vmax.f32 %v780_v62, 1.0  ;;  %v782_v6 = vld [vmem:[%s2646_s19 + $0x40] sm:$0xff] }
 0x17e   : > { %2052 = vrcp.f32 %v790_v54  ;;  %1772 = vmatpush3.bf16.msra.mxu0 %v2034_v0  ;;  %v2036_v5 = vld [vmem:[%s2990_s4 + $0x28] sm:$0xff]   ;;  %v799_v7 = vmax.f32 %v783_v3, 1.0  ;;  %v785_v8 = vld [vmem:[%s2646_s19 + $0x58] sm:$0xff]  ;;  %v784_v9 = vld [vmem:[%s2646_s19 + $0x50] sm:$0xff]  ;;  %v798_v10 = vmax.f32 %v782_v6, 1.0 }
 0x17f   : > { %2054 = vrcp.f32 %v793_v55  ;;  %1773 = vmatprep.subr.bf16.mxu0 %v2035_v1  ;;  %v2037_v11 = vld [vmem:[%s2990_s4 + $0x20] sm:$0xff]   ;;  %v801_v14 = vmax.f32 %v785_v8, 1.0  ;;  %v800_v15 = vmax.f32 %v784_v9, 1.0  ;;  %v787_v16 = vld [vmem:[%s2646_s19 + $0x68] sm:$0xff]  ;;  %v2038_v17 = vld [vmem:[%s2990_s4 + $0x18] sm:$0xff]  }
 0x180   : > { %2056 = vrcp.f32 %v791_v57  ;;  %v786_v20 = vld [vmem:[%s2646_s19 + $0x60] sm:$0xff]  ;;  %v803_v21 = vmax.f32 %v787_v16, 1.0  ;;  %v789_v24 = vld [vmem:[%s2646_s19 + $0x78] sm:$0xff]  ;;  %v2039_v25 = vld [vmem:[%s2990_s4 + $0x10] sm:$0xff]  }
 0x181   : > { %2058 = vrcp.f32 %v795_v60  ;;  %v802_v23 = vmax.f32 %v786_v20, 1.0  ;;  %v788_v27 = vld [vmem:[%s2646_s19 + $0x70] sm:$0xff]  ;;  %v805_v28 = vmax.f32 %v789_v24, 1.0  ;;  %v2040_v31 = vld [vmem:[%s2990_s4 + $0x8] sm:$0xff]   ;;  %v2041_v34 = vld [vmem:[%s2990_s4] sm:$0xff]  }
 0x182   : > { %2060 = vrcp.f32 %v794_v63  ;;  %1774 = vmatpush3.bf16.msra.mxu0 %v2035_v1  ;;  %v804_v30 = vmax.f32 %v788_v27, 1.0  ;;  %v2042_v42 = vld [vmem:[%s2991_s1 + $0x38] sm:$0xff]   ;;  %v2043_v43 = vld [vmem:[%s2991_s1 + $0x30] sm:$0xff]   ;;  %v823_v49 = vld [vmem:[#allocation2] sm:$0xff] }
 0x183   : > { %2062 = vrcp.f32 %v797_v2  ;;  %1775 = vmatprep.subr.bf16.mxu0 %v2036_v5  ;;  %1803 = vmatprep.subr.bf16.mxu1 %v2042_v42  ;;  %v824_v46 = vld [vmem:[#allocation2 + $0x58] sm:$0xff]  ;;  %v822_v48 = vld [vmem:[#allocation2 + $0x30] sm:$0xff]  ;;  %v827_v56 = vld [vmem:[#allocation2 + $0x68] sm:$0xff] }
 0x184   : > { %2064 = vrcp.f32 %v796_v4  ;;  %1804 = vmatpush3.bf16.msra.mxu1 %v2042_v42  ;;  %v825_v47 = vld [vmem:[#allocation2 + $0x18] sm:$0xff]  ;;  %v826_v58 = vld [vmem:[#allocation2 + $0x50] sm:$0xff]  ;;  %v829_v0 = vld [vmem:[#allocation2 + $0x48] sm:$0xff] }
 0x185   : > { %2066 = vrcp.f32 %v799_v7  ;;  %1805 = vmatprep.subr.bf16.mxu1 %v2043_v43  ;;  %v828_v1 = vld [vmem:[#allocation2 + $0x8] sm:$0xff]  ;;  %v831_v7 = vld [vmem:[#allocation2 + $0x20] sm:$0xff] }
 0x186   : > { %1776 = vmatpush3.bf16.msra.mxu0 %v2036_v5  ;;  %2068 = vrcp.f32 %v798_v10  ;;  %v830_v8 = vld [vmem:[#allocation2 + $0x40] sm:$0xff] }
 0x187   : > { %1777 = vmatprep.subr.bf16.mxu0 %v2037_v11  ;;  %2070 = vrcp.f32 %v801_v14  ;;  %v833_v14 = vld [vmem:[#allocation2 + $0x38] sm:$0xff] }
 0x188   : > { %2072 = vrcp.f32 %v800_v15  ;;  %1806 = vmatpush3.bf16.msra.mxu1 %v2043_v43  ;;  %v832_v15 = vld [vmem:[#allocation2 + $0x10] sm:$0xff]  ;;  %v1650_v43 = vld [vmem:[%s2992_s22] ss:$0 sm:$0xff] }
 0x189   : > { %2074 = vrcp.f32 %v803_v21  ;;  %v835_v21 = vld [vmem:[#allocation2 + $0x70] sm:$0xff] }
 0x18a   : > { %v2051_v12 = vpop.eup %2050  ;;  %1778 = vmatpush3.bf16.msra.mxu0 %v2037_v11  ;;  %2076 = vrcp.f32 %v802_v23 }
 0x18b   : > { %v2053_v13 = vpop.eup %2052  ;;  %850 = vperm.xlu1 %2033, %v2051_v12   ;;  %1779 = vmatprep.subr.bf16.mxu0 %v2038_v17  ;;  %2078 = vrcp.f32 %v805_v28  ;;  %v837_v28 = vld [vmem:[#allocation2 + $0x28] sm:$0xff] }
 0x18c   : > { %v2055_v18 = vpop.eup %2054  ;;  %840 = vperm.xlu0 %2032, %v2053_v13   ;;  %2080 = vrcp.f32 %v804_v30 }
 0x18d   : > { %v2057_v19 = vpop.eup %2056 }
 0x18e   : > { %v2059_v22 = vpop.eup %2058  ;;  %1780 = vmatpush3.bf16.msra.mxu0 %v2038_v17 }
 0x18f   : > { %855 = vperm.xlu1 %2033, %v2055_v18   ;;  %v2061_v26 = vpop.eup %2060  ;;  %1781 = vmatprep.subr.bf16.mxu0 %v2039_v25 }
 0x190   : > { %845 = vperm.xlu0 %2032, %v2057_v19   ;;  %v2063_v29 = vpop.eup %2062 }
 0x191   : > { %v2065_v32 = vpop.eup %2064 }
 0x192   : > { %1782 = vmatpush3.bf16.msra.mxu0 %v2039_v25  ;;  %v2067_v33 = vpop.eup %2066 }
 0x193   : > { %865 = vperm.xlu1 %2033, %v2059_v22   ;;  %1783 = vmatprep.subr.bf16.mxu0 %v2040_v31  ;;  %v2069_v35 = vpop.eup %2068  ;;  %v834_v22 = vld [vmem:[#allocation2 + $0x60] sm:$0xff] }
 0x194   : > { %860 = vperm.xlu0 %2032, %v2061_v26   ;;  %v2071_v36 = vpop.eup %2070 }
 0x195   : > { %v2073_v37 = vpop.eup %2072 }
 0x196   : > { %1784 = vmatpush3.bf16.msra.mxu0 %v2040_v31  ;;  %v2075_v38 = vpop.eup %2074 }
 0x197   : > { %875 = vperm.xlu1 %2033, %v2063_v29   ;;  %1785 = vmatprep.subr.bf16.mxu0 %v2041_v34  ;;  %v2077_v39 = vpop.eup %2076  ;;  %v836_v29 = vld [vmem:[#allocation2 + $0x78] sm:$0xff] }
 0x198   : > { %870 = vperm.xlu0 %2032, %v2065_v32   ;;  %v2079_v40 = vpop.eup %2078 }
 0x199   : > { %v2081_v41 = vpop.eup %2080 }
 0x19a   : > { %1786 = vmatpush3.bf16.msra.mxu0 %v2041_v34 }
 0x19b   : > { %885 = vperm.xlu1 %2033, %v2067_v33  }
 0x19c   : > { %880 = vperm.xlu0 %2032, %v2069_v35  }
 0x19f   : > { %895 = vperm.xlu1 %2033, %v2071_v36   ;;  %v2044_v36 = vld [vmem:[%s2991_s1 + $0x28] sm:$0xff]  }
 0x1a0   : > { %890 = vperm.xlu0 %2032, %v2073_v37   ;;  %1807 = vmatprep.subr.bf16.mxu1 %v2044_v36  ;;  %v2045_v37 = vld [vmem:[%s2991_s1 + $0x20] sm:$0xff]  }
 0x1a1   : > { %1808 = vmatpush3.bf16.msra.mxu1 %v2044_v36 }
 0x1a2   : > { %1809 = vmatprep.subr.bf16.mxu1 %v2045_v37 }
 0x1a3   : > { %905 = vperm.xlu1 %2033, %v2075_v38   ;;  %v2046_v38 = vld [vmem:[%s2991_s1 + $0x18] sm:$0xff]  }
 0x1a4   : > { %900 = vperm.xlu0 %2032, %v2077_v39   ;;  %v2047_v39 = vld [vmem:[%s2991_s1 + $0x10] sm:$0xff]  }
 0x1a5   : > { %1810 = vmatpush3.bf16.msra.mxu1 %v2045_v37 }
 0x1a6   : > { %1811 = vmatprep.subr.bf16.mxu1 %v2046_v38 }
 0x1a7   : > { %915 = vperm.xlu1 %2033, %v2079_v40   ;;  %v2048_v40 = vld [vmem:[%s2991_s1 + $0x8] sm:$0xff]  }
 0x1a8   : > { %910 = vperm.xlu0 %2032, %v2081_v41   ;;  %v2049_v41 = vld [vmem:[%s2991_s1] sm:$0xff]  }
 0x1a9   : > { %1812 = vmatpush3.bf16.msra.mxu1 %v2046_v38 }
 0x1aa   : > { %1813 = vmatprep.subr.bf16.mxu1 %v2047_v39 }
 0x1ad   : > { %1814 = vmatpush3.bf16.msra.mxu1 %v2047_v39 }
 0x1ae   : > { %1815 = vmatprep.subr.bf16.mxu1 %v2048_v40 }
 0x1b1   : > { %1816 = vmatpush3.bf16.msra.mxu1 %v2048_v40 }
 0x1b2   : > { %1817 = vmatprep.subr.bf16.mxu1 %v2049_v41 }
 0x1b5   : > { %1818 = vmatpush3.bf16.msra.mxu1 %v2049_v41 }
 0x206   : > { %v851_v44 = vpop.permute.xlu1 %850 }
 0x207   : > { %v841_v45 = vpop.permute.xlu0 %840  ;;  %v920_v51 = vmul.f32 %v851_v44, %v824_v46 }
 0x208   : > { %v918_v54 = vmul.f32 %v841_v45, %v822_v48 }
 0x20a   : > { %v856_v50 = vpop.permute.xlu1 %855 }
 0x20b   : > { %v921_v52 = vmul.f32 %v856_v50, %v825_v47  ;;  %v846_v53 = vpop.permute.xlu0 %845 }
 0x20c   : > { %v919_v55 = vmul.f32 %v846_v53, %v823_v49 }
 0x20d   : > { %v935_v57 = vpack.c.bf16 %v921_v52, %v920_v51 }
 0x20e   : > { %v866_v59 = vpop.permute.xlu1 %865  ;;  %v934_v60 = vpack.c.bf16 %v919_v55, %v918_v54 }
 0x20f   : > { %v923_v61 = vmul.f32 %v866_v59, %v827_v56  ;;  %v861_v62 = vpop.permute.xlu0 %860 }
 0x210   : > { %v922_v63 = vmul.f32 %v861_v62, %v826_v58  ;;  %1787 = vmatprep.mubr.bf16.mxu0 %v934_v60 }
 0x211   : > { %1788 = vmatmul.mubr.bf16.vlgmr.msra.gmra.mxu0 %v935_v57 }
 0x212   : > { %v936_v2 = vpack.c.bf16 %v923_v61, %v922_v63  ;;  %v876_v3 = vpop.permute.xlu1 %875 }
 0x213   : > { %v925_v4 = vmul.f32 %v876_v3, %v829_v0  ;;  %v871_v5 = vpop.permute.xlu0 %870 }
 0x214   : > { %v924_v6 = vmul.f32 %v871_v5, %v828_v1  ;;  %1791 = vmatprep.mubr.bf16.mxu0 %v936_v2 }
 0x216   : > { %v937_v9 = vpack.c.bf16 %v925_v4, %v924_v6  ;;  %v886_v10 = vpop.permute.xlu1 %885 }
 0x217   : > { %v927_v11 = vmul.f32 %v886_v10, %v831_v7  ;;  %v881_v12 = vpop.permute.xlu0 %880 }
 0x218   : > { %v926_v13 = vmul.f32 %v881_v12, %v830_v8 }
 0x219   : > { %1792 = vmatmul.mubr.bf16.gmra.mxu0 %v937_v9 }
 0x21a   : > { %v938_v16 = vpack.c.bf16 %v927_v11, %v926_v13  ;;  %v896_v17 = vpop.permute.xlu1 %895 }
 0x21b   : > { %v929_v18 = vmul.f32 %v896_v17, %v833_v14  ;;  %v891_v19 = vpop.permute.xlu0 %890 }
 0x21c   : > { %v928_v20 = vmul.f32 %v891_v19, %v832_v15  ;;  %1795 = vmatprep.mubr.bf16.mxu0 %v938_v16 }
 0x21e   : > { %v939_v23 = vpack.c.bf16 %v929_v18, %v928_v20  ;;  %v906_v24 = vpop.permute.xlu1 %905 }
 0x21f   : > { %v931_v25 = vmul.f32 %v906_v24, %v835_v21  ;;  %v901_v26 = vpop.permute.xlu0 %900 }
 0x220   : > { %v930_v27 = vmul.f32 %v901_v26, %v834_v22 }
 0x221   : > { %1796 = vmatmul.mubr.bf16.gmra.mxu0 %v939_v23 }
 0x222   : > { %v940_v30 = vpack.c.bf16 %v931_v25, %v930_v27  ;;  %v916_v31 = vpop.permute.xlu1 %915 }
 0x223   : > { %v933_v32 = vmul.f32 %v916_v31, %v837_v28  ;;  %v911_v33 = vpop.permute.xlu0 %910 }
 0x224   : > { %v932_v34 = vmul.f32 %v911_v33, %v836_v29  ;;  %1799 = vmatprep.mubr.bf16.mxu0 %v940_v30 }
 0x226   : > { %v941_v35 = vpack.c.bf16 %v933_v32, %v932_v34 }
 0x229   : > { %1800 = vmatmul.mubr.bf16.gmra.mxu0 %v941_v35  ;;  %v1659_v35 = vld [vmem:[%s2993_s16] ss:$0 sm:$0xff] }
 0x2d1   : > { %v1789_v42 = vpop.f32.mrf.mxu0 }
 0x2d2   : > { %v1056_v48 = vadd.f32 %v1789_v42, %v1650_v43 }
 0x2d3   : > { %v1047_v44 = vpop.f32.mrf.mxu0 }
 0x2d4   : > { %v1048_v45 = vadd.f32 %v1650_v43, %v1047_v44 }
 0x2d5   : > { %v1790_v46 = vpop.f32.mrf.mxu0 }
 0x2d6   : > { %v1059_v47 = vadd.f32 %v1790_v46, %v1650_v43  ;;  %2082 = vtanh.f32 %v1048_v45 }
 0x2d7   : > { %v1050_v49 = vpop.f32.mrf.mxu0 }
 0x2d8   : > { %v1051_v50 = vadd.f32 %v1650_v43, %v1050_v49  ;;  %2084 = vtanh.f32 %v1059_v47 }
 0x2d9   : > { %v1793_v51 = vpop.f32.mrf.mxu0 }
 0x2da   : > { %2086 = vtanh.f32 %v1051_v50  ;;  %v1072_v56 = vadd.f32 %v1793_v51, %v1650_v43 }
 0x2db   : > { %2088 = vtanh.f32 %v1056_v48  ;;  %v1063_v52 = vpop.f32.mrf.mxu0 }
 0x2dc   : > { %v1064_v53 = vadd.f32 %v1650_v43, %v1063_v52 }
 0x2dd   : > { %v1794_v54 = vpop.f32.mrf.mxu0 }
 0x2de   : > { %v1075_v55 = vadd.f32 %v1794_v54, %v1650_v43  ;;  %2090 = vtanh.f32 %v1064_v53 }
 0x2df   : > { %v1066_v57 = vpop.f32.mrf.mxu0 }
 0x2e0   : > { %v1067_v58 = vadd.f32 %v1650_v43, %v1066_v57  ;;  %2092 = vtanh.f32 %v1075_v55 }
 0x2e1   : > { %v1797_v59 = vpop.f32.mrf.mxu0 }
 0x2e2   : > { %2094 = vtanh.f32 %v1067_v58  ;;  %v1088_v3 = vadd.f32 %v1797_v59, %v1650_v43 }
 0x2e3   : > { %2096 = vtanh.f32 %v1072_v56  ;;  %v1079_v60 = vpop.f32.mrf.mxu0  ;;  %v2083_v62 = vpop.eup %2082 }
 0x2e4   : > { %v1080_v61 = vadd.f32 %v1650_v43, %v1079_v60 }
 0x2e5   : > { %v1798_v63 = vpop.f32.mrf.mxu0  ;;  %v2085_v0 = vpop.eup %2084 }
 0x2e6   : > { %v1091_v1 = vadd.f32 %v1798_v63, %v1650_v43  ;;  %2098 = vtanh.f32 %v1080_v61 }
 0x2e7   : > { %v2087_v2 = vpop.eup %2086  ;;  %v1082_v4 = vpop.f32.mrf.mxu0 }
 0x2e8   : > { %v2089_v5 = vpop.eup %2088  ;;  %v1083_v6 = vadd.f32 %v1650_v43, %v1082_v4  ;;  %v1126_v7 = vpack.c.bf16 %v2087_v2, %v2083_v62  ;;  %2100 = vtanh.f32 %v1091_v1 }
 0x2e9   : > { %v1801_v8 = vpop.f32.mrf.mxu0  ;;  %v1127_v9 = vpack.c.bf16 %v2085_v0, %v2089_v5 }
 0x2ea   : > { %2102 = vtanh.f32 %v1083_v6  ;;  %1819 = vmatprep.mubr.bf16.mxu1 %v1126_v7  ;;  %v1104_v17 = vadd.f32 %v1801_v8, %v1650_v43 }
 0x2eb   : > { %2104 = vtanh.f32 %v1088_v3  ;;  %v1095_v10 = vpop.f32.mrf.mxu0  ;;  %1820 = vmatmul.mubr.bf16.vlgmr.msra.gmra.mxu1 %v1127_v9  ;;  %v2091_v12 = vpop.eup %2090 }
 0x2ec   : > { %v1096_v11 = vadd.f32 %v1650_v43, %v1095_v10 }
 0x2ed   : > { %v1802_v13 = vpop.f32.mrf.mxu0  ;;  %v2093_v14 = vpop.eup %2092 }
 0x2ee   : > { %v1107_v15 = vadd.f32 %v1802_v13, %v1650_v43  ;;  %2106 = vtanh.f32 %v1096_v11 }
 0x2ef   : > { %v2095_v16 = vpop.eup %2094  ;;  %v1098_v18 = vpop.f32.mrf.mxu0 }
 0x2f0   : > { %v2097_v19 = vpop.eup %2096  ;;  %v1099_v20 = vadd.f32 %v1650_v43, %v1098_v18  ;;  %v1128_v21 = vpack.c.bf16 %v2095_v16, %v2091_v12  ;;  %2108 = vtanh.f32 %v1107_v15 }
 0x2f1   : > { %v1129_v22 = vpack.c.bf16 %v2093_v14, %v2097_v19 }
 0x2f2   : > { %2110 = vtanh.f32 %v1099_v20  ;;  %1823 = vmatprep.mubr.bf16.mxu1 %v1128_v21 }
 0x2f3   : > { %2112 = vtanh.f32 %v1104_v17  ;;  %1824 = vmatmul.mubr.bf16.gmra.mxu1 %v1129_v22  ;;  %v2099_v23 = vpop.eup %2098 }
 0x2f5   : > { %v2101_v24 = vpop.eup %2100 }
 0x2f7   : > { %v2103_v25 = vpop.eup %2102 }
 0x2f8   : > { %v2105_v26 = vpop.eup %2104  ;;  %v1130_v27 = vpack.c.bf16 %v2103_v25, %v2099_v23 }
 0x2f9   : > { %v1131_v28 = vpack.c.bf16 %v2101_v24, %v2105_v26 }
 0x2fa   : > { %1827 = vmatprep.mubr.bf16.mxu1 %v1130_v27 }
 0x2fb   : > { %1828 = vmatmul.mubr.bf16.gmra.mxu1 %v1131_v28  ;;  %v2107_v29 = vpop.eup %2106 }
 0x2fd   : > { %v2109_v30 = vpop.eup %2108 }
 0x2ff   : > { %v2111_v31 = vpop.eup %2110 }
 0x300   : > { %v2113_v32 = vpop.eup %2112  ;;  %v1132_v33 = vpack.c.bf16 %v2111_v31, %v2107_v29 }
 0x301   : > { %v1133_v34 = vpack.c.bf16 %v2109_v30, %v2113_v32 }
 0x302   : > { %1831 = vmatprep.mubr.bf16.mxu1 %v1132_v33 }
 0x303   : > { %1832 = vmatmul.mubr.bf16.gmra.mxu1 %v1133_v34 }
 0x3ab   : > { %v1821_v36 = vpop.f32.mrf.mxu1 }
 0x3ac   : > { %v1248_v37 = vadd.f32 %v1821_v36, %v1659_v35 }
 0x3ad   : > { %v1239_v38 = vpop.f32.mrf.mxu1 }
 0x3ae   : > { %1306 = vmax.xlane.f32.xlu0 %v1248_v37  ;;  %v1240_v40 = vadd.f32 %v1659_v35, %v1239_v38 }
 0x3af   : > { %v1822_v39 = vpop.f32.mrf.mxu1 }
 0x3b0   : > { %v1251_v44 = vadd.f32 %v1822_v39, %v1659_v35 }
 0x3b1   : > { %v1242_v41 = vpop.f32.mrf.mxu1 }
 0x3b2   : > { %v1243_v42 = vadd.f32 %v1659_v35, %v1242_v41  ;;  %1302 = vmax.xlane.f32.xlu0 %v1240_v40 }
 0x3b3   : > { %v1825_v43 = vpop.f32.mrf.mxu1 }
 0x3b4   : > { %1304 = vmax.xlane.f32.xlu1 %v1243_v42  ;;  %v1264_v46 = vadd.f32 %v1825_v43, %v1659_v35 }
 0x3b5   : > { %v1255_v45 = vpop.f32.mrf.mxu1 }
 0x3b6   : > { %1308 = vmax.xlane.f32.xlu0 %v1251_v44  ;;  %v1256_v50 = vadd.f32 %v1659_v35, %v1255_v45 }
 0x3b7   : > { %v1826_v47 = vpop.f32.mrf.mxu1 }
 0x3b8   : > { %v1267_v48 = vadd.f32 %v1826_v47, %v1659_v35  ;;  %1314 = vmax.xlane.f32.xlu1 %v1264_v46 }
 0x3b9   : > { %v1258_v49 = vpop.f32.mrf.mxu1 }
 0x3ba   : > { %1316 = vmax.xlane.f32.xlu0 %v1267_v48  ;;  %v1259_v52 = vadd.f32 %v1659_v35, %v1258_v49 }
 0x3bb   : > { %v1829_v51 = vpop.f32.mrf.mxu1 }
 0x3bc   : > { %1310 = vmax.xlane.f32.xlu1 %v1256_v50  ;;  %v1280_v54 = vadd.f32 %v1829_v51, %v1659_v35 }
 0x3bd   : > { %v1271_v53 = vpop.f32.mrf.mxu1 }
 0x3be   : > { %1312 = vmax.xlane.f32.xlu0 %v1259_v52  ;;  %v2756_v58 = vadd.f32 %v1659_v35, %v1271_v53 }
 0x3bf   : > { %v1830_v55 = vpop.f32.mrf.mxu1 }
 0x3c0   : > { %v2754_v56 = vadd.f32 %v1830_v55, %v1659_v35  ;;  %1322 = vmax.xlane.f32.xlu1 %v1280_v54 }
 0x3c1   : > { %v1274_v57 = vpop.f32.mrf.mxu1 }
 0x3c2   : > { %1324 = vmax.xlane.f32.xlu0 %v2754_v56  ;;  %v2759_v60 = vadd.f32 %v1659_v35, %v1274_v57 }
 0x3c3   : > { %v1833_v59 = vpop.f32.mrf.mxu1 }
 0x3c4   : > { %1318 = vmax.xlane.f32.xlu1 %v2756_v58  ;;  %v2766_v1 = vadd.f32 %v1833_v59, %v1659_v35 }
 0x3c5   : > { %v1287_v61 = vpop.f32.mrf.mxu1 }
 0x3c6   : > { %v2762_v62 = vadd.f32 %v1659_v35, %v1287_v61  ;;  %1320 = vmax.xlane.f32.xlu0 %v2759_v60 }
 0x3c7   : > { %v1834_v63 = vpop.f32.mrf.mxu1 }
 0x3c8   : > { %1326 = vmax.xlane.f32.xlu1 %v2762_v62  ;;  %v2772_v3 = vadd.f32 %v1834_v63, %v1659_v35 }
 0x3c9   : > { %v1290_v0 = vpop.f32.mrf.mxu1 }
 0x3ca   : > { %v2768_v2 = vadd.f32 %v1659_v35, %v1290_v0 }
 0x3cc   : > { %1328 = vmax.xlane.f32.xlu0 %v2768_v2  ;;  %1330 = vmax.xlane.f32.xlu1 %v2766_v1 }
 0x3d0   : > { %1332 = vmax.xlane.f32.xlu0 %v2772_v3 }
 0x437   : > { %v1307_v4 = vpop.xlane.xlu0 %1306 }
 0x438   : > { %v1336_v5 = vsub.f32 %v1248_v37, %v1307_v4 }
 0x43a   : > { %v1354_v6 = vmul.f32 1.442695, %v1336_v5 }
 0x43b   : > { %v1303_v7 = vpop.xlane.xlu0 %1302 }
 0x43c   : > { %2114 = vpow2.f32 %v1354_v6  ;;  %v1334_v8 = vsub.f32 %v1240_v40, %v1303_v7 }
 0x43d   : > { %v1305_v9 = vpop.xlane.xlu1 %1304 }
 0x43e   : > { %v1350_v10 = vmul.f32 1.442695, %v1334_v8  ;;  %v1335_v12 = vsub.f32 %v1243_v42, %v1305_v9 }
 0x43f   : > { %v1309_v11 = vpop.xlane.xlu0 %1308 }
 0x440   : > { %2116 = vpow2.f32 %v1350_v10  ;;  %v1337_v13 = vsub.f32 %v1251_v44, %v1309_v11  ;;  %v1352_v18 = vmul.f32 1.442695, %v1335_v12 }
 0x441   : > { %v1315_v14 = vpop.xlane.xlu1 %1314 }
 0x442   : > { %v1356_v15 = vmul.f32 1.442695, %v1337_v13  ;;  %v1340_v16 = vsub.f32 %v1264_v46, %v1315_v14 }
 0x443   : > { %v1317_v17 = vpop.xlane.xlu0 %1316 }
 0x444   : > { %2118 = vpow2.f32 %v1356_v15  ;;  %v1362_v19 = vmul.f32 1.442695, %v1340_v16  ;;  %v1341_v20 = vsub.f32 %v1267_v48, %v1317_v17 }
 0x445   : > { %v1311_v21 = vpop.xlane.xlu1 %1310 }
 0x446   : > { %2120 = vpow2.f32 %v1362_v19  ;;  %v1338_v22 = vsub.f32 %v1256_v50, %v1311_v21  ;;  %v1364_v24 = vmul.f32 1.442695, %v1341_v20 }
 0x447   : > { %v1313_v23 = vpop.xlane.xlu0 %1312  ;;  %2122 = vpow2.f32 %v1352_v18 }
 0x448   : > { %v1358_v25 = vmul.f32 1.442695, %v1338_v22  ;;  %v1339_v26 = vsub.f32 %v1259_v52, %v1313_v23 }
 0x449   : > { %v2775_v27 = vpop.eup %2114  ;;  %v1323_v28 = vpop.xlane.xlu1 %1322 }
 0x44a   : > { %2124 = vpow2.f32 %v1358_v25  ;;  %v1344_v29 = vsub.f32 %v1280_v54, %v1323_v28  ;;  %1386 = vadd.xlane.f32.xlu1 %v2775_v27  ;;  %v1360_v31 = vmul.f32 1.442695, %v1339_v26 }
 0x44b   : > { %v1325_v30 = vpop.xlane.xlu0 %1324  ;;  %2126 = vpow2.f32 %v1364_v24 }
 0x44c   : > { %v1370_v32 = vmul.f32 1.442695, %v1344_v29  ;;  %v1345_v33 = vsub.f32 %v2754_v56, %v1325_v30 }
 0x44d   : > { %v2779_v34 = vpop.eup %2116  ;;  %v1319_v35 = vpop.xlane.xlu1 %1318 }
 0x44e   : > { %2128 = vpow2.f32 %v1370_v32  ;;  %v1342_v36 = vsub.f32 %v2756_v58, %v1319_v35  ;;  %1382 = vadd.xlane.f32.xlu1 %v2779_v34  ;;  %v1372_v38 = vmul.f32 1.442695, %v1345_v33 }
 0x44f   : > { %v1321_v37 = vpop.xlane.xlu0 %1320  ;;  %2130 = vpow2.f32 %v1360_v31 }
 0x450   : > { %v1366_v39 = vmul.f32 1.442695, %v1342_v36  ;;  %v1343_v40 = vsub.f32 %v2759_v60, %v1321_v37 }
 0x451   : > { %v2784_v41 = vpop.eup %2118  ;;  %v1327_v42 = vpop.xlane.xlu1 %1326 }
 0x452   : > { %2132 = vpow2.f32 %v1366_v39  ;;  %v1346_v43 = vsub.f32 %v2762_v62, %v1327_v42  ;;  %1388 = vadd.xlane.f32.xlu0 %v2784_v41  ;;  %v1368_v45 = vmul.f32 1.442695, %v1343_v40 }
 0x453   : > { %v2788_v44 = vpop.eup %2120  ;;  %2134 = vpow2.f32 %v1372_v38 }
 0x454   : > { %v1374_v46 = vmul.f32 1.442695, %v1346_v43  ;;  %1394 = vadd.xlane.f32.xlu1 %v2788_v44  ;;  %v2791_v47 = vpop.eup %2122 }
 0x455   : > { %v1331_v48 = vpop.xlane.xlu1 %1330  ;;  %v1329_v49 = vpop.xlane.xlu0 %1328 }
 0x456   : > { %2136 = vpow2.f32 %v1374_v46  ;;  %v1348_v50 = vsub.f32 %v2766_v1, %v1331_v48  ;;  %v1347_v51 = vsub.f32 %v2768_v2, %v1329_v49  ;;  %1384 = vadd.xlane.f32.xlu0 %v2791_v47 }
 0x457   : > { %v2796_v52 = vpop.eup %2124  ;;  %2138 = vpow2.f32 %v1368_v45 }
 0x458   : > { %v1378_v53 = vmul.f32 1.442695, %v1348_v50  ;;  %v1376_v54 = vmul.f32 1.442695, %v1347_v51  ;;  %1390 = vadd.xlane.f32.xlu1 %v2796_v52  ;;  %v2799_v55 = vpop.eup %2126 }
 0x459   : > { %v1333_v56 = vpop.xlane.xlu0 %1332 }
 0x45a   : > { %2140 = vpow2.f32 %v1378_v53  ;;  %v1349_v57 = vsub.f32 %v2772_v3, %v1333_v56  ;;  %1396 = vadd.xlane.f32.xlu0 %v2799_v55 }
 0x45b   : > { %v2803_v58 = vpop.eup %2128  ;;  %2142 = vpow2.f32 %v1376_v54 }
 0x45c   : > { %v1380_v59 = vmul.f32 1.442695, %v1349_v57  ;;  %1402 = vadd.xlane.f32.xlu1 %v2803_v58  ;;  %v2806_v60 = vpop.eup %2130 }
 0x45e   : > { %1392 = vadd.xlane.f32.xlu0 %v2806_v60  ;;  %2144 = vpow2.f32 %v1380_v59 }
 0x45f   : > { %v2809_v61 = vpop.eup %2132 }
 0x460   : > { %1398 = vadd.xlane.f32.xlu1 %v2809_v61  ;;  %v2812_v62 = vpop.eup %2134 }
 0x462   : > { %1404 = vadd.xlane.f32.xlu0 %v2812_v62 }
 0x463   : > { %v2815_v63 = vpop.eup %2136 }
 0x464   : > { %1406 = vadd.xlane.f32.xlu1 %v2815_v63  ;;  %v2818_v0 = vpop.eup %2138 }
 0x466   : > { %1400 = vadd.xlane.f32.xlu0 %v2818_v0 }
 0x467   : > { %v2821_v1 = vpop.eup %2140 }
 0x468   : > { %1410 = vadd.xlane.f32.xlu1 %v2821_v1  ;;  %v2824_v2 = vpop.eup %2142 }
 0x46a   : > { %1408 = vadd.xlane.f32.xlu0 %v2824_v2 }
 0x46b   : > { %v2827_v3 = vpop.eup %2144 }
 0x46e   : > { %1412 = vadd.xlane.f32.xlu0 %v2827_v3 }
 0x4d3   : > { %v1387_v4 = vpop.xlane.xlu1 %1386 }
 0x4d4   : > { %2146 = vrcp.f32 %v1387_v4 }
 0x4d7   : > { %v1383_v5 = vpop.xlane.xlu1 %1382 }
 0x4d8   : > { %2148 = vrcp.f32 %v1383_v5 }
 0x4db   : > { %v1389_v6 = vpop.xlane.xlu0 %1388 }
 0x4dc   : > { %2150 = vrcp.f32 %v1389_v6 }
 0x4dd   : > { %v1395_v7 = vpop.xlane.xlu1 %1394 }
 0x4de   : > { %2152 = vrcp.f32 %v1395_v7 }
 0x4df   : > { %v1385_v8 = vpop.xlane.xlu0 %1384 }
 0x4e0   : > { %2154 = vrcp.f32 %v1385_v8 }
 0x4e1   : > { %v2147_v9 = vpop.eup %2146  ;;  %v1391_v10 = vpop.xlane.xlu1 %1390 }
 0x4e2   : > { %v1419_v11 = vmul.f32 %v2147_v9, %v2775_v27  ;;  %2156 = vrcp.f32 %v1391_v10 }
 0x4e3   : > { %v1397_v12 = vpop.xlane.xlu0 %1396 }
 0x4e4   : > { %1448 = vst [vmem:[%s2648_s0 + $0x10] sm:$0xff] %v1419_v11  ;;  %2158 = vrcp.f32 %v1397_v12 }
 0x4e5   : > { %v2149_v13 = vpop.eup %2148  ;;  %v1403_v14 = vpop.xlane.xlu1 %1402 }
 0x4e6   : > { %v1415_v15 = vmul.f32 %v2149_v13, %v2779_v34  ;;  %2160 = vrcp.f32 %v1403_v14 }
 0x4e7   : > { %v1393_v16 = vpop.xlane.xlu0 %1392 }
 0x4e8   : > { %1446 = vst [vmem:[%s2648_s0] sm:$0xff] %v1415_v15  ;;  %2162 = vrcp.f32 %v1393_v16 }
 0x4e9   : > { %v2151_v17 = vpop.eup %2150  ;;  %v1399_v18 = vpop.xlane.xlu1 %1398 }
 0x4ea   : > { %v1421_v19 = vmul.f32 %v2151_v17, %v2784_v41  ;;  %2164 = vrcp.f32 %v1399_v18 }
 0x4eb   : > { %v2153_v20 = vpop.eup %2152  ;;  %v1405_v21 = vpop.xlane.xlu0 %1404 }
 0x4ec   : > { %1449 = vst [vmem:[%s2648_s0 + $0x18] sm:$0xff] %v1421_v19  ;;  %v1427_v22 = vmul.f32 %v2153_v20, %v2788_v44  ;;  %2166 = vrcp.f32 %v1405_v21 }
 0x4ed   : > { %v2155_v23 = vpop.eup %2154  ;;  %v1407_v24 = vpop.xlane.xlu1 %1406 }
 0x4ee   : > { %1452 = vst [vmem:[%s2648_s0 + $0x30] sm:$0xff] %v1427_v22  ;;  %v1417_v25 = vmul.f32 %v2155_v23, %v2791_v47  ;;  %2168 = vrcp.f32 %v1407_v24 }
 0x4ef   : > { %v2157_v26 = vpop.eup %2156  ;;  %v1401_v27 = vpop.xlane.xlu0 %1400 }
 0x4f0   : > { %1447 = vst [vmem:[%s2648_s0 + $0x8] sm:$0xff] %v1417_v25  ;;  %v1423_v28 = vmul.f32 %v2157_v26, %v2796_v52  ;;  %2170 = vrcp.f32 %v1401_v27 }
 0x4f1   : > { %v2159_v29 = vpop.eup %2158  ;;  %v1411_v30 = vpop.xlane.xlu1 %1410 }
 0x4f2   : > { %1450 = vst [vmem:[%s2648_s0 + $0x20] sm:$0xff] %v1423_v28  ;;  %v1429_v31 = vmul.f32 %v2159_v29, %v2799_v55  ;;  %2172 = vrcp.f32 %v1411_v30 }
 0x4f3   : > { %v2161_v32 = vpop.eup %2160  ;;  %v1409_v33 = vpop.xlane.xlu0 %1408 }
 0x4f4   : > { %1453 = vst [vmem:[%s2648_s0 + $0x38] sm:$0xff] %v1429_v31  ;;  %v1435_v34 = vmul.f32 %v2161_v32, %v2803_v58  ;;  %2174 = vrcp.f32 %v1409_v33 }
 0x4f5   : > { %v2163_v35 = vpop.eup %2162 }
 0x4f6   : > { %1456 = vst [vmem:[%s2648_s0 + $0x50] sm:$0xff] %v1435_v34  ;;  %v1425_v36 = vmul.f32 %v2163_v35, %v2806_v60 }
 0x4f7   : > { %v2165_v37 = vpop.eup %2164  ;;  %v1413_v38 = vpop.xlane.xlu0 %1412 }
 0x4f8   : > { %1451 = vst [vmem:[%s2648_s0 + $0x28] sm:$0xff] %v1425_v36  ;;  %v1431_v39 = vmul.f32 %v2165_v37, %v2809_v61  ;;  %2176 = vrcp.f32 %v1413_v38 }
 0x4f9   : > { %v2167_v40 = vpop.eup %2166 }
 0x4fa   : > { %1454 = vst [vmem:[%s2648_s0 + $0x40] sm:$0xff] %v1431_v39  ;;  %v1437_v41 = vmul.f32 %v2167_v40, %v2812_v62 }
 0x4fb   : > { %v2169_v42 = vpop.eup %2168 }
 0x4fc   : > { %1457 = vst [vmem:[%s2648_s0 + $0x58] sm:$0xff] %v1437_v41  ;;  %v1439_v43 = vmul.f32 %v2169_v42, %v2815_v63 }
 0x4fd   : > { %v2171_v44 = vpop.eup %2170 }
 0x4fe   : > { %1458 = vst [vmem:[%s2648_s0 + $0x60] sm:$0xff] %v1439_v43  ;;  %v1433_v45 = vmul.f32 %v2171_v44, %v2818_v0 }
 0x4ff   : > { %v2173_v46 = vpop.eup %2172 }
 0x500   : > { %1455 = vst [vmem:[%s2648_s0 + $0x48] sm:$0xff] %v1433_v45  ;;  %v1443_v47 = vmul.f32 %v2173_v46, %v2821_v1 }
 0x501   : > { %v2175_v48 = vpop.eup %2174 }
 0x502   : > { %1460 = vst [vmem:[%s2648_s0 + $0x70] sm:$0xff] %v1443_v47  ;;  %v1441_v49 = vmul.f32 %v2175_v48, %v2824_v2 }
 0x504   : > { %1459 = vst [vmem:[%s2648_s0 + $0x68] sm:$0xff] %v1441_v49 }
 0x505   : > { %v2177_v50 = vpop.eup %2176 }
 0x506   : > { %v1445_v51 = vmul.f32 %v2177_v50, %v2827_v3 }
 0x508   : > { %1461 = vst [vmem:[%s2648_s0 + $0x78] sm:$0xff] %v1445_v51 }
 0x509 PF: > { %s2994_s19 = sld [smem:[#allocation13_spill]]  ;;  %s1476_s15 = sshll.u32 %s2648_s0, 4  ;;  %s2869_s15 = int_to_ptr.vmem [resolvable:$true] %s1476_s15 }
 0x50a   : > { %s2995_s17 = sld [smem:[#allocation23_spill]]  ;;  %s2873_s27 = scalar_lea.sflag [#allocation5], %s367_s21 }
 0x50b   : > { %s2234_s22 = scalar_lea.vmem %s2869_s15, 2048  ;;  %s2393_s18 = smov [#allocation8]  }
 0x50c   : > { %p2235_p13 = scmp.ne.s32.totalorder %s2869_s15, %s2234_s22  ;;  %s2238_s5 = sshll.u32 %s2393_s18, 4  ;;  %s2239_s5 = int_to_ptr.vmem [resolvable:$false] %s2238_s5 }
 0x50d   : > { %s2240_s16 = scalar_lea.vmem %s2239_s5, 4096  ;;  %p2241_p0 = scmp.lt.s32.totalorder %s2869_s15, %s2239_s5 }
 0x50e   : > { %p2236_p2 = pnand %p2235_p13, %p2598_p6  ;;  %p2242_p9 = scmp.lt.s32.totalorder %s2240_s16, %s2234_s22 }
 0x50f   : > { %s1674_s11 = sshll.u32 %s2994_s19, 11 }
 0x510   : > { %s2866_s23 = scalar_lea.hbm %s2995_s17, %s1674_s11  ;;  %p2237_p12 = pneg %p2236_p2 }
 0x511   : > { %p2243_p4 = por %p2242_p9, %p2241_p0 }
 0x513   : > { %p2244_p7 = pnand %p2243_p4, %p2237_p12 }
 0x515   : > { %2247 = shalt.err (!%p2244_p7)
}
 0x516   : > { %s2248_s21 = scalar_lea.hbm %s2866_s23, 2048  ;;  %s2252_s11 = scalar_lea.hbm %s2995_s17, 4096 }
 0x517   : > { %p2249_p5 = scmp.ne.s32.totalorder %s2866_s23, %s2248_s21  ;;  %p2253_p11 = scmp.lt.s32.totalorder %s2866_s23, %s2995_s17 }
 0x518   : > { %p2254_p1 = scmp.lt.s32.totalorder %s2252_s11, %s2248_s21 }
 0x519   : > { %p2250_p8 = pnand %p2249_p5, %p2598_p6 }
 0x51a   : > { %p2255_p3 = por %p2254_p1, %p2253_p11 }
 0x51b   : > { %p2251_p10 = pneg %p2250_p8 }
 0x51d   : > { %p2256_p13 = pnand %p2255_p3, %p2251_p10 }
 0x51f   : > { %2259 = shalt.err (!%p2256_p13)
}
 0x520   : > { %s2394_s22 = smov 128   ;;  %s2395_s18 = smov 8  }
 0x521   : > { %1856 = dma.vmem_to_hbm [thread:$0]  (%p2598_p6), %s2869_s15, 2048, %s2866_s23, %s2873_s27, %s2394_s22, %s2394_s22, %s2395_s18  }
 0x522 PF: > { %p1870_p2 = scmp.ge.s32.totalorder %s2382_s14, 2  ;;  %s1491_s5 = sand.u32 1, %s2330_s24  }
 0x523   : > { %p2996_p12 = scmp.ne.s32.totalorder %s2983_s20, 0  ;;  %s1492_s16 = scalar_lea.sflag [#allocation5], %s1491_s5 }
 0x525   : > { %p1866_p0 = pnand %p1870_p2, %p2996_p12 }
 0x527   : > { %p1867_p9 = pneg %p1866_p0 }
 0x529   : > { %2325 = dma.done.wait (%p1867_p9), %s1492_s16, 2048  }
 0x52a   : > { %2327 = vsyncadd (%p1867_p9), %s1492_s16, 4294965248  ;;  %s26_s14 = sadd.s32 1, %s2382_s14   ;;  %s2998_s11 = sld [smem:[#allocation14_spill]] }
 0x52b   : > { %p2901_p4 = scmp.ge.s32.totalorder %s26_s14, 8   ;;  %s2999_s20 = sld [smem:[#allocation15_spill]] }
 0x52c   : > { %s3000_s13 = sld [smem:[#allocation16_spill]]  ;;  %s3001_s24 = smov %s2334_s25 }
 0x52d   : > { %s3002_s25 = smov %s2338_s26  ;;  %s3003_s26 = smov %s2536_s7 }
 0x52e   : > { %s3004_s27 = smov %s2346_s28  ;;  %s3005_s28 = smov %s2350_s29 }
 0x52f   : > { %s3006_s29 = smov %s2582_s10  ;;  %s3007_s30 = smov %s2358_s8 }
 0x530   : > { %s3008_s8 = smov %s2362_s9  ;;  %s3009_s9 = smov %s2539_s6 }
 0x531   : > { %s3010_s10 = smov %s2374_s12  ;;  %s3011_s12 = smov %s2999_s20 }
 0x532   :  { %25 = sbr.rel (!%p2901_p4) target bundleno = 20 (0x14), region = 117 }
 0x537   :  { %1497 = vsyncpa [#allocation4], 1 }
 0x538   :  { %1499 = vsyncpa [#allocation4 + $0x1], 1 }
 0x539   :  { %1500 = vsyncpa [#allocation7], 1 }
 0x53a   :  { %1502 = vsyncpa [#allocation7 + $0x1], 1 }
 0x53b   :  { %1503 = vsyncpa [#allocation5], 1 }
 0x53c   :  { %1505 = vsyncpa [#allocation5 + $0x1], 1 }

// kernel: tpu_custom_call.1
= control target key start
LH: loop header
LB: loop body
LE: loop exit
PB: predicated region body
PF: predicated region fallthrough
CT: control target
= control target key end

     0   :  { %s2948_s0 = inlined_call_operand.hbm [shape: bf16[256,768], index: 0, kind: input, shape index: {}]   ;;  %s2949_s1 = inlined_call_operand.vmem [shape: f32[256,1], index: 1, kind: input, shape index: {}]   ;;  %s2950_s2 = inlined_call_operand.hbm [shape: bf16[768,128], index: 2, kind: input, shape index: {}]   ;;  %s2951_s3 = inlined_call_operand.vmem [shape: bf16[128,128], index: 3, kind: input, shape index: {}]   ;;  %s2952_s4 = inlined_call_operand.vmem [shape: f32[1,128], index: 4, kind: input, shape index: {}]   ;;  %s2953_s5 = inlined_call_operand.vmem [shape: bf16[128,128], index: 5, kind: input, shape index: {}]   ;;  %s2954_s6 = inlined_call_operand.vmem [shape: f32[1,128], index: 6, kind: input, shape index: {}]   ;;  %s2955_s7 = inlined_call_operand.hbm [shape: f32[256,128], index: 7, kind: output, shape index: {}]  }
   0x1   :  { %2963 = sst [smem:[#allocation17_spill]] %s2948_s0 }
   0x2   :  { %2964 = sst [smem:[#allocation18_spill]] %s2949_s1 }
   0x3   :  { %2965 = sst [smem:[#allocation19_spill]] %s2951_s3 }
   0x4   :  { %2966 = sst [smem:[#allocation20_spill]] %s2952_s4 }
   0x5   :  { %2967 = sst [smem:[#allocation21_spill]] %s2953_s5 }
   0x6   :  { %2968 = sst [smem:[#allocation22_spill]] %s2954_s6 }
   0x7   :  { %2969 = sst [smem:[#allocation23_spill]] %s2955_s7 }
   0x8   :  { %12 = vsyncpa [#allocation4], 0 }
   0x9   :  { %14 = vsyncpa [#allocation4 + $0x1], 0 }
   0xa   :  { %15 = vsyncpa [#allocation7], 0 }
   0xb   :  { %17 = vsyncpa [#allocation7 + $0x1], 0 }
   0xc   :  { %18 = vsyncpa [#allocation5], 0 }
   0xd   :  { %20 = vsyncpa [#allocation5 + $0x1], 0  ;;  %s2436_s24 = smov 0   ;;  %s2438_s25 = smov 0  }
   0xe   :  { %s2440_s26 = smov 0   ;;  %s2442_s27 = smov 0  }
   0xf   :  { %s2444_s28 = smov 0   ;;  %s2446_s29 = smov 0  }
  0x10   :  { %s2448_s30 = smov 0   ;;  %s2450_s8 = smov 0  }
  0x11   :  { %s2452_s9 = smov 0   ;;  %s2454_s10 = smov 0  }
  0x12   :  { %s2456_s11 = smov 0   ;;  %s2458_s12 = smov 0  }
  0x13   :  { %s2460_s13 = smov 0   ;;  %s2462_s14 = smov 0  }
  0x14 LB: > { %2970 = sst [smem:[#allocation12_spill]] %s2366_s10  ;;  %s35_s15 = sadd.s32 1, %s2374_s12  ;;  %s2382_s14 = sphi %s2462_s14, %s26_s14   ;;  %s2378_s13 = sphi %s2460_s13, %s3000_s13   ;;  %s2374_s12 = sphi %s2458_s12, %s3011_s12   ;;  %s2370_s11 = sphi %s2456_s11, %s2998_s11   ;;  %s2366_s10 = sphi %s2454_s10, %s3010_s10   ;;  %s2362_s9 = sphi %s2452_s9, %s3009_s9   ;;  %s2358_s8 = sphi %s2450_s8, %s3008_s8   ;;  %s2354_s30 = sphi %s2448_s30, %s3007_s30   ;;  %s2350_s29 = sphi %s2446_s29, %s3006_s29   ;;  %s2346_s28 = sphi %s2444_s28, %s3005_s28   ;;  %s2342_s27 = sphi %s2442_s27, %s3004_s27   ;;  %s2338_s26 = sphi %s2440_s26, %s3003_s26   ;;  %s2334_s25 = sphi %s2438_s25, %s3002_s25   ;;  %s2330_s24 = sphi %s2436_s24, %s3001_s24  }
  0x15   : > { %2971 = sst [smem:[#allocation13_spill]] %s2370_s11  ;;  %s38_s16 = sadd.s32 1, %s2378_s13 }
  0x16   : > { %2972 = sst [smem:[#allocation14_spill]] %s2378_s13  ;;  %p36_p0 = scmp.ge.s32.totalorder %s35_s15, 3 }
  0x17   : > { %s47_s17 = sadd.s32 1, %s2362_s9  ;;  %p54_p1 = scmp.ne.s32.totalorder %s2362_s9, %s2358_s8 }
  0x18   : > { %p55_p2 = scmp.eq.s32.totalorder %s2382_s14, 0  ;;  %s3013_s15 = smov (%p36_p0, %s35_s15), 0 }
  0x19   : > { %2973 = sst [smem:[#allocation15_spill]] %s3013_s15  ;;  %s3015_s16 = smov (!%p36_p0, %s38_s16), %s2378_s13 }
  0x1a   : > { %s2517_s18 = ssub.s32 %s2374_s12, %s3013_s15  ;;  %p2521_p3 = por %p55_p2, %p54_p1 }
  0x1b   : > { %p40_p4 = scmp.ge.s32.totalorder %s3015_s16, 2  ;;  %p60_p5 = scmp.ne.s32.totalorder %s2358_s8, %s2354_s30 }
  0x1c   : > { %s209_s20 = sadd.s32 1, %s2338_s26  ;;  %p2962_p6 = scmp.lt.s32.totalorder %s2382_s14, 6 }
  0x1d   : > { %s3017_s16 = smov (%p40_p4, %s3015_s16), 0  ;;  %s258_s21 = sand.u32 1, %s2362_s9  }
  0x1e   : > { %2975 = sst [smem:[#allocation16_spill]] %s3017_s16  ;;  %s42_s22 = ssub.s32 %s2378_s13, %s3017_s16 }
  0x1f   : > { %s44_s23 = sor.u32 %s2517_s18, %s42_s22  ;;  %p207_p7 = scmp.eq.s32.totalorder %s42_s22, 0 }
  0x20   : > { %p45_p8 = scmp.eq.s32.totalorder %s44_s23, 0  ;;  %s1602_s15 = sshll.u32 %s258_s21, 7 }
  0x21   : > { %s2536_s7 = scalar_select %p207_p7, %s2338_s26, %s209_s20  }
  0x22   : > { %s2539_s6 = scalar_select %p45_p8, %s2362_s9, %s47_s17  }
  0x23   : > { %s1604_s4 = sshll.u32 %s2374_s12, 1  ;;  %s1851_s5 = smul.u32 96, %s2378_s13 }
  0x24   : > { %s262_s3 = scalar_lea.vmem [#allocation3], %s1602_s15  ;;  %p2547_p9 = pnand %p2962_p6, %p2521_p3 }
  0x25   : > { %s272_s10 = sshll.u32 %s262_s3, 4  ;;  %s269_s16 = sadd.s32 %s1851_s5, %s1604_s4  ;;  %s273_s10 = int_to_ptr.vmem [resolvable:$true] %s272_s10 }
  0x26   : > { %s1606_s22 = sshll.u32 %s269_s16, 6  ;;  %s2977_s0 = sld [smem:[#allocation17_spill]] }
  0x27   : > { %p1610_p10 = scmp.ge.s32.totalorder %s2382_s14, 1  ;;  %s259_s17 = scalar_lea.sflag [#allocation4], %s258_s21 }
  0x28   : > { %p2180_p11 = pneg %p2547_p9  ;;  %s2191_s15 = scalar_lea.vmem %s273_s10, 2048 }
  0x29   : > { %p2192_p12 = scmp.ne.s32.totalorder %s273_s10, %s2191_s15  ;;  %s2384_s3 = smov [#allocation3]  }
  0x2a   : > { %s2196_s19 = sshll.u32 %s2384_s3, 4  ;;  %s2197_s19 = int_to_ptr.vmem [resolvable:$false] %s2196_s19 }
  0x2b   : > { %p2194_p13 = pnand %p2192_p12, %p2180_p11  ;;  %s2198_s13 = scalar_lea.vmem %s2197_s19, 4096 }
  0x2c   : > { %s271_s20 = scalar_lea.hbm %s2977_s0, %s1606_s22  ;;  %p2199_p1 = scmp.lt.s32.totalorder %s273_s10, %s2197_s19 }
  0x2d   : > { %p2195_p0 = pneg %p2194_p13  ;;  %p2200_p3 = scmp.lt.s32.totalorder %s2198_s13, %s2191_s15 }
  0x2f   : > { %p2201_p4 = por %p2200_p3, %p2199_p1 }
  0x31   : > { %p2202_p7 = pnand %p2201_p4, %p2195_p0 }
  0x33   : > { %2205 = shalt.err (!%p2202_p7)
}
  0x34   : > { %s2385_s4 = smov 384   ;;  %s2386_s5 = smov 128  }
  0x35   : > { %s2387_s11 = smov 8   ;;  %p310_p8 = scmp.lt.s32.totalorder %s2382_s14, 7 }
  0x36   : > { %1861 = dma.hbm_to_vmem [thread:$0]  (!%p2547_p9), %s271_s20, 2048, %s273_s10, %s259_s17, %s2385_s4, %s2386_s5, %s2387_s11  }
  0x37   : > { %p2562_p11 = pnand %p1610_p10, %p310_p8  ;;  %s1598_s16 = sadd.s32 4294967295, %s2382_s14  }
  0x38   : > { %s1599_s21 = sadd.s32 4294967294, %s2382_s14   ;;  %p61_p12 = scmp.eq.s32.totalorder %s1598_s16, 0 }
  0x39   : > { %p97_p13 = scmp.eq.s32.totalorder %s2517_s18, 0  ;;  %s99_s22 = sadd.s32 1, %s2350_s29 }
  0x3a   : > { %p106_p0 = scmp.ne.s32.totalorder %s2350_s29, %s2346_s28  ;;  %p2575_p1 = por %p61_p12, %p60_p5 }
  0x3b   : > { %p112_p9 = scmp.ne.s32.totalorder %s2346_s28, %s2342_s27  ;;  %p219_p4 = scmp.ne.s32.totalorder %s2338_s26, %s2334_s25 }
  0x3c   : > { %s2582_s10 = scalar_select %p97_p13, %s2350_s29, %s99_s22  }
  0x3d   : > { %p2586_p10 = por %p106_p0, %p55_p2  ;;  %p2590_p3 = por %p112_p9, %p61_p12 }
  0x3e   : > { %p220_p7 = scmp.eq.s32.totalorder %s1598_s16, 5  ;;  %p225_p5 = scmp.ne.s32.totalorder %s2334_s25, %s2330_s24 }
  0x3f   : > { %p226_p8 = scmp.eq.s32.totalorder %s1599_s21, 5  ;;  %s291_s27 = sand.u32 1, %s2350_s29  }
  0x40   : > { %p2598_p6 = por %p220_p7, %p219_p4  ;;  %s1607_s17 = sshll.u32 %s291_s27, 7 }
  0x41   : > { %p2603_p13 = por %p226_p8, %p225_p5  ;;  %s1673_s15 = sshll.u32 %s2374_s12, 11 }
  0x42   : > { %s301_s4 = scalar_lea.hbm %s2950_s2, %s1673_s15  ;;  %s295_s5 = scalar_lea.vmem [#allocation6], %s1607_s17 }
  0x43   : > { %s2983_s20 = scalar_select %p2603_p13, 1, 0 }
  0x44   : > { %s302_s11 = sshll.u32 %s295_s5, 4  ;;  %p2984_p2 = scmp.lt.s32.totalorder %s2382_s14, 6  ;;  %s303_s11 = int_to_ptr.vmem [resolvable:$true] %s302_s11 }
  0x45   : > { %s292_s21 = scalar_lea.sflag [#allocation7], %s291_s27  ;;  %s2219_s22 = scalar_lea.vmem %s303_s11, 2048 }
  0x46   : > { %p2615_p12 = pnand %p2984_p2, %p2586_p10  ;;  %p2220_p9 = scmp.ne.s32.totalorder %s303_s11, %s2219_s22 }
  0x47   : > { %s2388_s0 = smov [#allocation6]  }
  0x48   : > { %p2208_p0 = pneg %p2615_p12  ;;  %s2224_s3 = sshll.u32 %s2388_s0, 4  ;;  %s2225_s3 = int_to_ptr.vmem [resolvable:$false] %s2224_s3 }
  0x49   : > { %s2226_s17 = scalar_lea.vmem %s2225_s3, 4096  ;;  %p2227_p5 = scmp.lt.s32.totalorder %s303_s11, %s2225_s3 }
  0x4a   : > { %p2222_p4 = pnand %p2220_p9, %p2208_p0  ;;  %p2228_p8 = scmp.lt.s32.totalorder %s2226_s17, %s2219_s22 }
  0x4c   : > { %p2223_p7 = pneg %p2222_p4  ;;  %p2229_p13 = por %p2228_p8, %p2227_p5 }
  0x4e   : > { %p2230_p10 = pnand %p2229_p13, %p2223_p7 }
  0x50   : > { %2233 = shalt.err (!%p2230_p10)
}
  0x51   : > { %s2389_s23 = smov 64   ;;  %s2390_s15 = smov 4  }
  0x52   : > { %1864 = dma.hbm_to_vmem [thread:$0]  (!%p2615_p12), %s301_s4, 2048, %s303_s11, %s292_s21, %s2389_s23, %s2389_s23, %s2390_s15  }
  0x53   : > { %314 = sbr.rel (%p2562_p11) target bundleno = 1314 (0x522), region = 48  ;;  %s316_s27 = sand.u32 (!%p2562_p11), 1, %s2358_s8  }
  0x54   : > { %s1611_s19 = sshll.u32 (!%p2562_p11), %s316_s27, 7  ;;  %s317_s0 = scalar_lea.sflag (!%p2562_p11), [#allocation4], %s316_s27 }
  0x55   : > { %s2626_s5 = scalar_lea.vmem (!%p2562_p11), [#allocation3], %s1611_s19 }
  0x58   : > { %2317 = dma.done.wait (%p2575_p1), %s317_s0, 2048  }
  0x59   : > { %2319 = vsyncadd (%p2575_p1), %s317_s0, 4294965248  ;;  %s325_s22 = sand.u32 1, %s2346_s28  }
  0x5a   : > { %s1612_s16 = sshll.u32 %s325_s22, 7  ;;  %s326_s4 = scalar_lea.sflag [#allocation7], %s325_s22 }
  0x5b   : > { %s2633_s11 = scalar_lea.vmem [#allocation6], %s1612_s16 }
  0x5c   : > { %2321 = dma.done.wait (%p2590_p3), %s326_s4, 2048  }
  0x5d   : > { %2323 = vsyncadd (%p2590_p3), %s326_s4, 4294965248  ;;  %s2986_s13 = sld [smem:[#allocation13_spill]]  ;;  %s367_s21 = sand.u32 1, %s2334_s25  }
  0x5e   : > { %s1613_s1 = sshll.u32 %s367_s21, 7  ;;  %s2987_s27 = sld [smem:[#allocation18_spill]] }
  0x5f   : > { %s2648_s0 = scalar_lea.vmem [#allocation8], %s1613_s1  ;;  %s2988_s22 = sld [smem:[#allocation12_spill]] }
  0x63   : > { %s1614_s3 = sshll.u32 %s2986_s13, 4 }
  0x64   : > { %p373_p11 = scmp.lt.s32.totalorder %s1614_s3, 31 }
  0x65   : > { %p1616_p1 = scmp.ne.s32.totalorder %s2988_s22, 0 }
  0x66   : > { %s3019_s3 = smov (!%p373_p11, %s1614_s3), 31 }
  0x67   : > { %s1615_s17 = sshll.u32 %s3019_s3, 3  ;;  %384 = sbr.rel (%p1616_p1) target bundleno = 117 (0x75), region = 60 }
  0x68   : > { %s2646_s19 = scalar_lea.vmem %s2987_s27, %s1615_s17 }
  0x6c   : > { %v2391_v0 = vmov 0.0  }
  0x6d   : > { %385 = vst [vmem:[#allocation2 + $0x30] sm:$0xff] %v2391_v0  ;;  %386 = vst [vmem:[#allocation2] sm:$0xff] %v2391_v0 }
  0x6e   : > { %387 = vst [vmem:[#allocation2 + $0x58] sm:$0xff] %v2391_v0  ;;  %388 = vst [vmem:[#allocation2 + $0x18] sm:$0xff] %v2391_v0 }
  0x6f   : > { %389 = vst [vmem:[#allocation2 + $0x50] sm:$0xff] %v2391_v0  ;;  %390 = vst [vmem:[#allocation2 + $0x68] sm:$0xff] %v2391_v0 }
  0x70   : > { %391 = vst [vmem:[#allocation2 + $0x8] sm:$0xff] %v2391_v0  ;;  %392 = vst [vmem:[#allocation2 + $0x48] sm:$0xff] %v2391_v0 }
  0x71   : > { %393 = vst [vmem:[#allocation2 + $0x40] sm:$0xff] %v2391_v0  ;;  %394 = vst [vmem:[#allocation2 + $0x20] sm:$0xff] %v2391_v0 }
  0x72   : > { %395 = vst [vmem:[#allocation2 + $0x10] sm:$0xff] %v2391_v0  ;;  %396 = vst [vmem:[#allocation2 + $0x38] sm:$0xff] %v2391_v0 }
  0x73   : > { %397 = vst [vmem:[#allocation2 + $0x60] sm:$0xff] %v2391_v0  ;;  %398 = vst [vmem:[#allocation2 + $0x70] sm:$0xff] %v2391_v0 }
  0x74   : > { %399 = vst [vmem:[#allocation2 + $0x78] sm:$0xff] %v2391_v0  ;;  %400 = vst [vmem:[#allocation2 + $0x28] sm:$0xff] %v2391_v0 }
  0x75 PF: > { %v1992_v1 = vld [vmem:[%s2633_s11 + $0x78] sm:$0xff]   ;;  %v1994_v3 = vld [vmem:[%s2633_s11 + $0x70] sm:$0xff]   ;;  %v1996_v5 = vld [vmem:[%s2633_s11 + $0x68] sm:$0xff]   ;;  %s2989_s18 = sld [smem:[#allocation12_spill]] }
  0x76   : > { %v1993_v2 = vld [vmem:[%s2633_s11 + $0x38] sm:$0xff]   ;;  %1675 = vmatprep.subr.bf16.mxu0 %v1992_v1  ;;  %1835 = vmatprep.subr.bf16.mxu1 %v1992_v1  ;;  %v1995_v4 = vld [vmem:[%s2633_s11 + $0x30] sm:$0xff]   ;;  %v1997_v6 = vld [vmem:[%s2633_s11 + $0x28] sm:$0xff]  }
  0x77   : > { %1676 = vmatpush3.bf16.msra.mxu0 %v1993_v2  ;;  %1843 = vmatpush3.bf16.msra.mxu1 %v1993_v2  ;;  %v1998_v7 = vld [vmem:[%s2633_s11 + $0x60] sm:$0xff]   ;;  %v2000_v9 = vld [vmem:[%s2633_s11 + $0x58] sm:$0xff]   ;;  %v2002_v11 = vld [vmem:[%s2633_s11 + $0x50] sm:$0xff]  }
  0x78   : > { %1677 = vmatprep.subr.bf16.mxu0 %v1994_v3  ;;  %1836 = vmatprep.subr.bf16.mxu1 %v1994_v3  ;;  %v1999_v8 = vld [vmem:[%s2633_s11 + $0x20] sm:$0xff]   ;;  %v2001_v10 = vld [vmem:[%s2633_s11 + $0x18] sm:$0xff]   ;;  %v2003_v14 = vld [vmem:[%s2633_s11 + $0x10] sm:$0xff]  }
  0x79   : > { %v2010_v12 = vld [vmem:[%s2626_s5 + $0x4] ss:$8 sps:$4 sm:$0xff]   ;;  %v2008_v19 = vld [vmem:[%s2626_s5] ss:$8 sps:$4 sm:$0xff]   ;;  %v2014_v21 = vld [vmem:[%s2626_s5 + $0x14] ss:$8 sps:$4 sm:$0xff]  }
  0x7a   : > { %v2013_v13 = vld [vmem:[%s2626_s5 + $0x44] ss:$8 sps:$4 sm:$0xff]   ;;  %673 = vmatprep.mubr.bf16.mxu0 %v2010_v12  ;;  %v2011_v20 = vld [vmem:[%s2626_s5 + $0x40] ss:$8 sps:$4 sm:$0xff]   ;;  %v2016_v22 = vld [vmem:[%s2626_s5 + $0x54] ss:$8 sps:$4 sm:$0xff]  }
  0x7b   : > { %1678 = vmatpush3.bf16.msra.mxu0 %v1995_v4  ;;  %1844 = vmatpush3.bf16.msra.mxu1 %v1995_v4  ;;  %v2004_v15 = vld [vmem:[%s2633_s11 + $0x48] sm:$0xff]   ;;  %v2006_v17 = vld [vmem:[%s2633_s11 + $0x40] sm:$0xff]   ;;  %v2018_v23 = vld [vmem:[%s2626_s5 + $0x10] ss:$8 sps:$4 sm:$0xff]   ;;  %p1649_p3 = scmp.ne.s32.totalorder %s2989_s18, 2 }
  0x7c   : > { %1679 = vmatprep.subr.bf16.mxu0 %v1996_v5  ;;  %1837 = vmatprep.subr.bf16.mxu1 %v1996_v5  ;;  %v2005_v16 = vld [vmem:[%s2633_s11 + $0x8] sm:$0xff]   ;;  %v2007_v18 = vld [vmem:[%s2633_s11] sm:$0xff]   ;;  %v2019_v24 = vld [vmem:[%s2626_s5 + $0x50] ss:$8 sps:$4 sm:$0xff]   ;;  %s2990_s4 = sld [smem:[#allocation19_spill]] (!%p1649_p3) }
  0x7d   : > { %705 = vmatprep.mubr.bf16.mxu1 %v2013_v13  ;;  %v2020_v25 = vld [vmem:[%s2626_s5 + $0x24] ss:$8 sps:$4 sm:$0xff]   ;;  %v2024_v27 = vld [vmem:[%s2626_s5 + $0x20] ss:$8 sps:$4 sm:$0xff]   ;;  %v2026_v29 = vld [vmem:[%s2626_s5 + $0x34] ss:$8 sps:$4 sm:$0xff]  }
  0x7e   : > { %v2022_v26 = vld [vmem:[%s2626_s5 + $0x64] ss:$8 sps:$4 sm:$0xff]   ;;  %v2025_v28 = vld [vmem:[%s2626_s5 + $0x60] ss:$8 sps:$4 sm:$0xff]   ;;  %v2028_v30 = vld [vmem:[%s2626_s5 + $0x74] ss:$8 sps:$4 sm:$0xff]  }
  0x7f   : > { %1680 = vmatpush3.bf16.msra.mxu0 %v1997_v6  ;;  %1845 = vmatpush3.bf16.msra.mxu1 %v1997_v6  ;;  %v2030_v31 = vld [vmem:[%s2626_s5 + $0x30] ss:$8 sps:$4 sm:$0xff]   ;;  %v409_v37 = vld [vmem:[#allocation2 + $0x40] sm:$0xff]  ;;  %s2991_s1 = sld [smem:[#allocation21_spill]] (!%p1649_p3) }
  0x80   : > { %1681 = vmatprep.subr.bf16.mxu0 %v1998_v7  ;;  %1838 = vmatprep.subr.bf16.mxu1 %v1998_v7  ;;  %v2031_v32 = vld [vmem:[%s2626_s5 + $0x70] ss:$8 sps:$4 sm:$0xff]   ;;  %v402_v45 = vld [vmem:[#allocation2] sm:$0xff]  ;;  %s2992_s22 = sld [smem:[#allocation20_spill]] (!%p1649_p3) }
  0x81   : > { %v401_v35 = vld [vmem:[#allocation2 + $0x30] sm:$0xff]  ;;  %v410_v47 = vld [vmem:[#allocation2 + $0x20] sm:$0xff]  ;;  %v403_v55 = vld [vmem:[#allocation2 + $0x58] sm:$0xff]  ;;  %s2993_s16 = sld [smem:[#allocation22_spill]] (!%p1649_p3) }
  0x82   : > { %v411_v57 = vld [vmem:[#allocation2 + $0x10] sm:$0xff]  ;;  %v404_v1 = vld [vmem:[#allocation2 + $0x18] sm:$0xff]  ;;  %v413_v13 = vld [vmem:[#allocation2 + $0x60] sm:$0xff] }
  0x83   : > { %1682 = vmatpush3.bf16.msra.mxu0 %v1999_v8  ;;  %1846 = vmatpush3.bf16.msra.mxu1 %v1999_v8  ;;  %v412_v3 = vld [vmem:[#allocation2 + $0x38] sm:$0xff] }
  0x84   : > { %1683 = vmatprep.subr.bf16.mxu0 %v2000_v9  ;;  %1839 = vmatprep.subr.bf16.mxu1 %v2000_v9 }
  0x87   : > { %1684 = vmatpush3.bf16.msra.mxu0 %v2001_v10  ;;  %1847 = vmatpush3.bf16.msra.mxu1 %v2001_v10 }
  0x88   : > { %1685 = vmatprep.subr.bf16.mxu0 %v2002_v11  ;;  %1840 = vmatprep.subr.bf16.mxu1 %v2002_v11  ;;  %v405_v11 = vld [vmem:[#allocation2 + $0x50] sm:$0xff] }
  0x8b   : > { %1686 = vmatpush3.bf16.msra.mxu0 %v2003_v14  ;;  %1848 = vmatpush3.bf16.msra.mxu1 %v2003_v14 }
  0x8c   : > { %1687 = vmatprep.subr.bf16.mxu0 %v2004_v15  ;;  %1841 = vmatprep.subr.bf16.mxu1 %v2004_v15 }
  0x8f   : > { %1688 = vmatpush3.bf16.msra.mxu0 %v2005_v16  ;;  %1849 = vmatpush3.bf16.msra.mxu1 %v2005_v16 }
  0x90   : > { %1689 = vmatprep.subr.bf16.mxu0 %v2006_v17  ;;  %1842 = vmatprep.subr.bf16.mxu1 %v2006_v17 }
  0x93   : > { %1690 = vmatpush3.bf16.msra.mxu0 %v2007_v18  ;;  %1850 = vmatpush3.bf16.msra.mxu1 %v2007_v18 }
  0x96   : > { %674 = vmatmul.mubr.bf16.vlgmr.msra.gmra.mxu0 %v2008_v19  ;;  %706 = vmatmul.mubr.bf16.vlgmr.msra.gmra.mxu1 %v2011_v20 }
  0x97   : > { %681 = vmatprep.mubr.bf16.mxu0 %v2014_v21  ;;  %713 = vmatprep.mubr.bf16.mxu1 %v2016_v22  ;;  %v406_v21 = vld [vmem:[#allocation2 + $0x68] sm:$0xff] }
  0x9e   : > { %682 = vmatmul.mubr.bf16.gmra.mxu0 %v2018_v23  ;;  %714 = vmatmul.mubr.bf16.gmra.mxu1 %v2019_v24  ;;  %v414_v23 = vld [vmem:[#allocation2 + $0x70] sm:$0xff] }
  0x9f   : > { %689 = vmatprep.mubr.bf16.mxu0 %v2020_v25  ;;  %721 = vmatprep.mubr.bf16.mxu1 %v2022_v26 }
  0xa6   : > { %690 = vmatmul.mubr.bf16.gmra.mxu0 %v2024_v27  ;;  %722 = vmatmul.mubr.bf16.gmra.mxu1 %v2025_v28 }
  0xa7   : > { %697 = vmatprep.mubr.bf16.mxu0 %v2026_v29  ;;  %729 = vmatprep.mubr.bf16.mxu1 %v2028_v30 }
  0xae   : > { %698 = vmatmul.mubr.bf16.gmra.mxu0 %v2030_v31  ;;  %730 = vmatmul.mubr.bf16.gmra.mxu1 %v2031_v32  ;;  %v407_v31 = vld [vmem:[#allocation2 + $0x8] sm:$0xff] }
 0x156   : > { %v1691_v33 = vpop.f32.mrf.mxu0  ;;  %v1715_v34 = vpop.f32.mrf.mxu1 }
 0x158   : > { %v1692_v36 = vpop.f32.mrf.mxu0  ;;  %v1716_v38 = vpop.f32.mrf.mxu1 }
 0x159   : > { %v1693_v39 = vadd.f32 %v1692_v36, %v1691_v33  ;;  %v1717_v40 = vadd.f32 %v1716_v38, %v1715_v34  ;;  %v415_v33 = vld [vmem:[#allocation2 + $0x78] sm:$0xff] }
 0x15a   : > { %v1694_v41 = vpop.f32.mrf.mxu0  ;;  %v1718_v42 = vpop.f32.mrf.mxu1 }
 0x15b   : > { %v738_v43 = vadd.f32 %v1693_v39, %v401_v35  ;;  %v746_v44 = vadd.f32 %v1717_v40, %v409_v37 }
 0x15c   : > { %v1695_v46 = vpop.f32.mrf.mxu0  ;;  %v1719_v48 = vpop.f32.mrf.mxu1 }
 0x15d   : > { %754 = vst [vmem:[#allocation2 + $0x30] sm:$0xff] %v738_v43  ;;  %762 = vst [vmem:[#allocation2 + $0x40] sm:$0xff] %v746_v44  ;;  %v1696_v49 = vadd.f32 %v1695_v46, %v1694_v41  ;;  %v1720_v50 = vadd.f32 %v1719_v48, %v1718_v42  ;;  %v408_v41 = vld [vmem:[#allocation2 + $0x48] sm:$0xff] }
 0x15e   : > { %v1697_v51 = vpop.f32.mrf.mxu0  ;;  %v1721_v52 = vpop.f32.mrf.mxu1  ;;  %v416_v43 = vld [vmem:[#allocation2 + $0x28] sm:$0xff] }
 0x15f   : > { %v739_v53 = vadd.f32 %v1696_v49, %v402_v45  ;;  %v747_v54 = vadd.f32 %v1720_v50, %v410_v47 }
 0x160   : > { %v1698_v56 = vpop.f32.mrf.mxu0  ;;  %v1722_v58 = vpop.f32.mrf.mxu1 }
 0x161   : > { %755 = vst [vmem:[#allocation2] sm:$0xff] %v739_v53  ;;  %763 = vst [vmem:[#allocation2 + $0x20] sm:$0xff] %v747_v54  ;;  %v1699_v59 = vadd.f32 %v1698_v56, %v1697_v51  ;;  %v1723_v60 = vadd.f32 %v1722_v58, %v1721_v52 }
 0x162   : > { %v1700_v61 = vpop.f32.mrf.mxu0  ;;  %v1724_v62 = vpop.f32.mrf.mxu1 }
 0x163   : > { %v740_v63 = vadd.f32 %v1699_v59, %v403_v55  ;;  %v748_v0 = vadd.f32 %v1723_v60, %v411_v57 }
 0x164   : > { %v1701_v2 = vpop.f32.mrf.mxu0  ;;  %v1725_v4 = vpop.f32.mrf.mxu1 }
 0x165   : > { %756 = vst [vmem:[#allocation2 + $0x58] sm:$0xff] %v740_v63  ;;  %764 = vst [vmem:[#allocation2 + $0x10] sm:$0xff] %v748_v0  ;;  %v1702_v5 = vadd.f32 %v1701_v2, %v1700_v61  ;;  %v1726_v6 = vadd.f32 %v1725_v4, %v1724_v62 }
 0x166   : > { %v1703_v7 = vpop.f32.mrf.mxu0  ;;  %v1727_v8 = vpop.f32.mrf.mxu1 }
 0x167   : > { %v741_v9 = vadd.f32 %v1702_v5, %v404_v1  ;;  %v749_v10 = vadd.f32 %v1726_v6, %v412_v3 }
 0x168   : > { %v1704_v12 = vpop.f32.mrf.mxu0  ;;  %v1728_v14 = vpop.f32.mrf.mxu1 }
 0x169   : > { %757 = vst [vmem:[#allocation2 + $0x18] sm:$0xff] %v741_v9  ;;  %765 = vst [vmem:[#allocation2 + $0x38] sm:$0xff] %v749_v10  ;;  %v1705_v15 = vadd.f32 %v1704_v12, %v1703_v7  ;;  %v1729_v16 = vadd.f32 %v1728_v14, %v1727_v8 }
 0x16a   : > { %v1706_v17 = vpop.f32.mrf.mxu0  ;;  %v1730_v18 = vpop.f32.mrf.mxu1 }
 0x16b   : > { %v742_v19 = vadd.f32 %v1705_v15, %v405_v11  ;;  %v750_v20 = vadd.f32 %v1729_v16, %v413_v13 }
 0x16c   : > { %v1707_v22 = vpop.f32.mrf.mxu0  ;;  %v1731_v24 = vpop.f32.mrf.mxu1 }
 0x16d   : > { %758 = vst [vmem:[#allocation2 + $0x50] sm:$0xff] %v742_v19  ;;  %766 = vst [vmem:[#allocation2 + $0x60] sm:$0xff] %v750_v20  ;;  %v1708_v25 = vadd.f32 %v1707_v22, %v1706_v17  ;;  %v1732_v26 = vadd.f32 %v1731_v24, %v1730_v18 }
 0x16e   : > { %v1709_v27 = vpop.f32.mrf.mxu0  ;;  %v1733_v28 = vpop.f32.mrf.mxu1 }
 0x16f   : > { %v743_v29 = vadd.f32 %v1708_v25, %v406_v21  ;;  %v751_v30 = vadd.f32 %v1732_v26, %v414_v23 }
 0x170   : > { %v1710_v32 = vpop.f32.mrf.mxu0  ;;  %v1734_v34 = vpop.f32.mrf.mxu1 }
 0x171   : > { %759 = vst [vmem:[#allocation2 + $0x68] sm:$0xff] %v743_v29  ;;  %767 = vst [vmem:[#allocation2 + $0x70] sm:$0xff] %v751_v30  ;;  %v1711_v35 = vadd.f32 %v1710_v32, %v1709_v27  ;;  %v1735_v36 = vadd.f32 %v1734_v34, %v1733_v28 }
 0x172   : > { %v1712_v37 = vpop.f32.mrf.mxu0  ;;  %v1736_v38 = vpop.f32.mrf.mxu1 }
 0x173   : > { %v744_v39 = vadd.f32 %v1711_v35, %v407_v31  ;;  %v752_v40 = vadd.f32 %v1735_v36, %v415_v33 }
 0x174   : > { %v1713_v42 = vpop.f32.mrf.mxu0  ;;  %v1737_v44 = vpop.f32.mrf.mxu1 }
 0x175   : > { %760 = vst [vmem:[#allocation2 + $0x8] sm:$0xff] %v744_v39  ;;  %768 = vst [vmem:[#allocation2 + $0x78] sm:$0xff] %v752_v40  ;;  %v1714_v45 = vadd.f32 %v1713_v42, %v1712_v37  ;;  %v1738_v46 = vadd.f32 %v1737_v44, %v1736_v38  ;;  %773 = sbr.rel (%p1649_p3) target bundleno = 1289 (0x509), region = 64 }
 0x177   : > { %v745_v47 = vadd.f32 %v1714_v45, %v408_v41  ;;  %v753_v48 = vadd.f32 %v1738_v46, %v416_v43 }
 0x179   : > { %761 = vst [vmem:[#allocation2 + $0x48] sm:$0xff] %v745_v47  ;;  %769 = vst [vmem:[#allocation2 + $0x28] sm:$0xff] %v753_v48 }
 0x17a   : > { %v776_v49 = vld [vmem:[%s2646_s19 + $0x10] sm:$0xff]  ;;  %v774_v50 = vld [vmem:[%s2646_s19] sm:$0xff]  ;;  %v777_v51 = vld [vmem:[%s2646_s19 + $0x18] sm:$0xff]  ;;  %v2392_v52 = vmov 0  }
 0x17b   : > { %2033 = vset.pattern.permute.xlu1 %v2392_v52  ;;  %2032 = vset.pattern.permute.xlu0 %v2392_v52  ;;  %v792_v53 = vmax.f32 %v776_v49, 1.0  ;;  %v790_v54 = vmax.f32 %v774_v50, 1.0  ;;  %v793_v55 = vmax.f32 %v777_v51, 1.0  ;;  %v775_v56 = vld [vmem:[%s2646_s19 + $0x8] sm:$0xff]  ;;  %v778_v59 = vld [vmem:[%s2646_s19 + $0x20] sm:$0xff]  ;;  %v781_v61 = vld [vmem:[%s2646_s19 + $0x38] sm:$0xff] }
 0x17c   : > { %v791_v57 = vmax.f32 %v775_v56, 1.0  ;;  %v779_v58 = vld [vmem:[%s2646_s19 + $0x28] sm:$0xff]  ;;  %v780_v62 = vld [vmem:[%s2646_s19 + $0x30] sm:$0xff]  ;;  %v794_v63 = vmax.f32 %v778_v59, 1.0  ;;  %v2034_v0 = vld [vmem:[%s2990_s4 + $0x38] sm:$0xff]   ;;  %v797_v2 = vmax.f32 %v781_v61, 1.0 }
 0x17d   : > { %2050 = vrcp.f32 %v792_v53  ;;  %v795_v60 = vmax.f32 %v779_v58, 1.0  ;;  %v2035_v1 = vld [vmem:[%s2990_s4 + $0x30] sm:$0xff]   ;;  %1771 = vmatprep.subr.bf16.mxu0 %v2034_v0  ;;  %v783_v3 = vld [vmem:[%s2646_s19 + $0x48] sm:$0xff]  ;;  %v796_v4 = vmax.f32 %v780_v62, 1.0  ;;  %v782_v6 = vld [vmem:[%s2646_s19 + $0x40] sm:$0xff] }
 0x17e   : > { %2052 = vrcp.f32 %v790_v54  ;;  %1772 = vmatpush3.bf16.msra.mxu0 %v2034_v0  ;;  %v2036_v5 = vld [vmem:[%s2990_s4 + $0x28] sm:$0xff]   ;;  %v799_v7 = vmax.f32 %v783_v3, 1.0  ;;  %v785_v8 = vld [vmem:[%s2646_s19 + $0x58] sm:$0xff]  ;;  %v784_v9 = vld [vmem:[%s2646_s19 + $0x50] sm:$0xff]  ;;  %v798_v10 = vmax.f32 %v782_v6, 1.0 }
 0x17f   : > { %2054 = vrcp.f32 %v793_v55  ;;  %1773 = vmatprep.subr.bf16.mxu0 %v2035_v1  ;;  %v2037_v11 = vld [vmem:[%s2990_s4 + $0x20] sm:$0xff]   ;;  %v801_v14 = vmax.f32 %v785_v8, 1.0  ;;  %v800_v15 = vmax.f32 %v784_v9, 1.0  ;;  %v787_v16 = vld [vmem:[%s2646_s19 + $0x68] sm:$0xff]  ;;  %v2038_v17 = vld [vmem:[%s2990_s4 + $0x18] sm:$0xff]  }
 0x180   : > { %2056 = vrcp.f32 %v791_v57  ;;  %v786_v20 = vld [vmem:[%s2646_s19 + $0x60] sm:$0xff]  ;;  %v803_v21 = vmax.f32 %v787_v16, 1.0  ;;  %v789_v24 = vld [vmem:[%s2646_s19 + $0x78] sm:$0xff]  ;;  %v2039_v25 = vld [vmem:[%s2990_s4 + $0x10] sm:$0xff]  }
 0x181   : > { %2058 = vrcp.f32 %v795_v60  ;;  %v802_v23 = vmax.f32 %v786_v20, 1.0  ;;  %v788_v27 = vld [vmem:[%s2646_s19 + $0x70] sm:$0xff]  ;;  %v805_v28 = vmax.f32 %v789_v24, 1.0  ;;  %v2040_v31 = vld [vmem:[%s2990_s4 + $0x8] sm:$0xff]   ;;  %v2041_v34 = vld [vmem:[%s2990_s4] sm:$0xff]  }
 0x182   : > { %2060 = vrcp.f32 %v794_v63  ;;  %1774 = vmatpush3.bf16.msra.mxu0 %v2035_v1  ;;  %v804_v30 = vmax.f32 %v788_v27, 1.0  ;;  %v2042_v42 = vld [vmem:[%s2991_s1 + $0x38] sm:$0xff]   ;;  %v2043_v43 = vld [vmem:[%s2991_s1 + $0x30] sm:$0xff]   ;;  %v823_v49 = vld [vmem:[#allocation2] sm:$0xff] }
 0x183   : > { %2062 = vrcp.f32 %v797_v2  ;;  %1775 = vmatprep.subr.bf16.mxu0 %v2036_v5  ;;  %1803 = vmatprep.subr.bf16.mxu1 %v2042_v42  ;;  %v824_v46 = vld [vmem:[#allocation2 + $0x58] sm:$0xff]  ;;  %v822_v48 = vld [vmem:[#allocation2 + $0x30] sm:$0xff]  ;;  %v827_v56 = vld [vmem:[#allocation2 + $0x68] sm:$0xff] }
 0x184   : > { %2064 = vrcp.f32 %v796_v4  ;;  %1804 = vmatpush3.bf16.msra.mxu1 %v2042_v42  ;;  %v825_v47 = vld [vmem:[#allocation2 + $0x18] sm:$0xff]  ;;  %v826_v58 = vld [vmem:[#allocation2 + $0x50] sm:$0xff]  ;;  %v829_v0 = vld [vmem:[#allocation2 + $0x48] sm:$0xff] }
 0x185   : > { %2066 = vrcp.f32 %v799_v7  ;;  %1805 = vmatprep.subr.bf16.mxu1 %v2043_v43  ;;  %v828_v1 = vld [vmem:[#allocation2 + $0x8] sm:$0xff]  ;;  %v831_v7 = vld [vmem:[#allocation2 + $0x20] sm:$0xff] }
 0x186   : > { %1776 = vmatpush3.bf16.msra.mxu0 %v2036_v5  ;;  %2068 = vrcp.f32 %v798_v10  ;;  %v830_v8 = vld [vmem:[#allocation2 + $0x40] sm:$0xff] }
 0x187   : > { %1777 = vmatprep.subr.bf16.mxu0 %v2037_v11  ;;  %2070 = vrcp.f32 %v801_v14  ;;  %v833_v14 = vld [vmem:[#allocation2 + $0x38] sm:$0xff] }
 0x188   : > { %2072 = vrcp.f32 %v800_v15  ;;  %1806 = vmatpush3.bf16.msra.mxu1 %v2043_v43  ;;  %v832_v15 = vld [vmem:[#allocation2 + $0x10] sm:$0xff]  ;;  %v1650_v43 = vld [vmem:[%s2992_s22] ss:$0 sm:$0xff] }
 0x189   : > { %2074 = vrcp.f32 %v803_v21  ;;  %v835_v21 = vld [vmem:[#allocation2 + $0x70] sm:$0xff] }
 0x18a   : > { %v2051_v12 = vpop.eup %2050  ;;  %1778 = vmatpush3.bf16.msra.mxu0 %v2037_v11  ;;  %2076 = vrcp.f32 %v802_v23 }
 0x18b   : > { %v2053_v13 = vpop.eup %2052  ;;  %850 = vperm.xlu1 %2033, %v2051_v12   ;;  %1779 = vmatprep.subr.bf16.mxu0 %v2038_v17  ;;  %2078 = vrcp.f32 %v805_v28  ;;  %v837_v28 = vld [vmem:[#allocation2 + $0x28] sm:$0xff] }
 0x18c   : > { %v2055_v18 = vpop.eup %2054  ;;  %840 = vperm.xlu0 %2032, %v2053_v13   ;;  %2080 = vrcp.f32 %v804_v30 }
 0x18d   : > { %v2057_v19 = vpop.eup %2056 }
 0x18e   : > { %v2059_v22 = vpop.eup %2058  ;;  %1780 = vmatpush3.bf16.msra.mxu0 %v2038_v17 }
 0x18f   : > { %855 = vperm.xlu1 %2033, %v2055_v18   ;;  %v2061_v26 = vpop.eup %2060  ;;  %1781 = vmatprep.subr.bf16.mxu0 %v2039_v25 }
 0x190   : > { %845 = vperm.xlu0 %2032, %v2057_v19   ;;  %v2063_v29 = vpop.eup %2062 }
 0x191   : > { %v2065_v32 = vpop.eup %2064 }
 0x192   : > { %1782 = vmatpush3.bf16.msra.mxu0 %v2039_v25  ;;  %v2067_v33 = vpop.eup %2066 }
 0x193   : > { %865 = vperm.xlu1 %2033, %v2059_v22   ;;  %1783 = vmatprep.subr.bf16.mxu0 %v2040_v31  ;;  %v2069_v35 = vpop.eup %2068  ;;  %v834_v22 = vld [vmem:[#allocation2 + $0x60] sm:$0xff] }
 0x194   : > { %860 = vperm.xlu0 %2032, %v2061_v26   ;;  %v2071_v36 = vpop.eup %2070 }
 0x195   : > { %v2073_v37 = vpop.eup %2072 }
 0x196   : > { %1784 = vmatpush3.bf16.msra.mxu0 %v2040_v31  ;;  %v2075_v38 = vpop.eup %2074 }
 0x197   : > { %875 = vperm.xlu1 %2033, %v2063_v29   ;;  %1785 = vmatprep.subr.bf16.mxu0 %v2041_v34  ;;  %v2077_v39 = vpop.eup %2076  ;;  %v836_v29 = vld [vmem:[#allocation2 + $0x78] sm:$0xff] }
 0x198   : > { %870 = vperm.xlu0 %2032, %v2065_v32   ;;  %v2079_v40 = vpop.eup %2078 }
 0x199   : > { %v2081_v41 = vpop.eup %2080 }
 0x19a   : > { %1786 = vmatpush3.bf16.msra.mxu0 %v2041_v34 }
 0x19b   : > { %885 = vperm.xlu1 %2033, %v2067_v33  }
 0x19c   : > { %880 = vperm.xlu0 %2032, %v2069_v35  }
 0x19f   : > { %895 = vperm.xlu1 %2033, %v2071_v36   ;;  %v2044_v36 = vld [vmem:[%s2991_s1 + $0x28] sm:$0xff]  }
 0x1a0   : > { %890 = vperm.xlu0 %2032, %v2073_v37   ;;  %1807 = vmatprep.subr.bf16.mxu1 %v2044_v36  ;;  %v2045_v37 = vld [vmem:[%s2991_s1 + $0x20] sm:$0xff]  }
 0x1a1   : > { %1808 = vmatpush3.bf16.msra.mxu1 %v2044_v36 }
 0x1a2   : > { %1809 = vmatprep.subr.bf16.mxu1 %v2045_v37 }
 0x1a3   : > { %905 = vperm.xlu1 %2033, %v2075_v38   ;;  %v2046_v38 = vld [vmem:[%s2991_s1 + $0x18] sm:$0xff]  }
 0x1a4   : > { %900 = vperm.xlu0 %2032, %v2077_v39   ;;  %v2047_v39 = vld [vmem:[%s2991_s1 + $0x10] sm:$0xff]  }
 0x1a5   : > { %1810 = vmatpush3.bf16.msra.mxu1 %v2045_v37 }
 0x1a6   : > { %1811 = vmatprep.subr.bf16.mxu1 %v2046_v38 }
 0x1a7   : > { %915 = vperm.xlu1 %2033, %v2079_v40   ;;  %v2048_v40 = vld [vmem:[%s2991_s1 + $0x8] sm:$0xff]  }
 0x1a8   : > { %910 = vperm.xlu0 %2032, %v2081_v41   ;;  %v2049_v41 = vld [vmem:[%s2991_s1] sm:$0xff]  }
 0x1a9   : > { %1812 = vmatpush3.bf16.msra.mxu1 %v2046_v38 }
 0x1aa   : > { %1813 = vmatprep.subr.bf16.mxu1 %v2047_v39 }
 0x1ad   : > { %1814 = vmatpush3.bf16.msra.mxu1 %v2047_v39 }
 0x1ae   : > { %1815 = vmatprep.subr.bf16.mxu1 %v2048_v40 }
 0x1b1   : > { %1816 = vmatpush3.bf16.msra.mxu1 %v2048_v40 }
 0x1b2   : > { %1817 = vmatprep.subr.bf16.mxu1 %v2049_v41 }
 0x1b5   : > { %1818 = vmatpush3.bf16.msra.mxu1 %v2049_v41 }
 0x206   : > { %v851_v44 = vpop.permute.xlu1 %850 }
 0x207   : > { %v841_v45 = vpop.permute.xlu0 %840  ;;  %v920_v51 = vmul.f32 %v851_v44, %v824_v46 }
 0x208   : > { %v918_v54 = vmul.f32 %v841_v45, %v822_v48 }
 0x20a   : > { %v856_v50 = vpop.permute.xlu1 %855 }
 0x20b   : > { %v921_v52 = vmul.f32 %v856_v50, %v825_v47  ;;  %v846_v53 = vpop.permute.xlu0 %845 }
 0x20c   : > { %v919_v55 = vmul.f32 %v846_v53, %v823_v49 }
 0x20d   : > { %v935_v57 = vpack.c.bf16 %v921_v52, %v920_v51 }
 0x20e   : > { %v866_v59 = vpop.permute.xlu1 %865  ;;  %v934_v60 = vpack.c.bf16 %v919_v55, %v918_v54 }
 0x20f   : > { %v923_v61 = vmul.f32 %v866_v59, %v827_v56  ;;  %v861_v62 = vpop.permute.xlu0 %860 }
 0x210   : > { %v922_v63 = vmul.f32 %v861_v62, %v826_v58  ;;  %1787 = vmatprep.mubr.bf16.mxu0 %v934_v60 }
 0x211   : > { %1788 = vmatmul.mubr.bf16.vlgmr.msra.gmra.mxu0 %v935_v57 }
 0x212   : > { %v936_v2 = vpack.c.bf16 %v923_v61, %v922_v63  ;;  %v876_v3 = vpop.permute.xlu1 %875 }
 0x213   : > { %v925_v4 = vmul.f32 %v876_v3, %v829_v0  ;;  %v871_v5 = vpop.permute.xlu0 %870 }
 0x214   : > { %v924_v6 = vmul.f32 %v871_v5, %v828_v1  ;;  %1791 = vmatprep.mubr.bf16.mxu0 %v936_v2 }
 0x216   : > { %v937_v9 = vpack.c.bf16 %v925_v4, %v924_v6  ;;  %v886_v10 = vpop.permute.xlu1 %885 }
 0x217   : > { %v927_v11 = vmul.f32 %v886_v10, %v831_v7  ;;  %v881_v12 = vpop.permute.xlu0 %880 }
 0x218   : > { %v926_v13 = vmul.f32 %v881_v12, %v830_v8 }
 0x219   : > { %1792 = vmatmul.mubr.bf16.gmra.mxu0 %v937_v9 }
 0x21a   : > { %v938_v16 = vpack.c.bf16 %v927_v11, %v926_v13  ;;  %v896_v17 = vpop.permute.xlu1 %895 }
 0x21b   : > { %v929_v18 = vmul.f32 %v896_v17, %v833_v14  ;;  %v891_v19 = vpop.permute.xlu0 %890 }
 0x21c   : > { %v928_v20 = vmul.f32 %v891_v19, %v832_v15  ;;  %1795 = vmatprep.mubr.bf16.mxu0 %v938_v16 }
 0x21e   : > { %v939_v23 = vpack.c.bf16 %v929_v18, %v928_v20  ;;  %v906_v24 = vpop.permute.xlu1 %905 }
 0x21f   : > { %v931_v25 = vmul.f32 %v906_v24, %v835_v21  ;;  %v901_v26 = vpop.permute.xlu0 %900 }
 0x220   : > { %v930_v27 = vmul.f32 %v901_v26, %v834_v22 }
 0x221   : > { %1796 = vmatmul.mubr.bf16.gmra.mxu0 %v939_v23 }
 0x222   : > { %v940_v30 = vpack.c.bf16 %v931_v25, %v930_v27  ;;  %v916_v31 = vpop.permute.xlu1 %915 }
 0x223   : > { %v933_v32 = vmul.f32 %v916_v31, %v837_v28  ;;  %v911_v33 = vpop.permute.xlu0 %910 }
 0x224   : > { %v932_v34 = vmul.f32 %v911_v33, %v836_v29  ;;  %1799 = vmatprep.mubr.bf16.mxu0 %v940_v30 }
 0x226   : > { %v941_v35 = vpack.c.bf16 %v933_v32, %v932_v34 }
 0x229   : > { %1800 = vmatmul.mubr.bf16.gmra.mxu0 %v941_v35  ;;  %v1659_v35 = vld [vmem:[%s2993_s16] ss:$0 sm:$0xff] }
 0x2d1   : > { %v1789_v42 = vpop.f32.mrf.mxu0 }
 0x2d2   : > { %v1056_v48 = vadd.f32 %v1789_v42, %v1650_v43 }
 0x2d3   : > { %v1047_v44 = vpop.f32.mrf.mxu0 }
 0x2d4   : > { %v1048_v45 = vadd.f32 %v1650_v43, %v1047_v44 }
 0x2d5   : > { %v1790_v46 = vpop.f32.mrf.mxu0 }
 0x2d6   : > { %v1059_v47 = vadd.f32 %v1790_v46, %v1650_v43  ;;  %2082 = vtanh.f32 %v1048_v45 }
 0x2d7   : > { %v1050_v49 = vpop.f32.mrf.mxu0 }
 0x2d8   : > { %v1051_v50 = vadd.f32 %v1650_v43, %v1050_v49  ;;  %2084 = vtanh.f32 %v1059_v47 }
 0x2d9   : > { %v1793_v51 = vpop.f32.mrf.mxu0 }
 0x2da   : > { %2086 = vtanh.f32 %v1051_v50  ;;  %v1072_v56 = vadd.f32 %v1793_v51, %v1650_v43 }
 0x2db   : > { %2088 = vtanh.f32 %v1056_v48  ;;  %v1063_v52 = vpop.f32.mrf.mxu0 }
 0x2dc   : > { %v1064_v53 = vadd.f32 %v1650_v43, %v1063_v52 }
 0x2dd   : > { %v1794_v54 = vpop.f32.mrf.mxu0 }
 0x2de   : > { %v1075_v55 = vadd.f32 %v1794_v54, %v1650_v43  ;;  %2090 = vtanh.f32 %v1064_v53 }
 0x2df   : > { %v1066_v57 = vpop.f32.mrf.mxu0 }
 0x2e0   : > { %v1067_v58 = vadd.f32 %v1650_v43, %v1066_v57  ;;  %2092 = vtanh.f32 %v1075_v55 }
 0x2e1   : > { %v1797_v59 = vpop.f32.mrf.mxu0 }
 0x2e2   : > { %2094 = vtanh.f32 %v1067_v58  ;;  %v1088_v3 = vadd.f32 %v1797_v59, %v1650_v43 }
 0x2e3   : > { %2096 = vtanh.f32 %v1072_v56  ;;  %v1079_v60 = vpop.f32.mrf.mxu0  ;;  %v2083_v62 = vpop.eup %2082 }
 0x2e4   : > { %v1080_v61 = vadd.f32 %v1650_v43, %v1079_v60 }
 0x2e5   : > { %v1798_v63 = vpop.f32.mrf.mxu0  ;;  %v2085_v0 = vpop.eup %2084 }
 0x2e6   : > { %v1091_v1 = vadd.f32 %v1798_v63, %v1650_v43  ;;  %2098 = vtanh.f32 %v1080_v61 }
 0x2e7   : > { %v2087_v2 = vpop.eup %2086  ;;  %v1082_v4 = vpop.f32.mrf.mxu0 }
 0x2e8   : > { %v2089_v5 = vpop.eup %2088  ;;  %v1083_v6 = vadd.f32 %v1650_v43, %v1082_v4  ;;  %v1126_v7 = vpack.c.bf16 %v2087_v2, %v2083_v62  ;;  %2100 = vtanh.f32 %v1091_v1 }
 0x2e9   : > { %v1801_v8 = vpop.f32.mrf.mxu0  ;;  %v1127_v9 = vpack.c.bf16 %v2085_v0, %v2089_v5 }
 0x2ea   : > { %2102 = vtanh.f32 %v1083_v6  ;;  %1819 = vmatprep.mubr.bf16.mxu1 %v1126_v7  ;;  %v1104_v17 = vadd.f32 %v1801_v8, %v1650_v43 }
 0x2eb   : > { %2104 = vtanh.f32 %v1088_v3  ;;  %v1095_v10 = vpop.f32.mrf.mxu0  ;;  %1820 = vmatmul.mubr.bf16.vlgmr.msra.gmra.mxu1 %v1127_v9  ;;  %v2091_v12 = vpop.eup %2090 }
 0x2ec   : > { %v1096_v11 = vadd.f32 %v1650_v43, %v1095_v10 }
 0x2ed   : > { %v1802_v13 = vpop.f32.mrf.mxu0  ;;  %v2093_v14 = vpop.eup %2092 }
 0x2ee   : > { %v1107_v15 = vadd.f32 %v1802_v13, %v1650_v43  ;;  %2106 = vtanh.f32 %v1096_v11 }
 0x2ef   : > { %v2095_v16 = vpop.eup %2094  ;;  %v1098_v18 = vpop.f32.mrf.mxu0 }
 0x2f0   : > { %v2097_v19 = vpop.eup %2096  ;;  %v1099_v20 = vadd.f32 %v1650_v43, %v1098_v18  ;;  %v1128_v21 = vpack.c.bf16 %v2095_v16, %v2091_v12  ;;  %2108 = vtanh.f32 %v1107_v15 }
 0x2f1   : > { %v1129_v22 = vpack.c.bf16 %v2093_v14, %v2097_v19 }
 0x2f2   : > { %2110 = vtanh.f32 %v1099_v20  ;;  %1823 = vmatprep.mubr.bf16.mxu1 %v1128_v21 }
 0x2f3   : > { %2112 = vtanh.f32 %v1104_v17  ;;  %1824 = vmatmul.mubr.bf16.gmra.mxu1 %v1129_v22  ;;  %v2099_v23 = vpop.eup %2098 }
 0x2f5   : > { %v2101_v24 = vpop.eup %2100 }
 0x2f7   : > { %v2103_v25 = vpop.eup %2102 }
 0x2f8   : > { %v2105_v26 = vpop.eup %2104  ;;  %v1130_v27 = vpack.c.bf16 %v2103_v25, %v2099_v23 }
 0x2f9   : > { %v1131_v28 = vpack.c.bf16 %v2101_v24, %v2105_v26 }
 0x2fa   : > { %1827 = vmatprep.mubr.bf16.mxu1 %v1130_v27 }
 0x2fb   : > { %1828 = vmatmul.mubr.bf16.gmra.mxu1 %v1131_v28  ;;  %v2107_v29 = vpop.eup %2106 }
 0x2fd   : > { %v2109_v30 = vpop.eup %2108 }
 0x2ff   : > { %v2111_v31 = vpop.eup %2110 }
 0x300   : > { %v2113_v32 = vpop.eup %2112  ;;  %v1132_v33 = vpack.c.bf16 %v2111_v31, %v2107_v29 }
 0x301   : > { %v1133_v34 = vpack.c.bf16 %v2109_v30, %v2113_v32 }
 0x302   : > { %1831 = vmatprep.mubr.bf16.mxu1 %v1132_v33 }
 0x303   : > { %1832 = vmatmul.mubr.bf16.gmra.mxu1 %v1133_v34 }
 0x3ab   : > { %v1821_v36 = vpop.f32.mrf.mxu1 }
 0x3ac   : > { %v1248_v37 = vadd.f32 %v1821_v36, %v1659_v35 }
 0x3ad   : > { %v1239_v38 = vpop.f32.mrf.mxu1 }
 0x3ae   : > { %1306 = vmax.xlane.f32.xlu0 %v1248_v37  ;;  %v1240_v40 = vadd.f32 %v1659_v35, %v1239_v38 }
 0x3af   : > { %v1822_v39 = vpop.f32.mrf.mxu1 }
 0x3b0   : > { %v1251_v44 = vadd.f32 %v1822_v39, %v1659_v35 }
 0x3b1   : > { %v1242_v41 = vpop.f32.mrf.mxu1 }
 0x3b2   : > { %v1243_v42 = vadd.f32 %v1659_v35, %v1242_v41  ;;  %1302 = vmax.xlane.f32.xlu0 %v1240_v40 }
 0x3b3   : > { %v1825_v43 = vpop.f32.mrf.mxu1 }
 0x3b4   : > { %1304 = vmax.xlane.f32.xlu1 %v1243_v42  ;;  %v1264_v46 = vadd.f32 %v1825_v43, %v1659_v35 }
 0x3b5   : > { %v1255_v45 = vpop.f32.mrf.mxu1 }
 0x3b6   : > { %1308 = vmax.xlane.f32.xlu0 %v1251_v44  ;;  %v1256_v50 = vadd.f32 %v1659_v35, %v1255_v45 }
 0x3b7   : > { %v1826_v47 = vpop.f32.mrf.mxu1 }
 0x3b8   : > { %v1267_v48 = vadd.f32 %v1826_v47, %v1659_v35  ;;  %1314 = vmax.xlane.f32.xlu1 %v1264_v46 }
 0x3b9   : > { %v1258_v49 = vpop.f32.mrf.mxu1 }
 0x3ba   : > { %1316 = vmax.xlane.f32.xlu0 %v1267_v48  ;;  %v1259_v52 = vadd.f32 %v1659_v35, %v1258_v49 }
 0x3bb   : > { %v1829_v51 = vpop.f32.mrf.mxu1 }
 0x3bc   : > { %1310 = vmax.xlane.f32.xlu1 %v1256_v50  ;;  %v1280_v54 = vadd.f32 %v1829_v51, %v1659_v35 }
 0x3bd   : > { %v1271_v53 = vpop.f32.mrf.mxu1 }
 0x3be   : > { %1312 = vmax.xlane.f32.xlu0 %v1259_v52  ;;  %v2756_v58 = vadd.f32 %v1659_v35, %v1271_v53 }
 0x3bf   : > { %v1830_v55 = vpop.f32.mrf.mxu1 }
 0x3c0   : > { %v2754_v56 = vadd.f32 %v1830_v55, %v1659_v35  ;;  %1322 = vmax.xlane.f32.xlu1 %v1280_v54 }
 0x3c1   : > { %v1274_v57 = vpop.f32.mrf.mxu1 }
 0x3c2   : > { %1324 = vmax.xlane.f32.xlu0 %v2754_v56  ;;  %v2759_v60 = vadd.f32 %v1659_v35, %v1274_v57 }
 0x3c3   : > { %v1833_v59 = vpop.f32.mrf.mxu1 }
 0x3c4   : > { %1318 = vmax.xlane.f32.xlu1 %v2756_v58  ;;  %v2766_v1 = vadd.f32 %v1833_v59, %v1659_v35 }
 0x3c5   : > { %v1287_v61 = vpop.f32.mrf.mxu1 }
 0x3c6   : > { %v2762_v62 = vadd.f32 %v1659_v35, %v1287_v61  ;;  %1320 = vmax.xlane.f32.xlu0 %v2759_v60 }
 0x3c7   : > { %v1834_v63 = vpop.f32.mrf.mxu1 }
 0x3c8   : > { %1326 = vmax.xlane.f32.xlu1 %v2762_v62  ;;  %v2772_v3 = vadd.f32 %v1834_v63, %v1659_v35 }
 0x3c9   : > { %v1290_v0 = vpop.f32.mrf.mxu1 }
 0x3ca   : > { %v2768_v2 = vadd.f32 %v1659_v35, %v1290_v0 }
 0x3cc   : > { %1328 = vmax.xlane.f32.xlu0 %v2768_v2  ;;  %1330 = vmax.xlane.f32.xlu1 %v2766_v1 }
 0x3d0   : > { %1332 = vmax.xlane.f32.xlu0 %v2772_v3 }
 0x437   : > { %v1307_v4 = vpop.xlane.xlu0 %1306 }
 0x438   : > { %v1336_v5 = vsub.f32 %v1248_v37, %v1307_v4 }
 0x43a   : > { %v1354_v6 = vmul.f32 1.442695, %v1336_v5 }
 0x43b   : > { %v1303_v7 = vpop.xlane.xlu0 %1302 }
 0x43c   : > { %2114 = vpow2.f32 %v1354_v6  ;;  %v1334_v8 = vsub.f32 %v1240_v40, %v1303_v7 }
 0x43d   : > { %v1305_v9 = vpop.xlane.xlu1 %1304 }
 0x43e   : > { %v1350_v10 = vmul.f32 1.442695, %v1334_v8  ;;  %v1335_v12 = vsub.f32 %v1243_v42, %v1305_v9 }
 0x43f   : > { %v1309_v11 = vpop.xlane.xlu0 %1308 }
 0x440   : > { %2116 = vpow2.f32 %v1350_v10  ;;  %v1337_v13 = vsub.f32 %v1251_v44, %v1309_v11  ;;  %v1352_v18 = vmul.f32 1.442695, %v1335_v12 }
 0x441   : > { %v1315_v14 = vpop.xlane.xlu1 %1314 }
 0x442   : > { %v1356_v15 = vmul.f32 1.442695, %v1337_v13  ;;  %v1340_v16 = vsub.f32 %v1264_v46, %v1315_v14 }
 0x443   : > { %v1317_v17 = vpop.xlane.xlu0 %1316 }
 0x444   : > { %2118 = vpow2.f32 %v1356_v15  ;;  %v1362_v19 = vmul.f32 1.442695, %v1340_v16  ;;  %v1341_v20 = vsub.f32 %v1267_v48, %v1317_v17 }
 0x445   : > { %v1311_v21 = vpop.xlane.xlu1 %1310 }
 0x446   : > { %2120 = vpow2.f32 %v1362_v19  ;;  %v1338_v22 = vsub.f32 %v1256_v50, %v1311_v21  ;;  %v1364_v24 = vmul.f32 1.442695, %v1341_v20 }
 0x447   : > { %v1313_v23 = vpop.xlane.xlu0 %1312  ;;  %2122 = vpow2.f32 %v1352_v18 }
 0x448   : > { %v1358_v25 = vmul.f32 1.442695, %v1338_v22  ;;  %v1339_v26 = vsub.f32 %v1259_v52, %v1313_v23 }
 0x449   : > { %v2775_v27 = vpop.eup %2114  ;;  %v1323_v28 = vpop.xlane.xlu1 %1322 }
 0x44a   : > { %2124 = vpow2.f32 %v1358_v25  ;;  %v1344_v29 = vsub.f32 %v1280_v54, %v1323_v28  ;;  %1386 = vadd.xlane.f32.xlu1 %v2775_v27  ;;  %v1360_v31 = vmul.f32 1.442695, %v1339_v26 }
 0x44b   : > { %v1325_v30 = vpop.xlane.xlu0 %1324  ;;  %2126 = vpow2.f32 %v1364_v24 }
 0x44c   : > { %v1370_v32 = vmul.f32 1.442695, %v1344_v29  ;;  %v1345_v33 = vsub.f32 %v2754_v56, %v1325_v30 }
 0x44d   : > { %v2779_v34 = vpop.eup %2116  ;;  %v1319_v35 = vpop.xlane.xlu1 %1318 }
 0x44e   : > { %2128 = vpow2.f32 %v1370_v32  ;;  %v1342_v36 = vsub.f32 %v2756_v58, %v1319_v35  ;;  %1382 = vadd.xlane.f32.xlu1 %v2779_v34  ;;  %v1372_v38 = vmul.f32 1.442695, %v1345_v33 }
 0x44f   : > { %v1321_v37 = vpop.xlane.xlu0 %1320  ;;  %2130 = vpow2.f32 %v1360_v31 }
 0x450   : > { %v1366_v39 = vmul.f32 1.442695, %v1342_v36  ;;  %v1343_v40 = vsub.f32 %v2759_v60, %v1321_v37 }
 0x451   : > { %v2784_v41 = vpop.eup %2118  ;;  %v1327_v42 = vpop.xlane.xlu1 %1326 }
 0x452   : > { %2132 = vpow2.f32 %v1366_v39  ;;  %v1346_v43 = vsub.f32 %v2762_v62, %v1327_v42  ;;  %1388 = vadd.xlane.f32.xlu0 %v2784_v41  ;;  %v1368_v45 = vmul.f32 1.442695, %v1343_v40 }
 0x453   : > { %v2788_v44 = vpop.eup %2120  ;;  %2134 = vpow2.f32 %v1372_v38 }
 0x454   : > { %v1374_v46 = vmul.f32 1.442695, %v1346_v43  ;;  %1394 = vadd.xlane.f32.xlu1 %v2788_v44  ;;  %v2791_v47 = vpop.eup %2122 }
 0x455   : > { %v1331_v48 = vpop.xlane.xlu1 %1330  ;;  %v1329_v49 = vpop.xlane.xlu0 %1328 }
 0x456   : > { %2136 = vpow2.f32 %v1374_v46  ;;  %v1348_v50 = vsub.f32 %v2766_v1, %v1331_v48  ;;  %v1347_v51 = vsub.f32 %v2768_v2, %v1329_v49  ;;  %1384 = vadd.xlane.f32.xlu0 %v2791_v47 }
 0x457   : > { %v2796_v52 = vpop.eup %2124  ;;  %2138 = vpow2.f32 %v1368_v45 }
 0x458   : > { %v1378_v53 = vmul.f32 1.442695, %v1348_v50  ;;  %v1376_v54 = vmul.f32 1.442695, %v1347_v51  ;;  %1390 = vadd.xlane.f32.xlu1 %v2796_v52  ;;  %v2799_v55 = vpop.eup %2126 }
 0x459   : > { %v1333_v56 = vpop.xlane.xlu0 %1332 }
 0x45a   : > { %2140 = vpow2.f32 %v1378_v53  ;;  %v1349_v57 = vsub.f32 %v2772_v3, %v1333_v56  ;;  %1396 = vadd.xlane.f32.xlu0 %v2799_v55 }
 0x45b   : > { %v2803_v58 = vpop.eup %2128  ;;  %2142 = vpow2.f32 %v1376_v54 }
 0x45c   : > { %v1380_v59 = vmul.f32 1.442695, %v1349_v57  ;;  %1402 = vadd.xlane.f32.xlu1 %v2803_v58  ;;  %v2806_v60 = vpop.eup %2130 }
 0x45e   : > { %1392 = vadd.xlane.f32.xlu0 %v2806_v60  ;;  %2144 = vpow2.f32 %v1380_v59 }
 0x45f   : > { %v2809_v61 = vpop.eup %2132 }
 0x460   : > { %1398 = vadd.xlane.f32.xlu1 %v2809_v61  ;;  %v2812_v62 = vpop.eup %2134 }
 0x462   : > { %1404 = vadd.xlane.f32.xlu0 %v2812_v62 }
 0x463   : > { %v2815_v63 = vpop.eup %2136 }
 0x464   : > { %1406 = vadd.xlane.f32.xlu1 %v2815_v63  ;;  %v2818_v0 = vpop.eup %2138 }
 0x466   : > { %1400 = vadd.xlane.f32.xlu0 %v2818_v0 }
 0x467   : > { %v2821_v1 = vpop.eup %2140 }
 0x468   : > { %1410 = vadd.xlane.f32.xlu1 %v2821_v1  ;;  %v2824_v2 = vpop.eup %2142 }
 0x46a   : > { %1408 = vadd.xlane.f32.xlu0 %v2824_v2 }
 0x46b   : > { %v2827_v3 = vpop.eup %2144 }
 0x46e   : > { %1412 = vadd.xlane.f32.xlu0 %v2827_v3 }
 0x4d3   : > { %v1387_v4 = vpop.xlane.xlu1 %1386 }
 0x4d4   : > { %2146 = vrcp.f32 %v1387_v4 }
 0x4d7   : > { %v1383_v5 = vpop.xlane.xlu1 %1382 }
 0x4d8   : > { %2148 = vrcp.f32 %v1383_v5 }
 0x4db   : > { %v1389_v6 = vpop.xlane.xlu0 %1388 }
 0x4dc   : > { %2150 = vrcp.f32 %v1389_v6 }
 0x4dd   : > { %v1395_v7 = vpop.xlane.xlu1 %1394 }
 0x4de   : > { %2152 = vrcp.f32 %v1395_v7 }
 0x4df   : > { %v1385_v8 = vpop.xlane.xlu0 %1384 }
 0x4e0   : > { %2154 = vrcp.f32 %v1385_v8 }
 0x4e1   : > { %v2147_v9 = vpop.eup %2146  ;;  %v1391_v10 = vpop.xlane.xlu1 %1390 }
 0x4e2   : > { %v1419_v11 = vmul.f32 %v2147_v9, %v2775_v27  ;;  %2156 = vrcp.f32 %v1391_v10 }
 0x4e3   : > { %v1397_v12 = vpop.xlane.xlu0 %1396 }
 0x4e4   : > { %1448 = vst [vmem:[%s2648_s0 + $0x10] sm:$0xff] %v1419_v11  ;;  %2158 = vrcp.f32 %v1397_v12 }
 0x4e5   : > { %v2149_v13 = vpop.eup %2148  ;;  %v1403_v14 = vpop.xlane.xlu1 %1402 }
 0x4e6   : > { %v1415_v15 = vmul.f32 %v2149_v13, %v2779_v34  ;;  %2160 = vrcp.f32 %v1403_v14 }
 0x4e7   : > { %v1393_v16 = vpop.xlane.xlu0 %1392 }
 0x4e8   : > { %1446 = vst [vmem:[%s2648_s0] sm:$0xff] %v1415_v15  ;;  %2162 = vrcp.f32 %v1393_v16 }
 0x4e9   : > { %v2151_v17 = vpop.eup %2150  ;;  %v1399_v18 = vpop.xlane.xlu1 %1398 }
 0x4ea   : > { %v1421_v19 = vmul.f32 %v2151_v17, %v2784_v41  ;;  %2164 = vrcp.f32 %v1399_v18 }
 0x4eb   : > { %v2153_v20 = vpop.eup %2152  ;;  %v1405_v21 = vpop.xlane.xlu0 %1404 }
 0x4ec   : > { %1449 = vst [vmem:[%s2648_s0 + $0x18] sm:$0xff] %v1421_v19  ;;  %v1427_v22 = vmul.f32 %v2153_v20, %v2788_v44  ;;  %2166 = vrcp.f32 %v1405_v21 }
 0x4ed   : > { %v2155_v23 = vpop.eup %2154  ;;  %v1407_v24 = vpop.xlane.xlu1 %1406 }
 0x4ee   : > { %1452 = vst [vmem:[%s2648_s0 + $0x30] sm:$0xff] %v1427_v22  ;;  %v1417_v25 = vmul.f32 %v2155_v23, %v2791_v47  ;;  %2168 = vrcp.f32 %v1407_v24 }
 0x4ef   : > { %v2157_v26 = vpop.eup %2156  ;;  %v1401_v27 = vpop.xlane.xlu0 %1400 }
 0x4f0   : > { %1447 = vst [vmem:[%s2648_s0 + $0x8] sm:$0xff] %v1417_v25  ;;  %v1423_v28 = vmul.f32 %v2157_v26, %v2796_v52  ;;  %2170 = vrcp.f32 %v1401_v27 }
 0x4f1   : > { %v2159_v29 = vpop.eup %2158  ;;  %v1411_v30 = vpop.xlane.xlu1 %1410 }
 0x4f2   : > { %1450 = vst [vmem:[%s2648_s0 + $0x20] sm:$0xff] %v1423_v28  ;;  %v1429_v31 = vmul.f32 %v2159_v29, %v2799_v55  ;;  %2172 = vrcp.f32 %v1411_v30 }
 0x4f3   : > { %v2161_v32 = vpop.eup %2160  ;;  %v1409_v33 = vpop.xlane.xlu0 %1408 }
 0x4f4   : > { %1453 = vst [vmem:[%s2648_s0 + $0x38] sm:$0xff] %v1429_v31  ;;  %v1435_v34 = vmul.f32 %v2161_v32, %v2803_v58  ;;  %2174 = vrcp.f32 %v1409_v33 }
 0x4f5   : > { %v2163_v35 = vpop.eup %2162 }
 0x4f6   : > { %1456 = vst [vmem:[%s2648_s0 + $0x50] sm:$0xff] %v1435_v34  ;;  %v1425_v36 = vmul.f32 %v2163_v35, %v2806_v60 }
 0x4f7   : > { %v2165_v37 = vpop.eup %2164  ;;  %v1413_v38 = vpop.xlane.xlu0 %1412 }
 0x4f8   : > { %1451 = vst [vmem:[%s2648_s0 + $0x28] sm:$0xff] %v1425_v36  ;;  %v1431_v39 = vmul.f32 %v2165_v37, %v2809_v61  ;;  %2176 = vrcp.f32 %v1413_v38 }
 0x4f9   : > { %v2167_v40 = vpop.eup %2166 }
 0x4fa   : > { %1454 = vst [vmem:[%s2648_s0 + $0x40] sm:$0xff] %v1431_v39  ;;  %v1437_v41 = vmul.f32 %v2167_v40, %v2812_v62 }
 0x4fb   : > { %v2169_v42 = vpop.eup %2168 }
 0x4fc   : > { %1457 = vst [vmem:[%s2648_s0 + $0x58] sm:$0xff] %v1437_v41  ;;  %v1439_v43 = vmul.f32 %v2169_v42, %v2815_v63 }
 0x4fd   : > { %v2171_v44 = vpop.eup %2170 }
 0x4fe   : > { %1458 = vst [vmem:[%s2648_s0 + $0x60] sm:$0xff] %v1439_v43  ;;  %v1433_v45 = vmul.f32 %v2171_v44, %v2818_v0 }
 0x4ff   : > { %v2173_v46 = vpop.eup %2172 }
 0x500   : > { %1455 = vst [vmem:[%s2648_s0 + $0x48] sm:$0xff] %v1433_v45  ;;  %v1443_v47 = vmul.f32 %v2173_v46, %v2821_v1 }
 0x501   : > { %v2175_v48 = vpop.eup %2174 }
 0x502   : > { %1460 = vst [vmem:[%s2648_s0 + $0x70] sm:$0xff] %v1443_v47  ;;  %v1441_v49 = vmul.f32 %v2175_v48, %v2824_v2 }
 0x504   : > { %1459 = vst [vmem:[%s2648_s0 + $0x68] sm:$0xff] %v1441_v49 }
 0x505   : > { %v2177_v50 = vpop.eup %2176 }
 0x506   : > { %v1445_v51 = vmul.f32 %v2177_v50, %v2827_v3 }
 0x508   : > { %1461 = vst [vmem:[%s2648_s0 + $0x78] sm:$0xff] %v1445_v51 }
 0x509 PF: > { %s2994_s19 = sld [smem:[#allocation13_spill]]  ;;  %s1476_s15 = sshll.u32 %s2648_s0, 4  ;;  %s2869_s15 = int_to_ptr.vmem [resolvable:$true] %s1476_s15 }
 0x50a   : > { %s2995_s17 = sld [smem:[#allocation23_spill]]  ;;  %s2873_s27 = scalar_lea.sflag [#allocation5], %s367_s21 }
 0x50b   : > { %s2234_s22 = scalar_lea.vmem %s2869_s15, 2048  ;;  %s2393_s18 = smov [#allocation8]  }
 0x50c   : > { %p2235_p13 = scmp.ne.s32.totalorder %s2869_s15, %s2234_s22  ;;  %s2238_s5 = sshll.u32 %s2393_s18, 4  ;;  %s2239_s5 = int_to_ptr.vmem [resolvable:$false] %s2238_s5 }
 0x50d   : > { %s2240_s16 = scalar_lea.vmem %s2239_s5, 4096  ;;  %p2241_p0 = scmp.lt.s32.totalorder %s2869_s15, %s2239_s5 }
 0x50e   : > { %p2236_p2 = pnand %p2235_p13, %p2598_p6  ;;  %p2242_p9 = scmp.lt.s32.totalorder %s2240_s16, %s2234_s22 }
 0x50f   : > { %s1674_s11 = sshll.u32 %s2994_s19, 11 }
 0x510   : > { %s2866_s23 = scalar_lea.hbm %s2995_s17, %s1674_s11  ;;  %p2237_p12 = pneg %p2236_p2 }
 0x511   : > { %p2243_p4 = por %p2242_p9, %p2241_p0 }
 0x513   : > { %p2244_p7 = pnand %p2243_p4, %p2237_p12 }
 0x515   : > { %2247 = shalt.err (!%p2244_p7)
}
 0x516   : > { %s2248_s21 = scalar_lea.hbm %s2866_s23, 2048  ;;  %s2252_s11 = scalar_lea.hbm %s2995_s17, 4096 }
 0x517   : > { %p2249_p5 = scmp.ne.s32.totalorder %s2866_s23, %s2248_s21  ;;  %p2253_p11 = scmp.lt.s32.totalorder %s2866_s23, %s2995_s17 }
 0x518   : > { %p2254_p1 = scmp.lt.s32.totalorder %s2252_s11, %s2248_s21 }
 0x519   : > { %p2250_p8 = pnand %p2249_p5, %p2598_p6 }
 0x51a   : > { %p2255_p3 = por %p2254_p1, %p2253_p11 }
 0x51b   : > { %p2251_p10 = pneg %p2250_p8 }
 0x51d   : > { %p2256_p13 = pnand %p2255_p3, %p2251_p10 }
 0x51f   : > { %2259 = shalt.err (!%p2256_p13)
}
 0x520   : > { %s2394_s22 = smov 128   ;;  %s2395_s18 = smov 8  }
 0x521   : > { %1856 = dma.vmem_to_hbm [thread:$0]  (%p2598_p6), %s2869_s15, 2048, %s2866_s23, %s2873_s27, %s2394_s22, %s2394_s22, %s2395_s18  }
 0x522 PF: > { %p1870_p2 = scmp.ge.s32.totalorder %s2382_s14, 2  ;;  %s1491_s5 = sand.u32 1, %s2330_s24  }
 0x523   : > { %p2996_p12 = scmp.ne.s32.totalorder %s2983_s20, 0  ;;  %s1492_s16 = scalar_lea.sflag [#allocation5], %s1491_s5 }
 0x525   : > { %p1866_p0 = pnand %p1870_p2, %p2996_p12 }
 0x527   : > { %p1867_p9 = pneg %p1866_p0 }
 0x529   : > { %2325 = dma.done.wait (%p1867_p9), %s1492_s16, 2048  }
 0x52a   : > { %2327 = vsyncadd (%p1867_p9), %s1492_s16, 4294965248  ;;  %s26_s14 = sadd.s32 1, %s2382_s14   ;;  %s2998_s11 = sld [smem:[#allocation14_spill]] }
 0x52b   : > { %p2901_p4 = scmp.ge.s32.totalorder %s26_s14, 8   ;;  %s2999_s20 = sld [smem:[#allocation15_spill]] }
 0x52c   : > { %s3000_s13 = sld [smem:[#allocation16_spill]]  ;;  %s3001_s24 = smov %s2334_s25 }
 0x52d   : > { %s3002_s25 = smov %s2338_s26  ;;  %s3003_s26 = smov %s2536_s7 }
 0x52e   : > { %s3004_s27 = smov %s2346_s28  ;;  %s3005_s28 = smov %s2350_s29 }
 0x52f   : > { %s3006_s29 = smov %s2582_s10  ;;  %s3007_s30 = smov %s2358_s8 }
 0x530   : > { %s3008_s8 = smov %s2362_s9  ;;  %s3009_s9 = smov %s2539_s6 }
 0x531   : > { %s3010_s10 = smov %s2374_s12  ;;  %s3011_s12 = smov %s2999_s20 }
 0x532   :  { %25 = sbr.rel (!%p2901_p4) target bundleno = 20 (0x14), region = 117 }
 0x537   :  { %1497 = vsyncpa [#allocation4], 1 }
 0x538   :  { %1499 = vsyncpa [#allocation4 + $0x1], 1 }
 0x539   :  { %1500 = vsyncpa [#allocation7], 1 }
 0x53a   :  { %1502 = vsyncpa [#allocation7 + $0x1], 1 }
 0x53b   :  { %1503 = vsyncpa [#allocation5], 1 }
 0x53c   :  { %1505 = vsyncpa [#allocation5 + $0x1], 1 }

</bundles_post_ra>
